<compile_context>
chip_gen: v7x
topology: tpu7x:2x2x1
jax: 0.10.0
libtpu: 0.0.40
codegen_flags: <defaults>
</compile_context>

<pallas_src>
import numpy as np
import jax
import jax.numpy as jnp
from jax.experimental import pallas as pl
from jax.experimental.pallas import tpu as pltpu

P = 128       # TPU lane width
FH = 5        # node feature dim
FE = 11       # edge feature dim
FA = 201      # adduct feature dim (233 - 32)
N_PAD = 8     # node rows padded to a sublane multiple
E_PAD = 16    # edge rows padded to a sublane multiple


# ---------------------------------------------------------------------------
# Fused kernel: 2x MPLayer (sequential per-edge updates) + readout + MLP head.
# ---------------------------------------------------------------------------
def _make_fused_kernel(n_nodes, n_edges):
    inv_n = 1.0 / float(n_nodes)

    def kernel(src_ref, dst_ref,                           # SMEM (E,), (E,)
               h0_ref, h2_ref, ef_ref, add_ref,            # (8,P),(8,P),(16,P),(1,2P)
               vw_ref, vb_ref, ew_ref, eb_ref, uw_ref, ub_ref,   # stacked (2,...)
               rwh_ref, rwh2_ref, rb_ref,                  # readout R (split)
               w1a_ref, w1b_ref, b1_ref, w2_ref, b2_ref, w3_ref, b3_ref,
               emb_ref, x_ref,                             # outputs (1,P),(1,P)
               h_scr, me_scr):                             # VMEM scratch
        f32 = jnp.float32
        h_scr[...] = h0_ref[...]

        # ---------------- two message-passing layers ----------------
        for layer in range(2):                             # static, unrolled
            vw = vw_ref[layer]                             # (P,P) out cols 5..9
            ew = ew_ref[layer]                             # (P,P) out cols 10..20
            uw = uw_ref[layer]                             # (P,P) rows 0..20 -> cols 0..4
            vb = vb_ref[pl.ds(layer, 1), :]                # (1,P)
            eb = eb_ref[pl.ds(layer, 1), :]
            ub = ub_ref[pl.ds(layer, 1), :]

            # Hoisted: E-linear for ALL edges in one MXU pass (independent of h).
            me_scr[...] = jnp.dot(ef_ref[...], ew,
                                  preferred_element_type=f32) + eb

            # Ordered, in-place per-edge updates of h (MPLayer semantics).
            # Fully unrolled: E is small and static.
            for e in range(n_edges):
                v = src_ref[e]
                w = dst_ref[e]
                h_v = h_scr[pl.ds(v, 1), :]                        # lanes 0..4
                h_w = h_scr[pl.ds(w, 1), :]
                m_w = jnp.dot(h_w, vw,
                              preferred_element_type=f32) + vb     # lanes 5..9
                # cat(h[v], m_w, m_e) realized as a single lane-disjoint add.
                packed = h_v + m_w + me_scr[pl.ds(e, 1), :]        # lanes 0..20
                h_scr[pl.ds(v, 1), :] = (
                    jnp.dot(packed, uw, preferred_element_type=f32) + ub)

        # ---------------- readout: R per node, mean over real nodes ----------
        acts = (jnp.dot(h_scr[...], rwh_ref[...], preferred_element_type=f32)
                + jnp.dot(h2_ref[...], rwh2_ref[...], preferred_element_type=f32))
        # padded rows are all-zero pre-bias, so sum/N + bias == masked mean.
        readout = jnp.sum(acts, axis=0, keepdims=True) * inv_n + rb_ref[...]

        r = jnp.maximum(readout, 0.0)                      # relu(readout part)
        a = jnp.maximum(add_ref[...], 0.0)                 # relu(adducts part)
        emb = (jnp.dot(r, w1a_ref[...], preferred_element_type=f32)
               + jnp.dot(a, w1b_ref[...], preferred_element_type=f32)
               + b1_ref[...])                              # fc1 -> (1,P)
        emb_ref[...] = emb

        x = jnp.dot(jnp.maximum(emb, 0.0), w2_ref[...],
                    preferred_element_type=f32) + b2_ref[...]      # fc2
        x = jnp.dot(jnp.maximum(x, 0.0), w3_ref[...],
                    preferred_element_type=f32) + b3_ref[...]      # fc3
        x_ref[...] = x

    return kernel


def model_forward(edge_src, edge_dst, h0_pad, h2_pad, ef_pad, add_pad,
                  vw_s, vb_s, ew_s, eb_s, uw_s, ub_s,
                  rwh, rwh2, rb_p, w1a, w1b, b1_p, w2_p, b2_p, w3_p, b3_p,
                  *, n_nodes, n_edges):
    kernel = _make_fused_kernel(n_nodes, n_edges)
    smem = pl.BlockSpec(memory_space=pltpu.MemorySpace.SMEM)
    vmem = pl.BlockSpec(memory_space=pltpu.MemorySpace.VMEM)
    return pl.pallas_call(
        kernel,
        out_shape=(jax.ShapeDtypeStruct((1, P), jnp.float32),   # embedding
                   jax.ShapeDtypeStruct((1, P), jnp.float32)),  # final x (lane 0)
        in_specs=[smem, smem] + [vmem] * 20,
        out_specs=(vmem, vmem),
        scratch_shapes=[pltpu.VMEM((h0_pad.shape[0], P), jnp.float32),   # h
                        pltpu.VMEM((ef_pad.shape[0], P), jnp.float32)],  # M_E
    )(edge_src, edge_dst, h0_pad, h2_pad, ef_pad, add_pad,
      vw_s, vb_s, ew_s, eb_s, uw_s, ub_s,
      rwh, rwh2, rb_p, w1a, w1b, b1_p, w2_p, b2_p, w3_p, b3_p)


# ---------------------------------------------------------------------------
# Parameter construction & lane packing.
# ---------------------------------------------------------------------------
def linear_params(key, fan_in, fan_out):
    kw, kb = jax.random.split(key)
    bound = 1.0 / np.sqrt(fan_in)
    w = jax.random.uniform(kw, (fan_in, fan_out), jnp.float32, -bound, bound)
    b = jax.random.uniform(kb, (fan_out,), jnp.float32, -bound, bound)
    return w, b                       # y = x @ w + b  (w = torch weight.T)


def mp_layer_params(kv, ke, ku):
    vw, vb = linear_params(kv, FH, FH)
    ew, eb = linear_params(ke, FE, FE)
    uw, ub = linear_params(ku, 2 * FH + FE, FH)
    return vw, vb, ew, eb, uw, ub


def place(shape, blocks):
    out = jnp.zeros(shape, jnp.float32)
    for (r, c, a) in blocks:
        out = out.at[r:r + a.shape[0], c:c + a.shape[1]].set(a)
    return out


def pad_row(v, col, width):
    return jnp.zeros((width,), jnp.float32).at[col:col + v.shape[0]].set(v)


def pack_mp_layer(vw, vb, ew, eb, uw, ub):
    # Shift V's output into lanes 5..9 and E's into lanes 10..20 so that the
    # concatenation for U is a single lane-disjoint add of 128-lane rows.
    vw_p = place((P, P), [(0, FH, vw)])            # rows 0..4  -> cols 5..9
    ew_p = place((P, P), [(0, 2 * FH, ew)])        # rows 0..10 -> cols 10..20
    uw_p = place((P, P), [(0, 0, uw)])             # rows 0..20 -> cols 0..4
    vb_p = pad_row(vb, FH, P)
    eb_p = pad_row(eb, 2 * FH, P)
    ub_p = pad_row(ub, 0, P)
    return vw_p, vb_p, ew_p, eb_p, uw_p, ub_p


# ---------------------------------------------------------------------------
# Pure-numpy reference of the PyTorch forward (correctness check).
# ---------------------------------------------------------------------------
def ref_forward(adducts, es, ed, ef, h0, h2, prm):
    h = np.array(h0, dtype=np.float32)
    ef = np.asarray(ef); h2n = np.asarray(h2); adductsn = np.asarray(adducts)
    for layer in (prm["layer1"], prm["layer2"]):
        vw, vb, ew, eb, uw, ub = (np.asarray(p) for p in layer)
        for e in range(len(es)):                      # MPLayer.forward semantics
            v, w = int(es[e]), int(ed[e])
            m_w = h[w] @ vw + vb
            m_e = ef[e] @ ew + eb
            cat = np.concatenate([h[v], m_w, m_e])
            h[v] = cat @ uw + ub
    catted = np.concatenate([h, h2n], axis=1)
    rw, rb = (np.asarray(p) for p in prm["R"])
    readout = (catted @ rw + rb).mean(axis=0)
    readout = np.concatenate([readout, adductsn])
    x = np.maximum(readout, 0.0)
    w1, b1 = (np.asarray(p) for p in prm["fc1"]); emb = x @ w1 + b1
    x = np.maximum(emb, 0.0)
    w2, b2 = (np.asarray(p) for p in prm["fc2"]); x = x @ w2 + b2
    x = np.maximum(x, 0.0)
    w3, b3 = (np.asarray(p) for p in prm["fc3"]); x = x @ w3 + b3
    return emb, x


# ---------------------------------------------------------------------------
def main():
    keys = jax.random.split(jax.random.PRNGKey(0), 16)

    prm = {
        "layer1": mp_layer_params(keys[0], keys[1], keys[2]),
        "layer2": mp_layer_params(keys[3], keys[4], keys[5]),
        "R":   linear_params(keys[6], 2 * FH, 32),
        "fc1": linear_params(keys[7], 233, P),
        "fc2": linear_params(keys[8], P, 32),
        "fc3": linear_params(keys[9], 32, 1),
    }

    # --- graph (host-side structure, as in the PyTorch dict-of-lists g) ---
    N = 6
    edge_src, edge_dst = [], []
    for v in range(N):                          # iteration order == dict order
        for w in ((v + 1) % N, (v + 2) % N):
            edge_src.append(v)
            edge_dst.append(w)
    E = len(edge_src)
    edge_src = jnp.asarray(edge_src, jnp.int32)
    edge_dst = jnp.asarray(edge_dst, jnp.int32)

    h0 = jax.random.normal(keys[10], (N, FH), jnp.float32) * 0.5
    h2 = jax.random.normal(keys[11], (N, FH), jnp.float32) * 0.5
    ef = jax.random.normal(keys[12], (E, FE), jnp.float32) * 0.5
    adducts = jax.random.normal(keys[13], (FA,), jnp.float32) * 0.5

    # --- pad inputs to lane-dense / sublane-aligned layouts ---
    h0_pad = place((N_PAD, P), [(0, 0, h0)])
    h2_pad = place((N_PAD, P), [(0, 0, h2)])
    ef_pad = place((E_PAD, P), [(0, 0, ef)])
    add_pad = place((1, 2 * P), [(0, 0, adducts[None])])

    l1 = pack_mp_layer(*prm["layer1"])
    l2 = pack_mp_layer(*prm["layer2"])
    vw_s, vb_s, ew_s, eb_s, uw_s, ub_s = (jnp.stack([a, b]) for a, b in zip(l1, l2))

    rw, rb = prm["R"]
    rwh = place((P, P), [(0, 0, rw[0:FH])])          # h  part of R
    rwh2 = place((P, P), [(0, 0, rw[FH:2 * FH])])    # h2 part of R
    rb_p = pad_row(rb, 0, P)[None, :]

    w1, b1 = prm["fc1"]
    w1a = place((P, P), [(0, 0, w1[0:32])])          # readout (32) rows
    w1b = place((2 * P, P), [(0, 0, w1[32:233])])    # adducts (201) rows
    b1_p = pad_row(b1, 0, P)[None, :]
    w2, b2 = prm["fc2"]
    w2_p = place((P, P), [(0, 0, w2)])
    b2_p = pad_row(b2, 0, P)[None, :]
    w3, b3 = prm["fc3"]
    w3_p = place((P, P), [(0, 0, w3)])
    b3_p = pad_row(b3, 0, P)[None, :]

    # --- single fused Pallas kernel: layer1 + layer2 + readout + MLP ---
    emb_pad, x_pad = model_forward(
        edge_src, edge_dst, h0_pad, h2_pad, ef_pad, add_pad,
        vw_s, vb_s, ew_s, eb_s, uw_s, ub_s,
        rwh, rwh2, rb_p, w1a, w1b, b1_p, w2_p, b2_p, w3_p, b3_p,
        n_nodes=N, n_edges=E)

    embedding = emb_pad[0, :128]
    x_out = x_pad[0, :1]
    jax.block_until_ready((embedding, x_out))

    # --- reference check ---
    emb_ref, x_ref = ref_forward(adducts, np.asarray(edge_src),
                                 np.asarray(edge_dst), ef, h0, h2, prm)
    np.testing.assert_allclose(np.asarray(embedding), emb_ref, rtol=5e-2, atol=5e-2)
    np.testing.assert_allclose(np.asarray(x_out), x_ref, rtol=5e-2, atol=5e-2)
    assert embedding.shape == (128,) and x_out.shape == (1,)

    print("KERNEL_OK")


if __name__ == "__main__":
    main()
</pallas_src>

<mosaic_0001>
module attributes {stable_mosaic.version = 11 : i64} {
  func.func @kernel(%arg0: memref<12xi32, #tpu.memory_space<smem>>, %arg1: memref<12xi32, #tpu.memory_space<smem>>, %arg2: memref<8x128xf32, #tpu.memory_space<vmem>>, %arg3: memref<8x128xf32, #tpu.memory_space<vmem>>, %arg4: memref<16x128xf32, #tpu.memory_space<vmem>>, %arg5: memref<1x256xf32, #tpu.memory_space<vmem>>, %arg6: memref<2x128x128xf32, #tpu.memory_space<vmem>>, %arg7: memref<2x128xf32, #tpu.memory_space<vmem>>, %arg8: memref<2x128x128xf32, #tpu.memory_space<vmem>>, %arg9: memref<2x128xf32, #tpu.memory_space<vmem>>, %arg10: memref<2x128x128xf32, #tpu.memory_space<vmem>>, %arg11: memref<2x128xf32, #tpu.memory_space<vmem>>, %arg12: memref<128x128xf32, #tpu.memory_space<vmem>>, %arg13: memref<128x128xf32, #tpu.memory_space<vmem>>, %arg14: memref<1x128xf32, #tpu.memory_space<vmem>>, %arg15: memref<128x128xf32, #tpu.memory_space<vmem>>, %arg16: memref<256x128xf32, #tpu.memory_space<vmem>>, %arg17: memref<1x128xf32, #tpu.memory_space<vmem>>, %arg18: memref<128x128xf32, #tpu.memory_space<vmem>>, %arg19: memref<1x128xf32, #tpu.memory_space<vmem>>, %arg20: memref<128x128xf32, #tpu.memory_space<vmem>>, %arg21: memref<1x128xf32, #tpu.memory_space<vmem>>, %arg22: memref<1x128xf32, #tpu.memory_space<vmem>>, %arg23: memref<1x128xf32, #tpu.memory_space<vmem>>, %arg24: memref<8x128xf32, #tpu.memory_space<vmem>>, %arg25: memref<16x128xf32, #tpu.memory_space<vmem>>) attributes {dimension_semantics = [], scalar_prefetch = 0 : i64, scratch_operands = 2 : i64, tpu.core_type = #tpu.core_type<tc>} {
    %c0 = arith.constant 0 : index
    %c0_0 = arith.constant 0 : index
    %0 = vector.load %arg2[%c0, %c0_0] : memref<8x128xf32, #tpu.memory_space<vmem>>, vector<8x128xf32>
    %c0_1 = arith.constant 0 : index
    %c0_2 = arith.constant 0 : index
    %1 = vector.load %arg24[%c0_1, %c0_2] : memref<8x128xf32, #tpu.memory_space<vmem>>, vector<8x128xf32>
    tpu.vector_store %arg24[%c0_1, %c0_2], %0 {strides = array<i32>} : memref<8x128xf32, #tpu.memory_space<vmem>>, vector<8x128xf32>,
    %c0_3 = arith.constant 0 : index
    %c0_4 = arith.constant 0 : index
    %c0_5 = arith.constant 0 : index
    %2 = vector.load %arg6[%c0_3, %c0_4, %c0_5] : memref<2x128x128xf32, #tpu.memory_space<vmem>>, vector<1x128x128xf32>
    %3 = vector.shape_cast %2 : vector<1x128x128xf32> to vector<128x128xf32>
    %c0_6 = arith.constant 0 : index
    %c0_7 = arith.constant 0 : index
    %c0_8 = arith.constant 0 : index
    %4 = vector.load %arg8[%c0_6, %c0_7, %c0_8] : memref<2x128x128xf32, #tpu.memory_space<vmem>>, vector<1x128x128xf32>
    %5 = vector.shape_cast %4 : vector<1x128x128xf32> to vector<128x128xf32>
    %c0_9 = arith.constant 0 : index
    %c0_10 = arith.constant 0 : index
    %c0_11 = arith.constant 0 : index
    %6 = vector.load %arg10[%c0_9, %c0_10, %c0_11] : memref<2x128x128xf32, #tpu.memory_space<vmem>>, vector<1x128x128xf32>
    %7 = vector.shape_cast %6 : vector<1x128x128xf32> to vector<128x128xf32>
    %c0_12 = arith.constant 0 : index
    %c0_13 = arith.constant 0 : index
    %8 = vector.load %arg7[%c0_12, %c0_13] : memref<2x128xf32, #tpu.memory_space<vmem>>, vector<1x128xf32>
    %c0_14 = arith.constant 0 : index
    %c0_15 = arith.constant 0 : index
    %9 = vector.load %arg9[%c0_14, %c0_15] : memref<2x128xf32, #tpu.memory_space<vmem>>, vector<1x128xf32>
    %c0_16 = arith.constant 0 : index
    %c0_17 = arith.constant 0 : index
    %10 = vector.load %arg11[%c0_16, %c0_17] : memref<2x128xf32, #tpu.memory_space<vmem>>, vector<1x128xf32>
    %c0_18 = arith.constant 0 : index
    %c0_19 = arith.constant 0 : index
    %11 = vector.load %arg4[%c0_18, %c0_19] : memref<16x128xf32, #tpu.memory_space<vmem>>, vector<16x128xf32>
    %cst = arith.constant dense<0.000000e+00> : vector<16x128xf32>
    %12 = tpu.matmul %11, %5, %cst {dimension_numbers = #tpu.dot_dimension_numbers<[1], [0], [0], [1], [0, 0, 1, 1], [], []>} : vector<16x128xf32>, vector<128x128xf32>, vector<16x128xf32> -> vector<16x128xf32>
    %13 = vector.broadcast %9 : vector<1x128xf32> to vector<16x128xf32>
    %14 = arith.addf %12, %13 : vector<16x128xf32>
    %c0_20 = arith.constant 0 : index
    %c0_21 = arith.constant 0 : index
    %15 = vector.load %arg25[%c0_20, %c0_21] : memref<16x128xf32, #tpu.memory_space<vmem>>, vector<16x128xf32>
    tpu.vector_store %arg25[%c0_20, %c0_21], %14 {strides = array<i32>} : memref<16x128xf32, #tpu.memory_space<vmem>>, vector<16x128xf32>,
    %c0_22 = arith.constant 0 : index
    %16 = memref.load %arg0[%c0_22] : memref<12xi32, #tpu.memory_space<smem>>
    %c0_23 = arith.constant 0 : index
    %17 = memref.load %arg1[%c0_23] : memref<12xi32, #tpu.memory_space<smem>>
    %18 = arith.index_cast %16 : i32 to index
    %c0_24 = arith.constant 0 : index
    %19 = vector.load %arg24[%18, %c0_24] : memref<8x128xf32, #tpu.memory_space<vmem>>, vector<1x128xf32>
    %20 = arith.index_cast %17 : i32 to index
    %c0_25 = arith.constant 0 : index
    %21 = vector.load %arg24[%20, %c0_25] : memref<8x128xf32, #tpu.memory_space<vmem>>, vector<1x128xf32>
    %cst_26 = arith.constant dense<0.000000e+00> : vector<1x128xf32>
    %22 = tpu.matmul %21, %3, %cst_26 {dimension_numbers = #tpu.dot_dimension_numbers<[1], [0], [0], [1], [0, 0, 1, 1], [], []>} : vector<1x128xf32>, vector<128x128xf32>, vector<1x128xf32> -> vector<1x128xf32>
    %23 = arith.addf %22, %8 : vector<1x128xf32>
    %24 = arith.addf %19, %23 : vector<1x128xf32>
    %c0_27 = arith.constant 0 : index
    %c0_28 = arith.constant 0 : index
    %25 = vector.load %arg25[%c0_27, %c0_28] : memref<16x128xf32, #tpu.memory_space<vmem>>, vector<1x128xf32>
    %26 = arith.addf %24, %25 : vector<1x128xf32>
    %cst_29 = arith.constant dense<0.000000e+00> : vector<1x128xf32>
    %27 = tpu.matmul %26, %7, %cst_29 {dimension_numbers = #tpu.dot_dimension_numbers<[1], [0], [0], [1], [0, 0, 1, 1], [], []>} : vector<1x128xf32>, vector<128x128xf32>, vector<1x128xf32> -> vector<1x128xf32>
    %28 = arith.addf %27, %10 : vector<1x128xf32>
    %29 = arith.index_cast %16 : i32 to index
    %c0_30 = arith.constant 0 : index
    %30 = vector.load %arg24[%29, %c0_30] : memref<8x128xf32, #tpu.memory_space<vmem>>, vector<1x128xf32>
    tpu.vector_store %arg24[%29, %c0_30], %28 {strides = array<i32>} : memref<8x128xf32, #tpu.memory_space<vmem>>, vector<1x128xf32>,
    %c1 = arith.constant 1 : index
    %31 = memref.load %arg0[%c1] : memref<12xi32, #tpu.memory_space<smem>>
    %c1_31 = arith.constant 1 : index
    %32 = memref.load %arg1[%c1_31] : memref<12xi32, #tpu.memory_space<smem>>
    %33 = arith.index_cast %31 : i32 to index
    %c0_32 = arith.constant 0 : index
    %34 = vector.load %arg24[%33, %c0_32] : memref<8x128xf32, #tpu.memory_space<vmem>>, vector<1x128xf32>
    %35 = arith.index_cast %32 : i32 to index
    %c0_33 = arith.constant 0 : index
    %36 = vector.load %arg24[%35, %c0_33] : memref<8x128xf32, #tpu.memory_space<vmem>>, vector<1x128xf32>
    %cst_34 = arith.constant dense<0.000000e+00> : vector<1x128xf32>
    %37 = tpu.matmul %36, %3, %cst_34 {dimension_numbers = #tpu.dot_dimension_numbers<[1], [0], [0], [1], [0, 0, 1, 1], [], []>} : vector<1x128xf32>, vector<128x128xf32>, vector<1x128xf32> -> vector<1x128xf32>
    %38 = arith.addf %37, %8 : vector<1x128xf32>
    %39 = arith.addf %34, %38 : vector<1x128xf32>
    %c1_35 = arith.constant 1 : index
    %c0_36 = arith.constant 0 : index
    %40 = vector.load %arg25[%c1_35, %c0_36] : memref<16x128xf32, #tpu.memory_space<vmem>>, vector<1x128xf32>
    %41 = arith.addf %39, %40 : vector<1x128xf32>
    %cst_37 = arith.constant dense<0.000000e+00> : vector<1x128xf32>
    %42 = tpu.matmul %41, %7, %cst_37 {dimension_numbers = #tpu.dot_dimension_numbers<[1], [0], [0], [1], [0, 0, 1, 1], [], []>} : vector<1x128xf32>, vector<128x128xf32>, vector<1x128xf32> -> vector<1x128xf32>
    %43 = arith.addf %42, %10 : vector<1x128xf32>
    %44 = arith.index_cast %31 : i32 to index
    %c0_38 = arith.constant 0 : index
    %45 = vector.load %arg24[%44, %c0_38] : memref<8x128xf32, #tpu.memory_space<vmem>>, vector<1x128xf32>
    tpu.vector_store %arg24[%44, %c0_38], %43 {strides = array<i32>} : memref<8x128xf32, #tpu.memory_space<vmem>>, vector<1x128xf32>,
    %c2 = arith.constant 2 : index
    %46 = memref.load %arg0[%c2] : memref<12xi32, #tpu.memory_space<smem>>
    %c2_39 = arith.constant 2 : index
    %47 = memref.load %arg1[%c2_39] : memref<12xi32, #tpu.memory_space<smem>>
    %48 = arith.index_cast %46 : i32 to index
    %c0_40 = arith.constant 0 : index
    %49 = vector.load %arg24[%48, %c0_40] : memref<8x128xf32, #tpu.memory_space<vmem>>, vector<1x128xf32>
    %50 = arith.index_cast %47 : i32 to index
    %c0_41 = arith.constant 0 : index
    %51 = vector.load %arg24[%50, %c0_41] : memref<8x128xf32, #tpu.memory_space<vmem>>, vector<1x128xf32>
    %cst_42 = arith.constant dense<0.000000e+00> : vector<1x128xf32>
    %52 = tpu.matmul %51, %3, %cst_42 {dimension_numbers = #tpu.dot_dimension_numbers<[1], [0], [0], [1], [0, 0, 1, 1], [], []>} : vector<1x128xf32>, vector<128x128xf32>, vector<1x128xf32> -> vector<1x128xf32>
    %53 = arith.addf %52, %8 : vector<1x128xf32>
    %54 = arith.addf %49, %53 : vector<1x128xf32>
    %c2_43 = arith.constant 2 : index
    %c0_44 = arith.constant 0 : index
    %55 = vector.load %arg25[%c2_43, %c0_44] : memref<16x128xf32, #tpu.memory_space<vmem>>, vector<1x128xf32>
    %56 = arith.addf %54, %55 : vector<1x128xf32>
    %cst_45 = arith.constant dense<0.000000e+00> : vector<1x128xf32>
    %57 = tpu.matmul %56, %7, %cst_45 {dimension_numbers = #tpu.dot_dimension_numbers<[1], [0], [0], [1], [0, 0, 1, 1], [], []>} : vector<1x128xf32>, vector<128x128xf32>, vector<1x128xf32> -> vector<1x128xf32>
    %58 = arith.addf %57, %10 : vector<1x128xf32>
    %59 = arith.index_cast %46 : i32 to index
    %c0_46 = arith.constant 0 : index
    %60 = vector.load %arg24[%59, %c0_46] : memref<8x128xf32, #tpu.memory_space<vmem>>, vector<1x128xf32>
    tpu.vector_store %arg24[%59, %c0_46], %58 {strides = array<i32>} : memref<8x128xf32, #tpu.memory_space<vmem>>, vector<1x128xf32>,
    %c3 = arith.constant 3 : index
    %61 = memref.load %arg0[%c3] : memref<12xi32, #tpu.memory_space<smem>>
    %c3_47 = arith.constant 3 : index
    %62 = memref.load %arg1[%c3_47] : memref<12xi32, #tpu.memory_space<smem>>
    %63 = arith.index_cast %61 : i32 to index
    %c0_48 = arith.constant 0 : index
    %64 = vector.load %arg24[%63, %c0_48] : memref<8x128xf32, #tpu.memory_space<vmem>>, vector<1x128xf32>
    %65 = arith.index_cast %62 : i32 to index
    %c0_49 = arith.constant 0 : index
    %66 = vector.load %arg24[%65, %c0_49] : memref<8x128xf32, #tpu.memory_space<vmem>>, vector<1x128xf32>
    %cst_50 = arith.constant dense<0.000000e+00> : vector<1x128xf32>
    %67 = tpu.matmul %66, %3, %cst_50 {dimension_numbers = #tpu.dot_dimension_numbers<[1], [0], [0], [1], [0, 0, 1, 1], [], []>} : vector<1x128xf32>, vector<128x128xf32>, vector<1x128xf32> -> vector<1x128xf32>
    %68 = arith.addf %67, %8 : vector<1x128xf32>
    %69 = arith.addf %64, %68 : vector<1x128xf32>
    %c3_51 = arith.constant 3 : index
    %c0_52 = arith.constant 0 : index
    %70 = vector.load %arg25[%c3_51, %c0_52] : memref<16x128xf32, #tpu.memory_space<vmem>>, vector<1x128xf32>
    %71 = arith.addf %69, %70 : vector<1x128xf32>
    %cst_53 = arith.constant dense<0.000000e+00> : vector<1x128xf32>
    %72 = tpu.matmul %71, %7, %cst_53 {dimension_numbers = #tpu.dot_dimension_numbers<[1], [0], [0], [1], [0, 0, 1, 1], [], []>} : vector<1x128xf32>, vector<128x128xf32>, vector<1x128xf32> -> vector<1x128xf32>
    %73 = arith.addf %72, %10 : vector<1x128xf32>
    %74 = arith.index_cast %61 : i32 to index
    %c0_54 = arith.constant 0 : index
    %75 = vector.load %arg24[%74, %c0_54] : memref<8x128xf32, #tpu.memory_space<vmem>>, vector<1x128xf32>
    tpu.vector_store %arg24[%74, %c0_54], %73 {strides = array<i32>} : memref<8x128xf32, #tpu.memory_space<vmem>>, vector<1x128xf32>,
    %c4 = arith.constant 4 : index
    %76 = memref.load %arg0[%c4] : memref<12xi32, #tpu.memory_space<smem>>
    %c4_55 = arith.constant 4 : index
    %77 = memref.load %arg1[%c4_55] : memref<12xi32, #tpu.memory_space<smem>>
    %78 = arith.index_cast %76 : i32 to index
    %c0_56 = arith.constant 0 : index
    %79 = vector.load %arg24[%78, %c0_56] : memref<8x128xf32, #tpu.memory_space<vmem>>, vector<1x128xf32>
    %80 = arith.index_cast %77 : i32 to index
    %c0_57 = arith.constant 0 : index
    %81 = vector.load %arg24[%80, %c0_57] : memref<8x128xf32, #tpu.memory_space<vmem>>, vector<1x128xf32>
    %cst_58 = arith.constant dense<0.000000e+00> : vector<1x128xf32>
    %82 = tpu.matmul %81, %3, %cst_58 {dimension_numbers = #tpu.dot_dimension_numbers<[1], [0], [0], [1], [0, 0, 1, 1], [], []>} : vector<1x128xf32>, vector<128x128xf32>, vector<1x128xf32> -> vector<1x128xf32>
    %83 = arith.addf %82, %8 : vector<1x128xf32>
    %84 = arith.addf %79, %83 : vector<1x128xf32>
    %c4_59 = arith.constant 4 : index
    %c0_60 = arith.constant 0 : index
    %85 = vector.load %arg25[%c4_59, %c0_60] : memref<16x128xf32, #tpu.memory_space<vmem>>, vector<1x128xf32>
    %86 = arith.addf %84, %85 : vector<1x128xf32>
    %cst_61 = arith.constant dense<0.000000e+00> : vector<1x128xf32>
    %87 = tpu.matmul %86, %7, %cst_61 {dimension_numbers = #tpu.dot_dimension_numbers<[1], [0], [0], [1], [0, 0, 1, 1], [], []>} : vector<1x128xf32>, vector<128x128xf32>, vector<1x128xf32> -> vector<1x128xf32>
    %88 = arith.addf %87, %10 : vector<1x128xf32>
    %89 = arith.index_cast %76 : i32 to index
    %c0_62 = arith.constant 0 : index
    %90 = vector.load %arg24[%89, %c0_62] : memref<8x128xf32, #tpu.memory_space<vmem>>, vector<1x128xf32>
    tpu.vector_store %arg24[%89, %c0_62], %88 {strides = array<i32>} : memref<8x128xf32, #tpu.memory_space<vmem>>, vector<1x128xf32>,
    %c5 = arith.constant 5 : index
    %91 = memref.load %arg0[%c5] : memref<12xi32, #tpu.memory_space<smem>>
    %c5_63 = arith.constant 5 : index
    %92 = memref.load %arg1[%c5_63] : memref<12xi32, #tpu.memory_space<smem>>
    %93 = arith.index_cast %91 : i32 to index
    %c0_64 = arith.constant 0 : index
    %94 = vector.load %arg24[%93, %c0_64] : memref<8x128xf32, #tpu.memory_space<vmem>>, vector<1x128xf32>
    %95 = arith.index_cast %92 : i32 to index
    %c0_65 = arith.constant 0 : index
    %96 = vector.load %arg24[%95, %c0_65] : memref<8x128xf32, #tpu.memory_space<vmem>>, vector<1x128xf32>
    %cst_66 = arith.constant dense<0.000000e+00> : vector<1x128xf32>
    %97 = tpu.matmul %96, %3, %cst_66 {dimension_numbers = #tpu.dot_dimension_numbers<[1], [0], [0], [1], [0, 0, 1, 1], [], []>} : vector<1x128xf32>, vector<128x128xf32>, vector<1x128xf32> -> vector<1x128xf32>
    %98 = arith.addf %97, %8 : vector<1x128xf32>
    %99 = arith.addf %94, %98 : vector<1x128xf32>
    %c5_67 = arith.constant 5 : index
    %c0_68 = arith.constant 0 : index
    %100 = vector.load %arg25[%c5_67, %c0_68] : memref<16x128xf32, #tpu.memory_space<vmem>>, vector<1x128xf32>
    %101 = arith.addf %99, %100 : vector<1x128xf32>
    %cst_69 = arith.constant dense<0.000000e+00> : vector<1x128xf32>
    %102 = tpu.matmul %101, %7, %cst_69 {dimension_numbers = #tpu.dot_dimension_numbers<[1], [0], [0], [1], [0, 0, 1, 1], [], []>} : vector<1x128xf32>, vector<128x128xf32>, vector<1x128xf32> -> vector<1x128xf32>
    %103 = arith.addf %102, %10 : vector<1x128xf32>
    %104 = arith.index_cast %91 : i32 to index
    %c0_70 = arith.constant 0 : index
    %105 = vector.load %arg24[%104, %c0_70] : memref<8x128xf32, #tpu.memory_space<vmem>>, vector<1x128xf32>
    tpu.vector_store %arg24[%104, %c0_70], %103 {strides = array<i32>} : memref<8x128xf32, #tpu.memory_space<vmem>>, vector<1x128xf32>,
    %c6 = arith.constant 6 : index
    %106 = memref.load %arg0[%c6] : memref<12xi32, #tpu.memory_space<smem>>
    %c6_71 = arith.constant 6 : index
    %107 = memref.load %arg1[%c6_71] : memref<12xi32, #tpu.memory_space<smem>>
    %108 = arith.index_cast %106 : i32 to index
    %c0_72 = arith.constant 0 : index
    %109 = vector.load %arg24[%108, %c0_72] : memref<8x128xf32, #tpu.memory_space<vmem>>, vector<1x128xf32>
    %110 = arith.index_cast %107 : i32 to index
    %c0_73 = arith.constant 0 : index
    %111 = vector.load %arg24[%110, %c0_73] : memref<8x128xf32, #tpu.memory_space<vmem>>, vector<1x128xf32>
    %cst_74 = arith.constant dense<0.000000e+00> : vector<1x128xf32>
    %112 = tpu.matmul %111, %3, %cst_74 {dimension_numbers = #tpu.dot_dimension_numbers<[1], [0], [0], [1], [0, 0, 1, 1], [], []>} : vector<1x128xf32>, vector<128x128xf32>, vector<1x128xf32> -> vector<1x128xf32>
    %113 = arith.addf %112, %8 : vector<1x128xf32>
    %114 = arith.addf %109, %113 : vector<1x128xf32>
    %c6_75 = arith.constant 6 : index
    %c0_76 = arith.constant 0 : index
    %115 = vector.load %arg25[%c6_75, %c0_76] : memref<16x128xf32, #tpu.memory_space<vmem>>, vector<1x128xf32>
    %116 = arith.addf %114, %115 : vector<1x128xf32>
    %cst_77 = arith.constant dense<0.000000e+00> : vector<1x128xf32>
    %117 = tpu.matmul %116, %7, %cst_77 {dimension_numbers = #tpu.dot_dimension_numbers<[1], [0], [0], [1], [0, 0, 1, 1], [], []>} : vector<1x128xf32>, vector<128x128xf32>, vector<1x128xf32> -> vector<1x128xf32>
    %118 = arith.addf %117, %10 : vector<1x128xf32>
    %119 = arith.index_cast %106 : i32 to index
    %c0_78 = arith.constant 0 : index
    %120 = vector.load %arg24[%119, %c0_78] : memref<8x128xf32, #tpu.memory_space<vmem>>, vector<1x128xf32>
    tpu.vector_store %arg24[%119, %c0_78], %118 {strides = array<i32>} : memref<8x128xf32, #tpu.memory_space<vmem>>, vector<1x128xf32>,
    %c7 = arith.constant 7 : index
    %121 = memref.load %arg0[%c7] : memref<12xi32, #tpu.memory_space<smem>>
    %c7_79 = arith.constant 7 : index
    %122 = memref.load %arg1[%c7_79] : memref<12xi32, #tpu.memory_space<smem>>
    %123 = arith.index_cast %121 : i32 to index
    %c0_80 = arith.constant 0 : index
    %124 = vector.load %arg24[%123, %c0_80] : memref<8x128xf32, #tpu.memory_space<vmem>>, vector<1x128xf32>
    %125 = arith.index_cast %122 : i32 to index
    %c0_81 = arith.constant 0 : index
    %126 = vector.load %arg24[%125, %c0_81] : memref<8x128xf32, #tpu.memory_space<vmem>>, vector<1x128xf32>
    %cst_82 = arith.constant dense<0.000000e+00> : vector<1x128xf32>
    %127 = tpu.matmul %126, %3, %cst_82 {dimension_numbers = #tpu.dot_dimension_numbers<[1], [0], [0], [1], [0, 0, 1, 1], [], []>} : vector<1x128xf32>, vector<128x128xf32>, vector<1x128xf32> -> vector<1x128xf32>
    %128 = arith.addf %127, %8 : vector<1x128xf32>
    %129 = arith.addf %124, %128 : vector<1x128xf32>
    %c7_83 = arith.constant 7 : index
    %c0_84 = arith.constant 0 : index
    %130 = vector.load %arg25[%c7_83, %c0_84] : memref<16x128xf32, #tpu.memory_space<vmem>>, vector<1x128xf32>
    %131 = arith.addf %129, %130 : vector<1x128xf32>
    %cst_85 = arith.constant dense<0.000000e+00> : vector<1x128xf32>
    %132 = tpu.matmul %131, %7, %cst_85 {dimension_numbers = #tpu.dot_dimension_numbers<[1], [0], [0], [1], [0, 0, 1, 1], [], []>} : vector<1x128xf32>, vector<128x128xf32>, vector<1x128xf32> -> vector<1x128xf32>
    %133 = arith.addf %132, %10 : vector<1x128xf32>
    %134 = arith.index_cast %121 : i32 to index
    %c0_86 = arith.constant 0 : index
    %135 = vector.load %arg24[%134, %c0_86] : memref<8x128xf32, #tpu.memory_space<vmem>>, vector<1x128xf32>
    tpu.vector_store %arg24[%134, %c0_86], %133 {strides = array<i32>} : memref<8x128xf32, #tpu.memory_space<vmem>>, vector<1x128xf32>,
    %c8 = arith.constant 8 : index
    %136 = memref.load %arg0[%c8] : memref<12xi32, #tpu.memory_space<smem>>
    %c8_87 = arith.constant 8 : index
    %137 = memref.load %arg1[%c8_87] : memref<12xi32, #tpu.memory_space<smem>>
    %138 = arith.index_cast %136 : i32 to index
    %c0_88 = arith.constant 0 : index
    %139 = vector.load %arg24[%138, %c0_88] : memref<8x128xf32, #tpu.memory_space<vmem>>, vector<1x128xf32>
    %140 = arith.index_cast %137 : i32 to index
    %c0_89 = arith.constant 0 : index
    %141 = vector.load %arg24[%140, %c0_89] : memref<8x128xf32, #tpu.memory_space<vmem>>, vector<1x128xf32>
    %cst_90 = arith.constant dense<0.000000e+00> : vector<1x128xf32>
    %142 = tpu.matmul %141, %3, %cst_90 {dimension_numbers = #tpu.dot_dimension_numbers<[1], [0], [0], [1], [0, 0, 1, 1], [], []>} : vector<1x128xf32>, vector<128x128xf32>, vector<1x128xf32> -> vector<1x128xf32>
    %143 = arith.addf %142, %8 : vector<1x128xf32>
    %144 = arith.addf %139, %143 : vector<1x128xf32>
    %c8_91 = arith.constant 8 : index
    %c0_92 = arith.constant 0 : index
    %145 = vector.load %arg25[%c8_91, %c0_92] : memref<16x128xf32, #tpu.memory_space<vmem>>, vector<1x128xf32>
    %146 = arith.addf %144, %145 : vector<1x128xf32>
    %cst_93 = arith.constant dense<0.000000e+00> : vector<1x128xf32>
    %147 = tpu.matmul %146, %7, %cst_93 {dimension_numbers = #tpu.dot_dimension_numbers<[1], [0], [0], [1], [0, 0, 1, 1], [], []>} : vector<1x128xf32>, vector<128x128xf32>, vector<1x128xf32> -> vector<1x128xf32>
    %148 = arith.addf %147, %10 : vector<1x128xf32>
    %149 = arith.index_cast %136 : i32 to index
    %c0_94 = arith.constant 0 : index
    %150 = vector.load %arg24[%149, %c0_94] : memref<8x128xf32, #tpu.memory_space<vmem>>, vector<1x128xf32>
    tpu.vector_store %arg24[%149, %c0_94], %148 {strides = array<i32>} : memref<8x128xf32, #tpu.memory_space<vmem>>, vector<1x128xf32>,
    %c9 = arith.constant 9 : index
    %151 = memref.load %arg0[%c9] : memref<12xi32, #tpu.memory_space<smem>>
    %c9_95 = arith.constant 9 : index
    %152 = memref.load %arg1[%c9_95] : memref<12xi32, #tpu.memory_space<smem>>
    %153 = arith.index_cast %151 : i32 to index
    %c0_96 = arith.constant 0 : index
    %154 = vector.load %arg24[%153, %c0_96] : memref<8x128xf32, #tpu.memory_space<vmem>>, vector<1x128xf32>
    %155 = arith.index_cast %152 : i32 to index
    %c0_97 = arith.constant 0 : index
    %156 = vector.load %arg24[%155, %c0_97] : memref<8x128xf32, #tpu.memory_space<vmem>>, vector<1x128xf32>
    %cst_98 = arith.constant dense<0.000000e+00> : vector<1x128xf32>
    %157 = tpu.matmul %156, %3, %cst_98 {dimension_numbers = #tpu.dot_dimension_numbers<[1], [0], [0], [1], [0, 0, 1, 1], [], []>} : vector<1x128xf32>, vector<128x128xf32>, vector<1x128xf32> -> vector<1x128xf32>
    %158 = arith.addf %157, %8 : vector<1x128xf32>
    %159 = arith.addf %154, %158 : vector<1x128xf32>
    %c9_99 = arith.constant 9 : index
    %c0_100 = arith.constant 0 : index
    %160 = vector.load %arg25[%c9_99, %c0_100] : memref<16x128xf32, #tpu.memory_space<vmem>>, vector<1x128xf32>
    %161 = arith.addf %159, %160 : vector<1x128xf32>
    %cst_101 = arith.constant dense<0.000000e+00> : vector<1x128xf32>
    %162 = tpu.matmul %161, %7, %cst_101 {dimension_numbers = #tpu.dot_dimension_numbers<[1], [0], [0], [1], [0, 0, 1, 1], [], []>} : vector<1x128xf32>, vector<128x128xf32>, vector<1x128xf32> -> vector<1x128xf32>
    %163 = arith.addf %162, %10 : vector<1x128xf32>
    %164 = arith.index_cast %151 : i32 to index
    %c0_102 = arith.constant 0 : index
    %165 = vector.load %arg24[%164, %c0_102] : memref<8x128xf32, #tpu.memory_space<vmem>>, vector<1x128xf32>
    tpu.vector_store %arg24[%164, %c0_102], %163 {strides = array<i32>} : memref<8x128xf32, #tpu.memory_space<vmem>>, vector<1x128xf32>,
    %c10 = arith.constant 10 : index
    %166 = memref.load %arg0[%c10] : memref<12xi32, #tpu.memory_space<smem>>
    %c10_103 = arith.constant 10 : index
    %167 = memref.load %arg1[%c10_103] : memref<12xi32, #tpu.memory_space<smem>>
    %168 = arith.index_cast %166 : i32 to index
    %c0_104 = arith.constant 0 : index
    %169 = vector.load %arg24[%168, %c0_104] : memref<8x128xf32, #tpu.memory_space<vmem>>, vector<1x128xf32>
    %170 = arith.index_cast %167 : i32 to index
    %c0_105 = arith.constant 0 : index
    %171 = vector.load %arg24[%170, %c0_105] : memref<8x128xf32, #tpu.memory_space<vmem>>, vector<1x128xf32>
    %cst_106 = arith.constant dense<0.000000e+00> : vector<1x128xf32>
    %172 = tpu.matmul %171, %3, %cst_106 {dimension_numbers = #tpu.dot_dimension_numbers<[1], [0], [0], [1], [0, 0, 1, 1], [], []>} : vector<1x128xf32>, vector<128x128xf32>, vector<1x128xf32> -> vector<1x128xf32>
    %173 = arith.addf %172, %8 : vector<1x128xf32>
    %174 = arith.addf %169, %173 : vector<1x128xf32>
    %c10_107 = arith.constant 10 : index
    %c0_108 = arith.constant 0 : index
    %175 = vector.load %arg25[%c10_107, %c0_108] : memref<16x128xf32, #tpu.memory_space<vmem>>, vector<1x128xf32>
    %176 = arith.addf %174, %175 : vector<1x128xf32>
    %cst_109 = arith.constant dense<0.000000e+00> : vector<1x128xf32>
    %177 = tpu.matmul %176, %7, %cst_109 {dimension_numbers = #tpu.dot_dimension_numbers<[1], [0], [0], [1], [0, 0, 1, 1], [], []>} : vector<1x128xf32>, vector<128x128xf32>, vector<1x128xf32> -> vector<1x128xf32>
    %178 = arith.addf %177, %10 : vector<1x128xf32>
    %179 = arith.index_cast %166 : i32 to index
    %c0_110 = arith.constant 0 : index
    %180 = vector.load %arg24[%179, %c0_110] : memref<8x128xf32, #tpu.memory_space<vmem>>, vector<1x128xf32>
    tpu.vector_store %arg24[%179, %c0_110], %178 {strides = array<i32>} : memref<8x128xf32, #tpu.memory_space<vmem>>, vector<1x128xf32>,
    %c11 = arith.constant 11 : index
    %181 = memref.load %arg0[%c11] : memref<12xi32, #tpu.memory_space<smem>>
    %c11_111 = arith.constant 11 : index
    %182 = memref.load %arg1[%c11_111] : memref<12xi32, #tpu.memory_space<smem>>
    %183 = arith.index_cast %181 : i32 to index
    %c0_112 = arith.constant 0 : index
    %184 = vector.load %arg24[%183, %c0_112] : memref<8x128xf32, #tpu.memory_space<vmem>>, vector<1x128xf32>
    %185 = arith.index_cast %182 : i32 to index
    %c0_113 = arith.constant 0 : index
    %186 = vector.load %arg24[%185, %c0_113] : memref<8x128xf32, #tpu.memory_space<vmem>>, vector<1x128xf32>
    %cst_114 = arith.constant dense<0.000000e+00> : vector<1x128xf32>
    %187 = tpu.matmul %186, %3, %cst_114 {dimension_numbers = #tpu.dot_dimension_numbers<[1], [0], [0], [1], [0, 0, 1, 1], [], []>} : vector<1x128xf32>, vector<128x128xf32>, vector<1x128xf32> -> vector<1x128xf32>
    %188 = arith.addf %187, %8 : vector<1x128xf32>
    %189 = arith.addf %184, %188 : vector<1x128xf32>
    %c11_115 = arith.constant 11 : index
    %c0_116 = arith.constant 0 : index
    %190 = vector.load %arg25[%c11_115, %c0_116] : memref<16x128xf32, #tpu.memory_space<vmem>>, vector<1x128xf32>
    %191 = arith.addf %189, %190 : vector<1x128xf32>
    %cst_117 = arith.constant dense<0.000000e+00> : vector<1x128xf32>
    %192 = tpu.matmul %191, %7, %cst_117 {dimension_numbers = #tpu.dot_dimension_numbers<[1], [0], [0], [1], [0, 0, 1, 1], [], []>} : vector<1x128xf32>, vector<128x128xf32>, vector<1x128xf32> -> vector<1x128xf32>
    %193 = arith.addf %192, %10 : vector<1x128xf32>
    %194 = arith.index_cast %181 : i32 to index
    %c0_118 = arith.constant 0 : index
    %195 = vector.load %arg24[%194, %c0_118] : memref<8x128xf32, #tpu.memory_space<vmem>>, vector<1x128xf32>
    tpu.vector_store %arg24[%194, %c0_118], %193 {strides = array<i32>} : memref<8x128xf32, #tpu.memory_space<vmem>>, vector<1x128xf32>,
    %c1_119 = arith.constant 1 : index
    %c0_120 = arith.constant 0 : index
    %c0_121 = arith.constant 0 : index
    %196 = vector.load %arg6[%c1_119, %c0_120, %c0_121] : memref<2x128x128xf32, #tpu.memory_space<vmem>>, vector<1x128x128xf32>
    %197 = vector.shape_cast %196 : vector<1x128x128xf32> to vector<128x128xf32>
    %c1_122 = arith.constant 1 : index
    %c0_123 = arith.constant 0 : index
    %c0_124 = arith.constant 0 : index
    %198 = vector.load %arg8[%c1_122, %c0_123, %c0_124] : memref<2x128x128xf32, #tpu.memory_space<vmem>>, vector<1x128x128xf32>
    %199 = vector.shape_cast %198 : vector<1x128x128xf32> to vector<128x128xf32>
    %c1_125 = arith.constant 1 : index
    %c0_126 = arith.constant 0 : index
    %c0_127 = arith.constant 0 : index
    %200 = vector.load %arg10[%c1_125, %c0_126, %c0_127] : memref<2x128x128xf32, #tpu.memory_space<vmem>>, vector<1x128x128xf32>
    %201 = vector.shape_cast %200 : vector<1x128x128xf32> to vector<128x128xf32>
    %c1_128 = arith.constant 1 : index
    %c0_129 = arith.constant 0 : index
    %202 = vector.load %arg7[%c1_128, %c0_129] : memref<2x128xf32, #tpu.memory_space<vmem>>, vector<1x128xf32>
    %c1_130 = arith.constant 1 : index
    %c0_131 = arith.constant 0 : index
    %203 = vector.load %arg9[%c1_130, %c0_131] : memref<2x128xf32, #tpu.memory_space<vmem>>, vector<1x128xf32>
    %c1_132 = arith.constant 1 : index
    %c0_133 = arith.constant 0 : index
    %204 = vector.load %arg11[%c1_132, %c0_133] : memref<2x128xf32, #tpu.memory_space<vmem>>, vector<1x128xf32>
    %c0_134 = arith.constant 0 : index
    %c0_135 = arith.constant 0 : index
    %205 = vector.load %arg4[%c0_134, %c0_135] : memref<16x128xf32, #tpu.memory_space<vmem>>, vector<16x128xf32>
    %cst_136 = arith.constant dense<0.000000e+00> : vector<16x128xf32>
    %206 = tpu.matmul %205, %199, %cst_136 {dimension_numbers = #tpu.dot_dimension_numbers<[1], [0], [0], [1], [0, 0, 1, 1], [], []>} : vector<16x128xf32>, vector<128x128xf32>, vector<16x128xf32> -> vector<16x128xf32>
    %207 = vector.broadcast %203 : vector<1x128xf32> to vector<16x128xf32>
    %208 = arith.addf %206, %207 : vector<16x128xf32>
    %c0_137 = arith.constant 0 : index
    %c0_138 = arith.constant 0 : index
    %209 = vector.load %arg25[%c0_137, %c0_138] : memref<16x128xf32, #tpu.memory_space<vmem>>, vector<16x128xf32>
    tpu.vector_store %arg25[%c0_137, %c0_138], %208 {strides = array<i32>} : memref<16x128xf32, #tpu.memory_space<vmem>>, vector<16x128xf32>,
    %c0_139 = arith.constant 0 : index
    %210 = memref.load %arg0[%c0_139] : memref<12xi32, #tpu.memory_space<smem>>
    %c0_140 = arith.constant 0 : index
    %211 = memref.load %arg1[%c0_140] : memref<12xi32, #tpu.memory_space<smem>>
    %212 = arith.index_cast %210 : i32 to index
    %c0_141 = arith.constant 0 : index
    %213 = vector.load %arg24[%212, %c0_141] : memref<8x128xf32, #tpu.memory_space<vmem>>, vector<1x128xf32>
    %214 = arith.index_cast %211 : i32 to index
    %c0_142 = arith.constant 0 : index
    %215 = vector.load %arg24[%214, %c0_142] : memref<8x128xf32, #tpu.memory_space<vmem>>, vector<1x128xf32>
    %cst_143 = arith.constant dense<0.000000e+00> : vector<1x128xf32>
    %216 = tpu.matmul %215, %197, %cst_143 {dimension_numbers = #tpu.dot_dimension_numbers<[1], [0], [0], [1], [0, 0, 1, 1], [], []>} : vector<1x128xf32>, vector<128x128xf32>, vector<1x128xf32> -> vector<1x128xf32>
    %217 = arith.addf %216, %202 : vector<1x128xf32>
    %218 = arith.addf %213, %217 : vector<1x128xf32>
    %c0_144 = arith.constant 0 : index
    %c0_145 = arith.constant 0 : index
    %219 = vector.load %arg25[%c0_144, %c0_145] : memref<16x128xf32, #tpu.memory_space<vmem>>, vector<1x128xf32>
    %220 = arith.addf %218, %219 : vector<1x128xf32>
    %cst_146 = arith.constant dense<0.000000e+00> : vector<1x128xf32>
    %221 = tpu.matmul %220, %201, %cst_146 {dimension_numbers = #tpu.dot_dimension_numbers<[1], [0], [0], [1], [0, 0, 1, 1], [], []>} : vector<1x128xf32>, vector<128x128xf32>, vector<1x128xf32> -> vector<1x128xf32>
    %222 = arith.addf %221, %204 : vector<1x128xf32>
    %223 = arith.index_cast %210 : i32 to index
    %c0_147 = arith.constant 0 : index
    %224 = vector.load %arg24[%223, %c0_147] : memref<8x128xf32, #tpu.memory_space<vmem>>, vector<1x128xf32>
    tpu.vector_store %arg24[%223, %c0_147], %222 {strides = array<i32>} : memref<8x128xf32, #tpu.memory_space<vmem>>, vector<1x128xf32>,
    %c1_148 = arith.constant 1 : index
    %225 = memref.load %arg0[%c1_148] : memref<12xi32, #tpu.memory_space<smem>>
    %c1_149 = arith.constant 1 : index
    %226 = memref.load %arg1[%c1_149] : memref<12xi32, #tpu.memory_space<smem>>
    %227 = arith.index_cast %225 : i32 to index
    %c0_150 = arith.constant 0 : index
    %228 = vector.load %arg24[%227, %c0_150] : memref<8x128xf32, #tpu.memory_space<vmem>>, vector<1x128xf32>
    %229 = arith.index_cast %226 : i32 to index
    %c0_151 = arith.constant 0 : index
    %230 = vector.load %arg24[%229, %c0_151] : memref<8x128xf32, #tpu.memory_space<vmem>>, vector<1x128xf32>
    %cst_152 = arith.constant dense<0.000000e+00> : vector<1x128xf32>
    %231 = tpu.matmul %230, %197, %cst_152 {dimension_numbers = #tpu.dot_dimension_numbers<[1], [0], [0], [1], [0, 0, 1, 1], [], []>} : vector<1x128xf32>, vector<128x128xf32>, vector<1x128xf32> -> vector<1x128xf32>
    %232 = arith.addf %231, %202 : vector<1x128xf32>
    %233 = arith.addf %228, %232 : vector<1x128xf32>
    %c1_153 = arith.constant 1 : index
    %c0_154 = arith.constant 0 : index
    %234 = vector.load %arg25[%c1_153, %c0_154] : memref<16x128xf32, #tpu.memory_space<vmem>>, vector<1x128xf32>
    %235 = arith.addf %233, %234 : vector<1x128xf32>
    %cst_155 = arith.constant dense<0.000000e+00> : vector<1x128xf32>
    %236 = tpu.matmul %235, %201, %cst_155 {dimension_numbers = #tpu.dot_dimension_numbers<[1], [0], [0], [1], [0, 0, 1, 1], [], []>} : vector<1x128xf32>, vector<128x128xf32>, vector<1x128xf32> -> vector<1x128xf32>
    %237 = arith.addf %236, %204 : vector<1x128xf32>
    %238 = arith.index_cast %225 : i32 to index
    %c0_156 = arith.constant 0 : index
    %239 = vector.load %arg24[%238, %c0_156] : memref<8x128xf32, #tpu.memory_space<vmem>>, vector<1x128xf32>
    tpu.vector_store %arg24[%238, %c0_156], %237 {strides = array<i32>} : memref<8x128xf32, #tpu.memory_space<vmem>>, vector<1x128xf32>,
    %c2_157 = arith.constant 2 : index
    %240 = memref.load %arg0[%c2_157] : memref<12xi32, #tpu.memory_space<smem>>
    %c2_158 = arith.constant 2 : index
    %241 = memref.load %arg1[%c2_158] : memref<12xi32, #tpu.memory_space<smem>>
    %242 = arith.index_cast %240 : i32 to index
    %c0_159 = arith.constant 0 : index
    %243 = vector.load %arg24[%242, %c0_159] : memref<8x128xf32, #tpu.memory_space<vmem>>, vector<1x128xf32>
    %244 = arith.index_cast %241 : i32 to index
    %c0_160 = arith.constant 0 : index
    %245 = vector.load %arg24[%244, %c0_160] : memref<8x128xf32, #tpu.memory_space<vmem>>, vector<1x128xf32>
    %cst_161 = arith.constant dense<0.000000e+00> : vector<1x128xf32>
    %246 = tpu.matmul %245, %197, %cst_161 {dimension_numbers = #tpu.dot_dimension_numbers<[1], [0], [0], [1], [0, 0, 1, 1], [], []>} : vector<1x128xf32>, vector<128x128xf32>, vector<1x128xf32> -> vector<1x128xf32>
    %247 = arith.addf %246, %202 : vector<1x128xf32>
    %248 = arith.addf %243, %247 : vector<1x128xf32>
    %c2_162 = arith.constant 2 : index
    %c0_163 = arith.constant 0 : index
    %249 = vector.load %arg25[%c2_162, %c0_163] : memref<16x128xf32, #tpu.memory_space<vmem>>, vector<1x128xf32>
    %250 = arith.addf %248, %249 : vector<1x128xf32>
    %cst_164 = arith.constant dense<0.000000e+00> : vector<1x128xf32>
    %251 = tpu.matmul %250, %201, %cst_164 {dimension_numbers = #tpu.dot_dimension_numbers<[1], [0], [0], [1], [0, 0, 1, 1], [], []>} : vector<1x128xf32>, vector<128x128xf32>, vector<1x128xf32> -> vector<1x128xf32>
    %252 = arith.addf %251, %204 : vector<1x128xf32>
    %253 = arith.index_cast %240 : i32 to index
    %c0_165 = arith.constant 0 : index
    %254 = vector.load %arg24[%253, %c0_165] : memref<8x128xf32, #tpu.memory_space<vmem>>, vector<1x128xf32>
    tpu.vector_store %arg24[%253, %c0_165], %252 {strides = array<i32>} : memref<8x128xf32, #tpu.memory_space<vmem>>, vector<1x128xf32>,
    %c3_166 = arith.constant 3 : index
    %255 = memref.load %arg0[%c3_166] : memref<12xi32, #tpu.memory_space<smem>>
    %c3_167 = arith.constant 3 : index
    %256 = memref.load %arg1[%c3_167] : memref<12xi32, #tpu.memory_space<smem>>
    %257 = arith.index_cast %255 : i32 to index
    %c0_168 = arith.constant 0 : index
    %258 = vector.load %arg24[%257, %c0_168] : memref<8x128xf32, #tpu.memory_space<vmem>>, vector<1x128xf32>
    %259 = arith.index_cast %256 : i32 to index
    %c0_169 = arith.constant 0 : index
    %260 = vector.load %arg24[%259, %c0_169] : memref<8x128xf32, #tpu.memory_space<vmem>>, vector<1x128xf32>
    %cst_170 = arith.constant dense<0.000000e+00> : vector<1x128xf32>
    %261 = tpu.matmul %260, %197, %cst_170 {dimension_numbers = #tpu.dot_dimension_numbers<[1], [0], [0], [1], [0, 0, 1, 1], [], []>} : vector<1x128xf32>, vector<128x128xf32>, vector<1x128xf32> -> vector<1x128xf32>
    %262 = arith.addf %261, %202 : vector<1x128xf32>
    %263 = arith.addf %258, %262 : vector<1x128xf32>
    %c3_171 = arith.constant 3 : index
    %c0_172 = arith.constant 0 : index
    %264 = vector.load %arg25[%c3_171, %c0_172] : memref<16x128xf32, #tpu.memory_space<vmem>>, vector<1x128xf32>
    %265 = arith.addf %263, %264 : vector<1x128xf32>
    %cst_173 = arith.constant dense<0.000000e+00> : vector<1x128xf32>
    %266 = tpu.matmul %265, %201, %cst_173 {dimension_numbers = #tpu.dot_dimension_numbers<[1], [0], [0], [1], [0, 0, 1, 1], [], []>} : vector<1x128xf32>, vector<128x128xf32>, vector<1x128xf32> -> vector<1x128xf32>
    %267 = arith.addf %266, %204 : vector<1x128xf32>
    %268 = arith.index_cast %255 : i32 to index
    %c0_174 = arith.constant 0 : index
    %269 = vector.load %arg24[%268, %c0_174] : memref<8x128xf32, #tpu.memory_space<vmem>>, vector<1x128xf32>
    tpu.vector_store %arg24[%268, %c0_174], %267 {strides = array<i32>} : memref<8x128xf32, #tpu.memory_space<vmem>>, vector<1x128xf32>,
    %c4_175 = arith.constant 4 : index
    %270 = memref.load %arg0[%c4_175] : memref<12xi32, #tpu.memory_space<smem>>
    %c4_176 = arith.constant 4 : index
    %271 = memref.load %arg1[%c4_176] : memref<12xi32, #tpu.memory_space<smem>>
    %272 = arith.index_cast %270 : i32 to index
    %c0_177 = arith.constant 0 : index
    %273 = vector.load %arg24[%272, %c0_177] : memref<8x128xf32, #tpu.memory_space<vmem>>, vector<1x128xf32>
    %274 = arith.index_cast %271 : i32 to index
    %c0_178 = arith.constant 0 : index
    %275 = vector.load %arg24[%274, %c0_178] : memref<8x128xf32, #tpu.memory_space<vmem>>, vector<1x128xf32>
    %cst_179 = arith.constant dense<0.000000e+00> : vector<1x128xf32>
    %276 = tpu.matmul %275, %197, %cst_179 {dimension_numbers = #tpu.dot_dimension_numbers<[1], [0], [0], [1], [0, 0, 1, 1], [], []>} : vector<1x128xf32>, vector<128x128xf32>, vector<1x128xf32> -> vector<1x128xf32>
    %277 = arith.addf %276, %202 : vector<1x128xf32>
    %278 = arith.addf %273, %277 : vector<1x128xf32>
    %c4_180 = arith.constant 4 : index
    %c0_181 = arith.constant 0 : index
    %279 = vector.load %arg25[%c4_180, %c0_181] : memref<16x128xf32, #tpu.memory_space<vmem>>, vector<1x128xf32>
    %280 = arith.addf %278, %279 : vector<1x128xf32>
    %cst_182 = arith.constant dense<0.000000e+00> : vector<1x128xf32>
    %281 = tpu.matmul %280, %201, %cst_182 {dimension_numbers = #tpu.dot_dimension_numbers<[1], [0], [0], [1], [0, 0, 1, 1], [], []>} : vector<1x128xf32>, vector<128x128xf32>, vector<1x128xf32> -> vector<1x128xf32>
    %282 = arith.addf %281, %204 : vector<1x128xf32>
    %283 = arith.index_cast %270 : i32 to index
    %c0_183 = arith.constant 0 : index
    %284 = vector.load %arg24[%283, %c0_183] : memref<8x128xf32, #tpu.memory_space<vmem>>, vector<1x128xf32>
    tpu.vector_store %arg24[%283, %c0_183], %282 {strides = array<i32>} : memref<8x128xf32, #tpu.memory_space<vmem>>, vector<1x128xf32>,
    %c5_184 = arith.constant 5 : index
    %285 = memref.load %arg0[%c5_184] : memref<12xi32, #tpu.memory_space<smem>>
    %c5_185 = arith.constant 5 : index
    %286 = memref.load %arg1[%c5_185] : memref<12xi32, #tpu.memory_space<smem>>
    %287 = arith.index_cast %285 : i32 to index
    %c0_186 = arith.constant 0 : index
    %288 = vector.load %arg24[%287, %c0_186] : memref<8x128xf32, #tpu.memory_space<vmem>>, vector<1x128xf32>
    %289 = arith.index_cast %286 : i32 to index
    %c0_187 = arith.constant 0 : index
    %290 = vector.load %arg24[%289, %c0_187] : memref<8x128xf32, #tpu.memory_space<vmem>>, vector<1x128xf32>
    %cst_188 = arith.constant dense<0.000000e+00> : vector<1x128xf32>
    %291 = tpu.matmul %290, %197, %cst_188 {dimension_numbers = #tpu.dot_dimension_numbers<[1], [0], [0], [1], [0, 0, 1, 1], [], []>} : vector<1x128xf32>, vector<128x128xf32>, vector<1x128xf32> -> vector<1x128xf32>
    %292 = arith.addf %291, %202 : vector<1x128xf32>
    %293 = arith.addf %288, %292 : vector<1x128xf32>
    %c5_189 = arith.constant 5 : index
    %c0_190 = arith.constant 0 : index
    %294 = vector.load %arg25[%c5_189, %c0_190] : memref<16x128xf32, #tpu.memory_space<vmem>>, vector<1x128xf32>
    %295 = arith.addf %293, %294 : vector<1x128xf32>
    %cst_191 = arith.constant dense<0.000000e+00> : vector<1x128xf32>
    %296 = tpu.matmul %295, %201, %cst_191 {dimension_numbers = #tpu.dot_dimension_numbers<[1], [0], [0], [1], [0, 0, 1, 1], [], []>} : vector<1x128xf32>, vector<128x128xf32>, vector<1x128xf32> -> vector<1x128xf32>
    %297 = arith.addf %296, %204 : vector<1x128xf32>
    %298 = arith.index_cast %285 : i32 to index
    %c0_192 = arith.constant 0 : index
    %299 = vector.load %arg24[%298, %c0_192] : memref<8x128xf32, #tpu.memory_space<vmem>>, vector<1x128xf32>
    tpu.vector_store %arg24[%298, %c0_192], %297 {strides = array<i32>} : memref<8x128xf32, #tpu.memory_space<vmem>>, vector<1x128xf32>,
    %c6_193 = arith.constant 6 : index
    %300 = memref.load %arg0[%c6_193] : memref<12xi32, #tpu.memory_space<smem>>
    %c6_194 = arith.constant 6 : index
    %301 = memref.load %arg1[%c6_194] : memref<12xi32, #tpu.memory_space<smem>>
    %302 = arith.index_cast %300 : i32 to index
    %c0_195 = arith.constant 0 : index
    %303 = vector.load %arg24[%302, %c0_195] : memref<8x128xf32, #tpu.memory_space<vmem>>, vector<1x128xf32>
    %304 = arith.index_cast %301 : i32 to index
    %c0_196 = arith.constant 0 : index
    %305 = vector.load %arg24[%304, %c0_196] : memref<8x128xf32, #tpu.memory_space<vmem>>, vector<1x128xf32>
    %cst_197 = arith.constant dense<0.000000e+00> : vector<1x128xf32>
    %306 = tpu.matmul %305, %197, %cst_197 {dimension_numbers = #tpu.dot_dimension_numbers<[1], [0], [0], [1], [0, 0, 1, 1], [], []>} : vector<1x128xf32>, vector<128x128xf32>, vector<1x128xf32> -> vector<1x128xf32>
    %307 = arith.addf %306, %202 : vector<1x128xf32>
    %308 = arith.addf %303, %307 : vector<1x128xf32>
    %c6_198 = arith.constant 6 : index
    %c0_199 = arith.constant 0 : index
    %309 = vector.load %arg25[%c6_198, %c0_199] : memref<16x128xf32, #tpu.memory_space<vmem>>, vector<1x128xf32>
    %310 = arith.addf %308, %309 : vector<1x128xf32>
    %cst_200 = arith.constant dense<0.000000e+00> : vector<1x128xf32>
    %311 = tpu.matmul %310, %201, %cst_200 {dimension_numbers = #tpu.dot_dimension_numbers<[1], [0], [0], [1], [0, 0, 1, 1], [], []>} : vector<1x128xf32>, vector<128x128xf32>, vector<1x128xf32> -> vector<1x128xf32>
    %312 = arith.addf %311, %204 : vector<1x128xf32>
    %313 = arith.index_cast %300 : i32 to index
    %c0_201 = arith.constant 0 : index
    %314 = vector.load %arg24[%313, %c0_201] : memref<8x128xf32, #tpu.memory_space<vmem>>, vector<1x128xf32>
    tpu.vector_store %arg24[%313, %c0_201], %312 {strides = array<i32>} : memref<8x128xf32, #tpu.memory_space<vmem>>, vector<1x128xf32>,
    %c7_202 = arith.constant 7 : index
    %315 = memref.load %arg0[%c7_202] : memref<12xi32, #tpu.memory_space<smem>>
    %c7_203 = arith.constant 7 : index
    %316 = memref.load %arg1[%c7_203] : memref<12xi32, #tpu.memory_space<smem>>
    %317 = arith.index_cast %315 : i32 to index
    %c0_204 = arith.constant 0 : index
    %318 = vector.load %arg24[%317, %c0_204] : memref<8x128xf32, #tpu.memory_space<vmem>>, vector<1x128xf32>
    %319 = arith.index_cast %316 : i32 to index
    %c0_205 = arith.constant 0 : index
    %320 = vector.load %arg24[%319, %c0_205] : memref<8x128xf32, #tpu.memory_space<vmem>>, vector<1x128xf32>
    %cst_206 = arith.constant dense<0.000000e+00> : vector<1x128xf32>
    %321 = tpu.matmul %320, %197, %cst_206 {dimension_numbers = #tpu.dot_dimension_numbers<[1], [0], [0], [1], [0, 0, 1, 1], [], []>} : vector<1x128xf32>, vector<128x128xf32>, vector<1x128xf32> -> vector<1x128xf32>
    %322 = arith.addf %321, %202 : vector<1x128xf32>
    %323 = arith.addf %318, %322 : vector<1x128xf32>
    %c7_207 = arith.constant 7 : index
    %c0_208 = arith.constant 0 : index
    %324 = vector.load %arg25[%c7_207, %c0_208] : memref<16x128xf32, #tpu.memory_space<vmem>>, vector<1x128xf32>
    %325 = arith.addf %323, %324 : vector<1x128xf32>
    %cst_209 = arith.constant dense<0.000000e+00> : vector<1x128xf32>
    %326 = tpu.matmul %325, %201, %cst_209 {dimension_numbers = #tpu.dot_dimension_numbers<[1], [0], [0], [1], [0, 0, 1, 1], [], []>} : vector<1x128xf32>, vector<128x128xf32>, vector<1x128xf32> -> vector<1x128xf32>
    %327 = arith.addf %326, %204 : vector<1x128xf32>
    %328 = arith.index_cast %315 : i32 to index
    %c0_210 = arith.constant 0 : index
    %329 = vector.load %arg24[%328, %c0_210] : memref<8x128xf32, #tpu.memory_space<vmem>>, vector<1x128xf32>
    tpu.vector_store %arg24[%328, %c0_210], %327 {strides = array<i32>} : memref<8x128xf32, #tpu.memory_space<vmem>>, vector<1x128xf32>,
    %c8_211 = arith.constant 8 : index
    %330 = memref.load %arg0[%c8_211] : memref<12xi32, #tpu.memory_space<smem>>
    %c8_212 = arith.constant 8 : index
    %331 = memref.load %arg1[%c8_212] : memref<12xi32, #tpu.memory_space<smem>>
    %332 = arith.index_cast %330 : i32 to index
    %c0_213 = arith.constant 0 : index
    %333 = vector.load %arg24[%332, %c0_213] : memref<8x128xf32, #tpu.memory_space<vmem>>, vector<1x128xf32>
    %334 = arith.index_cast %331 : i32 to index
    %c0_214 = arith.constant 0 : index
    %335 = vector.load %arg24[%334, %c0_214] : memref<8x128xf32, #tpu.memory_space<vmem>>, vector<1x128xf32>
    %cst_215 = arith.constant dense<0.000000e+00> : vector<1x128xf32>
    %336 = tpu.matmul %335, %197, %cst_215 {dimension_numbers = #tpu.dot_dimension_numbers<[1], [0], [0], [1], [0, 0, 1, 1], [], []>} : vector<1x128xf32>, vector<128x128xf32>, vector<1x128xf32> -> vector<1x128xf32>
    %337 = arith.addf %336, %202 : vector<1x128xf32>
    %338 = arith.addf %333, %337 : vector<1x128xf32>
    %c8_216 = arith.constant 8 : index
    %c0_217 = arith.constant 0 : index
    %339 = vector.load %arg25[%c8_216, %c0_217] : memref<16x128xf32, #tpu.memory_space<vmem>>, vector<1x128xf32>
    %340 = arith.addf %338, %339 : vector<1x128xf32>
    %cst_218 = arith.constant dense<0.000000e+00> : vector<1x128xf32>
    %341 = tpu.matmul %340, %201, %cst_218 {dimension_numbers = #tpu.dot_dimension_numbers<[1], [0], [0], [1], [0, 0, 1, 1], [], []>} : vector<1x128xf32>, vector<128x128xf32>, vector<1x128xf32> -> vector<1x128xf32>
    %342 = arith.addf %341, %204 : vector<1x128xf32>
    %343 = arith.index_cast %330 : i32 to index
    %c0_219 = arith.constant 0 : index
    %344 = vector.load %arg24[%343, %c0_219] : memref<8x128xf32, #tpu.memory_space<vmem>>, vector<1x128xf32>
    tpu.vector_store %arg24[%343, %c0_219], %342 {strides = array<i32>} : memref<8x128xf32, #tpu.memory_space<vmem>>, vector<1x128xf32>,
    %c9_220 = arith.constant 9 : index
    %345 = memref.load %arg0[%c9_220] : memref<12xi32, #tpu.memory_space<smem>>
    %c9_221 = arith.constant 9 : index
    %346 = memref.load %arg1[%c9_221] : memref<12xi32, #tpu.memory_space<smem>>
    %347 = arith.index_cast %345 : i32 to index
    %c0_222 = arith.constant 0 : index
    %348 = vector.load %arg24[%347, %c0_222] : memref<8x128xf32, #tpu.memory_space<vmem>>, vector<1x128xf32>
    %349 = arith.index_cast %346 : i32 to index
    %c0_223 = arith.constant 0 : index
    %350 = vector.load %arg24[%349, %c0_223] : memref<8x128xf32, #tpu.memory_space<vmem>>, vector<1x128xf32>
    %cst_224 = arith.constant dense<0.000000e+00> : vector<1x128xf32>
    %351 = tpu.matmul %350, %197, %cst_224 {dimension_numbers = #tpu.dot_dimension_numbers<[1], [0], [0], [1], [0, 0, 1, 1], [], []>} : vector<1x128xf32>, vector<128x128xf32>, vector<1x128xf32> -> vector<1x128xf32>
    %352 = arith.addf %351, %202 : vector<1x128xf32>
    %353 = arith.addf %348, %352 : vector<1x128xf32>
    %c9_225 = arith.constant 9 : index
    %c0_226 = arith.constant 0 : index
    %354 = vector.load %arg25[%c9_225, %c0_226] : memref<16x128xf32, #tpu.memory_space<vmem>>, vector<1x128xf32>
    %355 = arith.addf %353, %354 : vector<1x128xf32>
    %cst_227 = arith.constant dense<0.000000e+00> : vector<1x128xf32>
    %356 = tpu.matmul %355, %201, %cst_227 {dimension_numbers = #tpu.dot_dimension_numbers<[1], [0], [0], [1], [0, 0, 1, 1], [], []>} : vector<1x128xf32>, vector<128x128xf32>, vector<1x128xf32> -> vector<1x128xf32>
    %357 = arith.addf %356, %204 : vector<1x128xf32>
    %358 = arith.index_cast %345 : i32 to index
    %c0_228 = arith.constant 0 : index
    %359 = vector.load %arg24[%358, %c0_228] : memref<8x128xf32, #tpu.memory_space<vmem>>, vector<1x128xf32>
    tpu.vector_store %arg24[%358, %c0_228], %357 {strides = array<i32>} : memref<8x128xf32, #tpu.memory_space<vmem>>, vector<1x128xf32>,
    %c10_229 = arith.constant 10 : index
    %360 = memref.load %arg0[%c10_229] : memref<12xi32, #tpu.memory_space<smem>>
    %c10_230 = arith.constant 10 : index
    %361 = memref.load %arg1[%c10_230] : memref<12xi32, #tpu.memory_space<smem>>
    %362 = arith.index_cast %360 : i32 to index
    %c0_231 = arith.constant 0 : index
    %363 = vector.load %arg24[%362, %c0_231] : memref<8x128xf32, #tpu.memory_space<vmem>>, vector<1x128xf32>
    %364 = arith.index_cast %361 : i32 to index
    %c0_232 = arith.constant 0 : index
    %365 = vector.load %arg24[%364, %c0_232] : memref<8x128xf32, #tpu.memory_space<vmem>>, vector<1x128xf32>
    %cst_233 = arith.constant dense<0.000000e+00> : vector<1x128xf32>
    %366 = tpu.matmul %365, %197, %cst_233 {dimension_numbers = #tpu.dot_dimension_numbers<[1], [0], [0], [1], [0, 0, 1, 1], [], []>} : vector<1x128xf32>, vector<128x128xf32>, vector<1x128xf32> -> vector<1x128xf32>
    %367 = arith.addf %366, %202 : vector<1x128xf32>
    %368 = arith.addf %363, %367 : vector<1x128xf32>
    %c10_234 = arith.constant 10 : index
    %c0_235 = arith.constant 0 : index
    %369 = vector.load %arg25[%c10_234, %c0_235] : memref<16x128xf32, #tpu.memory_space<vmem>>, vector<1x128xf32>
    %370 = arith.addf %368, %369 : vector<1x128xf32>
    %cst_236 = arith.constant dense<0.000000e+00> : vector<1x128xf32>
    %371 = tpu.matmul %370, %201, %cst_236 {dimension_numbers = #tpu.dot_dimension_numbers<[1], [0], [0], [1], [0, 0, 1, 1], [], []>} : vector<1x128xf32>, vector<128x128xf32>, vector<1x128xf32> -> vector<1x128xf32>
    %372 = arith.addf %371, %204 : vector<1x128xf32>
    %373 = arith.index_cast %360 : i32 to index
    %c0_237 = arith.constant 0 : index
    %374 = vector.load %arg24[%373, %c0_237] : memref<8x128xf32, #tpu.memory_space<vmem>>, vector<1x128xf32>
    tpu.vector_store %arg24[%373, %c0_237], %372 {strides = array<i32>} : memref<8x128xf32, #tpu.memory_space<vmem>>, vector<1x128xf32>,
    %c11_238 = arith.constant 11 : index
    %375 = memref.load %arg0[%c11_238] : memref<12xi32, #tpu.memory_space<smem>>
    %c11_239 = arith.constant 11 : index
    %376 = memref.load %arg1[%c11_239] : memref<12xi32, #tpu.memory_space<smem>>
    %377 = arith.index_cast %375 : i32 to index
    %c0_240 = arith.constant 0 : index
    %378 = vector.load %arg24[%377, %c0_240] : memref<8x128xf32, #tpu.memory_space<vmem>>, vector<1x128xf32>
    %379 = arith.index_cast %376 : i32 to index
    %c0_241 = arith.constant 0 : index
    %380 = vector.load %arg24[%379, %c0_241] : memref<8x128xf32, #tpu.memory_space<vmem>>, vector<1x128xf32>
    %cst_242 = arith.constant dense<0.000000e+00> : vector<1x128xf32>
    %381 = tpu.matmul %380, %197, %cst_242 {dimension_numbers = #tpu.dot_dimension_numbers<[1], [0], [0], [1], [0, 0, 1, 1], [], []>} : vector<1x128xf32>, vector<128x128xf32>, vector<1x128xf32> -> vector<1x128xf32>
    %382 = arith.addf %381, %202 : vector<1x128xf32>
    %383 = arith.addf %378, %382 : vector<1x128xf32>
    %c11_243 = arith.constant 11 : index
    %c0_244 = arith.constant 0 : index
    %384 = vector.load %arg25[%c11_243, %c0_244] : memref<16x128xf32, #tpu.memory_space<vmem>>, vector<1x128xf32>
    %385 = arith.addf %383, %384 : vector<1x128xf32>
    %cst_245 = arith.constant dense<0.000000e+00> : vector<1x128xf32>
    %386 = tpu.matmul %385, %201, %cst_245 {dimension_numbers = #tpu.dot_dimension_numbers<[1], [0], [0], [1], [0, 0, 1, 1], [], []>} : vector<1x128xf32>, vector<128x128xf32>, vector<1x128xf32> -> vector<1x128xf32>
    %387 = arith.addf %386, %204 : vector<1x128xf32>
    %388 = arith.index_cast %375 : i32 to index
    %c0_246 = arith.constant 0 : index
    %389 = vector.load %arg24[%388, %c0_246] : memref<8x128xf32, #tpu.memory_space<vmem>>, vector<1x128xf32>
    tpu.vector_store %arg24[%388, %c0_246], %387 {strides = array<i32>} : memref<8x128xf32, #tpu.memory_space<vmem>>, vector<1x128xf32>,
    %c0_247 = arith.constant 0 : index
    %c0_248 = arith.constant 0 : index
    %390 = vector.load %arg24[%c0_247, %c0_248] : memref<8x128xf32, #tpu.memory_space<vmem>>, vector<8x128xf32>
    %c0_249 = arith.constant 0 : index
    %c0_250 = arith.constant 0 : index
    %391 = vector.load %arg12[%c0_249, %c0_250] : memref<128x128xf32, #tpu.memory_space<vmem>>, vector<128x128xf32>
    %cst_251 = arith.constant dense<0.000000e+00> : vector<8x128xf32>
    %392 = tpu.matmul %390, %391, %cst_251 {dimension_numbers = #tpu.dot_dimension_numbers<[1], [0], [0], [1], [0, 0, 1, 1], [], []>} : vector<8x128xf32>, vector<128x128xf32>, vector<8x128xf32> -> vector<8x128xf32>
    %c0_252 = arith.constant 0 : index
    %c0_253 = arith.constant 0 : index
    %393 = vector.load %arg3[%c0_252, %c0_253] : memref<8x128xf32, #tpu.memory_space<vmem>>, vector<8x128xf32>
    %c0_254 = arith.constant 0 : index
    %c0_255 = arith.constant 0 : index
    %394 = vector.load %arg13[%c0_254, %c0_255] : memref<128x128xf32, #tpu.memory_space<vmem>>, vector<128x128xf32>
    %cst_256 = arith.constant dense<0.000000e+00> : vector<8x128xf32>
    %395 = tpu.matmul %393, %394, %cst_256 {dimension_numbers = #tpu.dot_dimension_numbers<[1], [0], [0], [1], [0, 0, 1, 1], [], []>} : vector<8x128xf32>, vector<128x128xf32>, vector<8x128xf32> -> vector<8x128xf32>
    %396 = arith.addf %392, %395 : vector<8x128xf32>
    %cst_257 = arith.constant dense<0.000000e+00> : vector<128xf32>
    %397 = vector.multi_reduction <add>, %396, %cst_257 [0] : vector<8x128xf32> to vector<128xf32>
    %398 = vector.shape_cast %397 : vector<128xf32> to vector<1x128xf32>
    %cst_258 = arith.constant 0.166666672 : f32
    %399 = vector.broadcast %cst_258 : f32 to vector<1x128xf32>
    %400 = arith.mulf %398, %399 : vector<1x128xf32>
    %c0_259 = arith.constant 0 : index
    %c0_260 = arith.constant 0 : index
    %401 = vector.load %arg14[%c0_259, %c0_260] : memref<1x128xf32, #tpu.memory_space<vmem>>, vector<1x128xf32>
    %402 = arith.addf %400, %401 : vector<1x128xf32>
    %cst_261 = arith.constant 0.000000e+00 : f32
    %403 = vector.broadcast %cst_261 : f32 to vector<1x128xf32>
    %404 = arith.maximumf %402, %403 : vector<1x128xf32>
    %c0_262 = arith.constant 0 : index
    %c0_263 = arith.constant 0 : index
    %405 = vector.load %arg5[%c0_262, %c0_263] : memref<1x256xf32, #tpu.memory_space<vmem>>, vector<1x256xf32>
    %cst_264 = arith.constant 0.000000e+00 : f32
    %406 = vector.broadcast %cst_264 : f32 to vector<1x256xf32>
    %407 = arith.maximumf %405, %406 : vector<1x256xf32>
    %c0_265 = arith.constant 0 : index
    %c0_266 = arith.constant 0 : index
    %408 = vector.load %arg15[%c0_265, %c0_266] : memref<128x128xf32, #tpu.memory_space<vmem>>, vector<128x128xf32>
    %cst_267 = arith.constant dense<0.000000e+00> : vector<1x128xf32>
    %409 = tpu.matmul %404, %408, %cst_267 {dimension_numbers = #tpu.dot_dimension_numbers<[1], [0], [0], [1], [0, 0, 1, 1], [], []>} : vector<1x128xf32>, vector<128x128xf32>, vector<1x128xf32> -> vector<1x128xf32>
    %c0_268 = arith.constant 0 : index
    %c0_269 = arith.constant 0 : index
    %410 = vector.load %arg16[%c0_268, %c0_269] : memref<256x128xf32, #tpu.memory_space<vmem>>, vector<256x128xf32>
    %cst_270 = arith.constant dense<0.000000e+00> : vector<1x128xf32>
    %411 = tpu.matmul %407, %410, %cst_270 {dimension_numbers = #tpu.dot_dimension_numbers<[1], [0], [0], [1], [0, 0, 1, 1], [], []>} : vector<1x256xf32>, vector<256x128xf32>, vector<1x128xf32> -> vector<1x128xf32>
    %412 = arith.addf %409, %411 : vector<1x128xf32>
    %c0_271 = arith.constant 0 : index
    %c0_272 = arith.constant 0 : index
    %413 = vector.load %arg17[%c0_271, %c0_272] : memref<1x128xf32, #tpu.memory_space<vmem>>, vector<1x128xf32>
    %414 = arith.addf %412, %413 : vector<1x128xf32>
    %c0_273 = arith.constant 0 : index
    %c0_274 = arith.constant 0 : index
    %415 = vector.load %arg22[%c0_273, %c0_274] : memref<1x128xf32, #tpu.memory_space<vmem>>, vector<1x128xf32>
    tpu.vector_store %arg22[%c0_273, %c0_274], %414 {strides = array<i32>} : memref<1x128xf32, #tpu.memory_space<vmem>>, vector<1x128xf32>,
    %cst_275 = arith.constant 0.000000e+00 : f32
    %416 = vector.broadcast %cst_275 : f32 to vector<1x128xf32>
    %417 = arith.maximumf %414, %416 : vector<1x128xf32>
    %c0_276 = arith.constant 0 : index
    %c0_277 = arith.constant 0 : index
    %418 = vector.load %arg18[%c0_276, %c0_277] : memref<128x128xf32, #tpu.memory_space<vmem>>, vector<128x128xf32>
    %cst_278 = arith.constant dense<0.000000e+00> : vector<1x128xf32>
    %419 = tpu.matmul %417, %418, %cst_278 {dimension_numbers = #tpu.dot_dimension_numbers<[1], [0], [0], [1], [0, 0, 1, 1], [], []>} : vector<1x128xf32>, vector<128x128xf32>, vector<1x128xf32> -> vector<1x128xf32>
    %c0_279 = arith.constant 0 : index
    %c0_280 = arith.constant 0 : index
    %420 = vector.load %arg19[%c0_279, %c0_280] : memref<1x128xf32, #tpu.memory_space<vmem>>, vector<1x128xf32>
    %421 = arith.addf %419, %420 : vector<1x128xf32>
    %cst_281 = arith.constant 0.000000e+00 : f32
    %422 = vector.broadcast %cst_281 : f32 to vector<1x128xf32>
    %423 = arith.maximumf %421, %422 : vector<1x128xf32>
    %c0_282 = arith.constant 0 : index
    %c0_283 = arith.constant 0 : index
    %424 = vector.load %arg20[%c0_282, %c0_283] : memref<128x128xf32, #tpu.memory_space<vmem>>, vector<128x128xf32>
    %cst_284 = arith.constant dense<0.000000e+00> : vector<1x128xf32>
    %425 = tpu.matmul %423, %424, %cst_284 {dimension_numbers = #tpu.dot_dimension_numbers<[1], [0], [0], [1], [0, 0, 1, 1], [], []>} : vector<1x128xf32>, vector<128x128xf32>, vector<1x128xf32> -> vector<1x128xf32>
    %c0_285 = arith.constant 0 : index
    %c0_286 = arith.constant 0 : index
    %426 = vector.load %arg21[%c0_285, %c0_286] : memref<1x128xf32, #tpu.memory_space<vmem>>, vector<1x128xf32>
    %427 = arith.addf %425, %426 : vector<1x128xf32>
    %c0_287 = arith.constant 0 : index
    %c0_288 = arith.constant 0 : index
    %428 = vector.load %arg23[%c0_287, %c0_288] : memref<1x128xf32, #tpu.memory_space<vmem>>, vector<1x128xf32>
    tpu.vector_store %arg23[%c0_287, %c0_288], %427 {strides = array<i32>} : memref<1x128xf32, #tpu.memory_space<vmem>>, vector<1x128xf32>,
    return
  }
}

</mosaic_0001>

<bundles_post_ra>
// kernel: tpu_custom_call.1
= control target key start
LH: loop header
LB: loop body
LE: loop exit
PB: predicated region body
PF: predicated region fallthrough
CT: control target
= control target key end

     0   :  { %s10946_s0 = inlined_call_operand.hbm [shape: s32[12], index: 0, kind: input, shape index: {}]   ;;  %s10947_s1 = inlined_call_operand.vmem [shape: s32[12], index: 1, kind: input, shape index: {}]   ;;  %s10948_s2 = inlined_call_operand.hbm [shape: f32[8,128], index: 2, kind: input, shape index: {}]   ;;  %s10949_s3 = inlined_call_operand.vmem [shape: f32[8,128], index: 3, kind: input, shape index: {}]   ;;  %s10950_s4 = inlined_call_operand.hbm [shape: f32[16,128], index: 4, kind: input, shape index: {}]   ;;  %s10951_s5 = inlined_call_operand.vmem [shape: f32[1,256], index: 5, kind: input, shape index: {}]   ;;  %s10952_s6 = inlined_call_operand.hbm [shape: f32[2,128,128], index: 6, kind: input, shape index: {}]   ;;  %s10953_s7 = inlined_call_operand.vmem [shape: f32[2,128], index: 7, kind: input, shape index: {}]   ;;  %s10954_s8 = inlined_call_operand.hbm [shape: f32[2,128,128], index: 8, kind: input, shape index: {}]   ;;  %s10955_s9 = inlined_call_operand.vmem [shape: f32[2,128], index: 9, kind: input, shape index: {}]   ;;  %s10956_s10 = inlined_call_operand.hbm [shape: f32[2,128,128], index: 10, kind: input, shape index: {}]   ;;  %s10957_s11 = inlined_call_operand.vmem [shape: f32[2,128], index: 11, kind: input, shape index: {}]   ;;  %s10958_s12 = inlined_call_operand.hbm [shape: f32[128,128], index: 12, kind: input, shape index: {}]   ;;  %s10959_s13 = inlined_call_operand.hbm [shape: f32[128,128], index: 13, kind: input, shape index: {}]   ;;  %s10960_s14 = inlined_call_operand.vmem [shape: f32[1,128], index: 14, kind: input, shape index: {}]   ;;  %s10961_s15 = inlined_call_operand.hbm [shape: f32[128,128], index: 15, kind: input, shape index: {}]   ;;  %s10962_s16 = inlined_call_operand.hbm [shape: f32[256,128], index: 16, kind: input, shape index: {}]   ;;  %s10963_s17 = inlined_call_operand.vmem [shape: f32[1,128], index: 17, kind: input, shape index: {}]   ;;  %s10964_s18 = inlined_call_operand.hbm [shape: f32[128,128], index: 18, kind: input, shape index: {}]   ;;  %s10965_s19 = inlined_call_operand.vmem [shape: f32[1,128], index: 19, kind: input, shape index: {}]   ;;  %s10966_s20 = inlined_call_operand.hbm [shape: f32[128,128], index: 20, kind: input, shape index: {}]   ;;  %s10967_s21 = inlined_call_operand.vmem [shape: f32[1,128], index: 21, kind: input, shape index: {}]   ;;  %s10968_s22 = inlined_call_operand.hbm [shape: f32[1,128], index: 22, kind: output, shape index: {0}]   ;;  %s10969_s23 = inlined_call_operand.hbm [shape: f32[1,128], index: 23, kind: output, shape index: {1}]  }
   0x1   :  { %10976 = sst [smem:[#allocation39_spill]] %s10946_s0 }
   0x2   :  { %10977 = sst [smem:[#allocation40_spill]] %s10947_s1 }
   0x3   :  { %10978 = sst [smem:[#allocation41_spill]] %s10948_s2 }
   0x4   :  { %10979 = sst [smem:[#allocation42_spill]] %s10949_s3 }
   0x5   :  { %10980 = sst [smem:[#allocation43_spill]] %s10950_s4 }
   0x6   :  { %10981 = sst [smem:[#allocation44_spill]] %s10951_s5 }
   0x7   :  { %10982 = sst [smem:[#allocation45_spill]] %s10952_s6 }
   0x8   :  { %10983 = sst [smem:[#allocation46_spill]] %s10953_s7 }
   0x9   :  { %10984 = sst [smem:[#allocation47_spill]] %s10967_s21 }
   0xa   :  { %10985 = sst [smem:[#allocation48_spill]] %s10969_s23 }
   0xb   :  { %29 = vsyncpa [#allocation7], 0 }
   0xc   :  { %30 = vsyncpa [#allocation8], 0 }
   0xd   :  { %31 = vsyncpa [#allocation5], 0 }
   0xe   :  { %32 = vsyncpa [#allocation12], 0 }
   0xf   :  { %33 = vsyncpa [#allocation15], 0 }
  0x10   :  { %34 = vsyncpa [#allocation18], 0 }
  0x11   :  { %35 = vsyncpa [#allocation21], 0 }
  0x12   :  { %36 = vsyncpa [#allocation24], 0 }
  0x13   :  { %37 = vsyncpa [#allocation6], 0 }
  0x14   :  { %38 = vsyncpa [#allocation28], 0  ;;  %s9432_s4 = smov [#allocation11]   ;;  %s10986_s5 = sld [smem:[#allocation43_spill]] }
  0x15   :  { %s74_s30 = sshll.u32 %s9432_s4, 4  ;;  %s75_s30 = int_to_ptr.vmem [resolvable:$true] %s74_s30 }
  0x1a   :  { %s9104_s1 = scalar_lea.hbm %s10986_s5, 256 }
  0x1b   :  { %p9105_p0 = scmp.ne.s32.totalorder %s10986_s5, %s9104_s1  ;;  %p9108_p1 = scmp.lt.u32.totalorder %s9104_s1, %s10986_s5 }
  0x1d   :  { %p9110_p2 = pnand %p9108_p1, %p9105_p0 }
  0x1f   :  { %9113 = shalt.err (!%p9110_p2)
}
  0x20   :  { %s9114_s7 = scalar_lea.vmem %s75_s30, 256  ;;  %p9119_p4 = scmp.lt.s32.totalorder %s75_s30, %s75_s30 }
  0x21   :  { %p9115_p3 = scmp.ne.s32.totalorder %s75_s30, %s9114_s7  ;;  %p9120_p5 = scmp.lt.s32.totalorder %s9114_s7, %s9114_s7 }
  0x23   :  { %p9121_p6 = por %p9120_p5, %p9119_p4 }
  0x25   :  { %p9122_p7 = pnand %p9121_p6, %p9115_p3 }
  0x27   :  { %9125 = shalt.err (!%p9122_p7)
}
  0x28   :  { %s9433_s28 = smov 128   ;;  %s9434_s29 = smov 8  }
  0x29   :  { %80 = dma.hbm_to_vmem [thread:$0]  %s10986_s5, 256, %s75_s30, [#allocation12], %s9433_s28, %s9433_s28, %s9434_s29  }
  0x2a   :  { %s9435_s4 = smov [#allocation14]   ;;  %s9436_s25 = smov [#allocation17]  }
  0x2b   :  { %s102_s24 = sshll.u32 %s9435_s4, 4  ;;  %s130_s1 = sshll.u32 %s9436_s25, 4  ;;  %s103_s24 = int_to_ptr.vmem [resolvable:$true] %s102_s24  ;;  %s131_s1 = int_to_ptr.vmem [resolvable:$true] %s130_s1 }
  0x2c   :  { %s9126_s6 = scalar_lea.hbm %s10954_s8, 4096 }
  0x2d   :  { %p9127_p8 = scmp.ne.s32.totalorder %s10954_s8, %s9126_s6  ;;  %p9130_p9 = scmp.lt.u32.totalorder %s9126_s6, %s10954_s8 }
  0x2f   :  { %p9132_p10 = pnand %p9130_p9, %p9127_p8 }
  0x31   :  { %9135 = shalt.err (!%p9132_p10)
}
  0x32   :  { %s9136_s30 = scalar_lea.vmem %s103_s24, 4096  ;;  %p9141_p12 = scmp.lt.s32.totalorder %s103_s24, %s103_s24 }
  0x33   :  { %p9137_p11 = scmp.ne.s32.totalorder %s103_s24, %s9136_s30  ;;  %p9142_p13 = scmp.lt.s32.totalorder %s9136_s30, %s9136_s30 }
  0x35   :  { %p9143_p0 = por %p9142_p13, %p9141_p12 }
  0x37   :  { %p9144_p1 = pnand %p9143_p0, %p9137_p11 }
  0x39   :  { %9147 = shalt.err (!%p9144_p1)
}
  0x3a   :  { %108 = dma.hbm_to_vmem [thread:$0]  %s10954_s8, 4096, %s103_s24, [#allocation15], %s9433_s28, %s9433_s28, %s9434_s29  }
  0x3b   :  { %s9148_s23 = scalar_lea.hbm %s10958_s12, 2048 }
  0x3c   :  { %p9149_p2 = scmp.ne.s32.totalorder %s10958_s12, %s9148_s23  ;;  %p9152_p3 = scmp.lt.u32.totalorder %s9148_s23, %s10958_s12 }
  0x3e   :  { %p9154_p4 = pnand %p9152_p3, %p9149_p2 }
  0x40   :  { %9157 = shalt.err (!%p9154_p4)
}
  0x41   :  { %s9158_s6 = scalar_lea.vmem %s131_s1, 2048  ;;  %p9163_p6 = scmp.lt.s32.totalorder %s131_s1, %s131_s1 }
  0x42   :  { %p9159_p5 = scmp.ne.s32.totalorder %s131_s1, %s9158_s6  ;;  %p9164_p7 = scmp.lt.s32.totalorder %s9158_s6, %s9158_s6 }
  0x44   :  { %p9165_p8 = por %p9164_p7, %p9163_p6 }
  0x46   :  { %p9166_p9 = pnand %p9165_p8, %p9159_p5 }
  0x48   :  { %9169 = shalt.err (!%p9166_p9)
}
  0x49   :  { %136 = dma.hbm_to_vmem [thread:$0]  %s10958_s12, 2048, %s131_s1, [#allocation18], %s9433_s28, %s9433_s28, %s9434_s29  }
  0x4a   :  { %s9437_s27 = smov [#allocation20]   ;;  %s9438_s30 = smov [#allocation23]  }
  0x4b   :  { %s156_s7 = sshll.u32 %s9437_s27, 4  ;;  %s182_s5 = sshll.u32 %s9438_s30, 4  ;;  %s157_s7 = int_to_ptr.vmem [resolvable:$true] %s156_s7  ;;  %s183_s5 = int_to_ptr.vmem [resolvable:$true] %s182_s5 }
  0x4c   :  { %s9170_s21 = scalar_lea.hbm %s10961_s15, 2048 }
  0x4d   :  { %p9171_p10 = scmp.ne.s32.totalorder %s10961_s15, %s9170_s21  ;;  %p9174_p11 = scmp.lt.u32.totalorder %s9170_s21, %s10961_s15 }
  0x4f   :  { %p9176_p12 = pnand %p9174_p11, %p9171_p10 }
  0x51   :  { %9179 = shalt.err (!%p9176_p12)
}
  0x52   :  { %s9180_s12 = scalar_lea.vmem %s157_s7, 2048  ;;  %p9185_p0 = scmp.lt.s32.totalorder %s157_s7, %s157_s7 }
  0x53   :  { %p9181_p13 = scmp.ne.s32.totalorder %s157_s7, %s9180_s12  ;;  %p9186_p1 = scmp.lt.s32.totalorder %s9180_s12, %s9180_s12 }
  0x55   :  { %p9187_p2 = por %p9186_p1, %p9185_p0 }
  0x57   :  { %p9188_p3 = pnand %p9187_p2, %p9181_p13 }
  0x59   :  { %9191 = shalt.err (!%p9188_p3)
}
  0x5a   :  { %162 = dma.hbm_to_vmem [thread:$0]  %s10961_s15, 2048, %s157_s7, [#allocation21], %s9433_s28, %s9433_s28, %s9434_s29  }
  0x5b   :  { %s9192_s24 = scalar_lea.hbm %s10964_s18, 2048 }
  0x5c   :  { %p9193_p4 = scmp.ne.s32.totalorder %s10964_s18, %s9192_s24  ;;  %p9196_p5 = scmp.lt.u32.totalorder %s9192_s24, %s10964_s18 }
  0x5e   :  { %p9198_p6 = pnand %p9196_p5, %p9193_p4 }
  0x60   :  { %9201 = shalt.err (!%p9198_p6)
}
  0x61   :  { %s9202_s21 = scalar_lea.vmem %s183_s5, 2048  ;;  %p9207_p8 = scmp.lt.s32.totalorder %s183_s5, %s183_s5 }
  0x62   :  { %p9203_p7 = scmp.ne.s32.totalorder %s183_s5, %s9202_s21  ;;  %p9208_p9 = scmp.lt.s32.totalorder %s9202_s21, %s9202_s21 }
  0x64   :  { %p9209_p10 = por %p9208_p9, %p9207_p8 }
  0x66   :  { %p9210_p11 = pnand %p9209_p10, %p9203_p7 }
  0x68   :  { %9213 = shalt.err (!%p9210_p11)
}
  0x69   :  { %188 = dma.hbm_to_vmem [thread:$0]  %s10964_s18, 2048, %s183_s5, [#allocation24], %s9433_s28, %s9433_s28, %s9434_s29  }
  0x6a   :  { %s10987_s25 = sld [smem:[#allocation39_spill]] }
  0x70   :  { %s9214_s26 = scalar_lea.hbm %s10987_s25, 16 }
  0x71   :  { %p9215_p12 = scmp.ne.s32.totalorder %s10987_s25, %s9214_s26  ;;  %p9218_p13 = scmp.lt.u32.totalorder %s9214_s26, %s10987_s25 }
  0x73   :  { %p9220_p0 = pnand %p9218_p13, %p9215_p12 }
  0x75   :  { %9223 = shalt.err (!%p9220_p0)
}
  0x76   :  { %s9439_s8 = smov [#allocation4]   ;;  %s10988_s30 = sld [smem:[#allocation40_spill]] }
  0x77   :  { %46 = dma.hbm_to_smem %s10987_s25, 16, %s9439_s8, [#allocation7]  }
  0x7c   :  { %s53_s3 = sshll.u32 %s10988_s30, 4  ;;  %s54_s3 = int_to_ptr.vmem [resolvable:$true] %s53_s3 }
  0x7d   :  { %s9224_s0 = scalar_lea.vmem %s54_s3, 16  ;;  %p9229_p2 = scmp.lt.s32.totalorder %s54_s3, %s54_s3 }
  0x7e   :  { %p9225_p1 = scmp.ne.s32.totalorder %s54_s3, %s9224_s0  ;;  %p9230_p3 = scmp.lt.s32.totalorder %s9224_s0, %s9224_s0 }
  0x80   :  { %p9231_p4 = por %p9230_p3, %p9229_p2 }
  0x82   :  { %p9232_p5 = pnand %p9231_p4, %p9225_p1 }
  0x84   :  { %9235 = shalt.err (!%p9232_p5)
}
  0x85   :  { %s9440_s21 = smov [#allocation9]   ;;  %s9441_s15 = smov [#allocation10]  }
  0x86   :  { %56 = dma.vmem_to_smem %s54_s3, 16, %s9440_s21, [#allocation8]  }
  0x87   :  { %s63_s7 = sshll.u32 %s9441_s15, 4  ;;  %s9442_s23 = smov [#allocation13]   ;;  %s64_s7 = int_to_ptr.vmem [resolvable:$true] %s63_s7 }
  0x88   :  { %s88_s4 = sshll.u32 %s9442_s23, 4  ;;  %s10989_s12 = sld [smem:[#allocation41_spill]]  ;;  %s89_s4 = int_to_ptr.vmem [resolvable:$true] %s88_s4 }
  0x8e   :  { %s9236_s1 = scalar_lea.hbm %s10989_s12, 128 }
  0x8f   :  { %p9237_p6 = scmp.ne.s32.totalorder %s10989_s12, %s9236_s1  ;;  %p9240_p7 = scmp.lt.u32.totalorder %s9236_s1, %s10989_s12 }
  0x91   :  { %p9242_p8 = pnand %p9240_p7, %p9237_p6 }
  0x93   :  { %9245 = shalt.err (!%p9242_p8)
}
  0x94   :  { %s9246_s27 = scalar_lea.vmem %s64_s7, 128  ;;  %p9251_p10 = scmp.lt.s32.totalorder %s64_s7, %s64_s7 }
  0x95   :  { %p9247_p9 = scmp.ne.s32.totalorder %s64_s7, %s9246_s27  ;;  %p9252_p11 = scmp.lt.s32.totalorder %s9246_s27, %s9246_s27 }
  0x97   :  { %p9253_p12 = por %p9252_p11, %p9251_p10 }
  0x99   :  { %p9254_p13 = pnand %p9253_p12, %p9247_p9 }
  0x9b   :  { %9257 = shalt.err (!%p9254_p13)
}
  0x9c   :  { %66 = dma.hbm_to_vmem [thread:$0]  %s10989_s12, 128, %s64_s7, [#allocation5]  }
  0x9d   :  { %s10990_s0 = sld [smem:[#allocation45_spill]] }
  0xa3   :  { %s9258_s21 = scalar_lea.hbm %s10990_s0, 4096 }
  0xa4   :  { %p9259_p0 = scmp.ne.s32.totalorder %s10990_s0, %s9258_s21  ;;  %p9262_p1 = scmp.lt.u32.totalorder %s9258_s21, %s10990_s0 }
  0xa6   :  { %p9264_p2 = pnand %p9262_p1, %p9259_p0 }
  0xa8   :  { %9267 = shalt.err (!%p9264_p2)
}
  0xa9   :  { %s9268_s1 = scalar_lea.vmem %s89_s4, 4096  ;;  %p9273_p4 = scmp.lt.s32.totalorder %s89_s4, %s89_s4 }
  0xaa   :  { %p9269_p3 = scmp.ne.s32.totalorder %s89_s4, %s9268_s1  ;;  %p9274_p5 = scmp.lt.s32.totalorder %s9268_s1, %s9268_s1 }
  0xac   :  { %p9275_p6 = por %p9274_p5, %p9273_p4 }
  0xae   :  { %p9276_p7 = pnand %p9275_p6, %p9269_p3 }
  0xb0   :  { %9279 = shalt.err (!%p9276_p7)
}
  0xb1   :  { %94 = dma.hbm_to_vmem [thread:$0]  %s10990_s0, 4096, %s89_s4, [#allocation12], %s9433_s28, %s9433_s28, %s9434_s29  }
  0xb2   :  { %s9443_s2 = smov [#allocation16]   ;;  %s9444_s8 = smov [#allocation19]  }
  0xb3   :  { %s116_s6 = sshll.u32 %s9443_s2, 4  ;;  %s142_s24 = sshll.u32 %s9444_s8, 4  ;;  %s117_s6 = int_to_ptr.vmem [resolvable:$true] %s116_s6  ;;  %s143_s24 = int_to_ptr.vmem [resolvable:$true] %s142_s24 }
  0xb4   :  { %s9280_s5 = scalar_lea.hbm %s10956_s10, 4096 }
  0xb5   :  { %p9281_p8 = scmp.ne.s32.totalorder %s10956_s10, %s9280_s5  ;;  %p9284_p9 = scmp.lt.u32.totalorder %s9280_s5, %s10956_s10 }
  0xb7   :  { %p9286_p10 = pnand %p9284_p9, %p9281_p8 }
  0xb9   :  { %9289 = shalt.err (!%p9286_p10)
}
  0xba   :  { %s9290_s4 = scalar_lea.vmem %s117_s6, 4096  ;;  %p9295_p12 = scmp.lt.s32.totalorder %s117_s6, %s117_s6 }
  0xbb   :  { %p9291_p11 = scmp.ne.s32.totalorder %s117_s6, %s9290_s4  ;;  %p9296_p13 = scmp.lt.s32.totalorder %s9290_s4, %s9290_s4 }
  0xbd   :  { %p9297_p0 = por %p9296_p13, %p9295_p12 }
  0xbf   :  { %p9298_p1 = pnand %p9297_p0, %p9291_p11 }
  0xc1   :  { %9301 = shalt.err (!%p9298_p1)
}
  0xc2   :  { %122 = dma.hbm_to_vmem [thread:$0]  %s10956_s10, 4096, %s117_s6, [#allocation15], %s9433_s28, %s9433_s28, %s9434_s29  }
  0xc3   :  { %s9302_s1 = scalar_lea.hbm %s10959_s13, 2048 }
  0xc4   :  { %p9303_p2 = scmp.ne.s32.totalorder %s10959_s13, %s9302_s1  ;;  %p9306_p3 = scmp.lt.u32.totalorder %s9302_s1, %s10959_s13 }
  0xc6   :  { %p9308_p4 = pnand %p9306_p3, %p9303_p2 }
  0xc8   :  { %9311 = shalt.err (!%p9308_p4)
}
  0xc9   :  { %s9312_s27 = scalar_lea.vmem %s143_s24, 2048  ;;  %p9317_p6 = scmp.lt.s32.totalorder %s143_s24, %s143_s24 }
  0xca   :  { %p9313_p5 = scmp.ne.s32.totalorder %s143_s24, %s9312_s27  ;;  %p9318_p7 = scmp.lt.s32.totalorder %s9312_s27, %s9312_s27 }
  0xcc   :  { %p9319_p8 = por %p9318_p7, %p9317_p6 }
  0xce   :  { %p9320_p9 = pnand %p9319_p8, %p9313_p5 }
  0xd0   :  { %9323 = shalt.err (!%p9320_p9)
}
  0xd1   :  { %148 = dma.hbm_to_vmem [thread:$0]  %s10959_s13, 2048, %s143_s24, [#allocation18], %s9433_s28, %s9433_s28, %s9434_s29  }
  0xd2   :  { %s9445_s18 = smov [#allocation22]   ;;  %s9446_s30 = smov [#allocation25]  }
  0xd3   :  { %s168_s5 = sshll.u32 %s9445_s18, 4  ;;  %s196_s3 = sshll.u32 %s9446_s30, 4  ;;  %s169_s5 = int_to_ptr.vmem [resolvable:$true] %s168_s5  ;;  %s197_s3 = int_to_ptr.vmem [resolvable:$true] %s196_s3 }
  0xd4   :  { %s9324_s4 = scalar_lea.hbm %s10962_s16, 4096 }
  0xd5   :  { %p9325_p10 = scmp.ne.s32.totalorder %s10962_s16, %s9324_s4  ;;  %p9328_p11 = scmp.lt.u32.totalorder %s9324_s4, %s10962_s16 }
  0xd7   :  { %p9330_p12 = pnand %p9328_p11, %p9325_p10 }
  0xd9   :  { %9333 = shalt.err (!%p9330_p12)
}
  0xda   :  { %s9334_s13 = scalar_lea.vmem %s169_s5, 4096  ;;  %p9339_p0 = scmp.lt.s32.totalorder %s169_s5, %s169_s5 }
  0xdb   :  { %p9335_p13 = scmp.ne.s32.totalorder %s169_s5, %s9334_s13  ;;  %p9340_p1 = scmp.lt.s32.totalorder %s9334_s13, %s9334_s13 }
  0xdd   :  { %p9341_p2 = por %p9340_p1, %p9339_p0 }
  0xdf   :  { %p9342_p3 = pnand %p9341_p2, %p9335_p13 }
  0xe1   :  { %9345 = shalt.err (!%p9342_p3)
}
  0xe2   :  { %174 = dma.hbm_to_vmem [thread:$0]  %s10962_s16, 4096, %s169_s5, [#allocation21], %s9433_s28, %s9433_s28, %s9434_s29  }
  0xe3   :  { %s9346_s2 = scalar_lea.hbm %s10966_s20, 2048 }
  0xe4   :  { %p9347_p4 = scmp.ne.s32.totalorder %s10966_s20, %s9346_s2  ;;  %p9350_p5 = scmp.lt.u32.totalorder %s9346_s2, %s10966_s20 }
  0xe6   :  { %p9352_p6 = pnand %p9350_p5, %p9347_p4 }
  0xe8   :  { %9355 = shalt.err (!%p9352_p6)
}
  0xe9   :  { %s9356_s18 = scalar_lea.vmem %s197_s3, 2048  ;;  %p9361_p8 = scmp.lt.s32.totalorder %s197_s3, %s197_s3 }
  0xea   :  { %p9357_p7 = scmp.ne.s32.totalorder %s197_s3, %s9356_s18  ;;  %p9362_p9 = scmp.lt.s32.totalorder %s9356_s18, %s9356_s18 }
  0xec   :  { %p9363_p10 = por %p9362_p9, %p9361_p8 }
  0xee   :  { %p9364_p11 = pnand %p9363_p10, %p9357_p7 }
  0xf0   :  { %9367 = shalt.err (!%p9364_p11)
}
  0xf1   :  { %202 = dma.hbm_to_vmem [thread:$0]  %s10966_s20, 2048, %s197_s3, [#allocation24], %s9433_s28, %s9433_s28, %s9434_s29  }
  0xf2   :  { %9412 = dma.done.wait [#allocation7], 16  }
  0xf3   :  { %9413 = vsyncadd [#allocation7], 4294967280 }
  0xf4   :  { %9414 = dma.done.wait [#allocation8], 16  }
  0xf5   :  { %9415 = vsyncadd [#allocation8], 4294967280 }
  0xf6   :  { %9416 = dma.done.wait [#allocation5], 128  }
  0xf7   :  { %9417 = vsyncadd [#allocation5], 4294967168 }
  0xf8   :  { %9418 = dma.done.wait [#allocation12], 4352  }
  0xf9   :  { %9419 = vsyncadd [#allocation12], 4294962944 }
  0xfa   :  { %9420 = dma.done.wait [#allocation15], 8192  }
  0xfb   :  { %9421 = vsyncadd [#allocation15], 4294959104 }
  0xfc   :  { %9422 = dma.done.wait [#allocation18], 4096  }
  0xfd   :  { %9423 = vsyncadd [#allocation18], 4294963200 }
  0xfe   :  { %9424 = dma.done.wait [#allocation21], 6144  }
  0xff   :  { %9425 = vsyncadd [#allocation21], 4294961152 }
 0x100   :  { %9426 = dma.done.wait [#allocation24], 4096  }
 0x101   :  { %9427 = vsyncadd [#allocation24], 4294963200 }
 0x102   :  { %244 = sfence }
 0x103   :  { %v263_v0 = vld [vmem:[#allocation14] sm:$0xff]  ;;  %v264_v1 = vld [vmem:[#allocation14 + $0x8] sm:$0xff]  ;;  %v265_v2 = vld [vmem:[#allocation14 + $0x10] sm:$0xff]  ;;  %v9447_v5 = vmov 0.0|0.0   ;;  %vm9448_vm0 = vmmov 0   ;;  %v9449_v8 = vmov 0.0  }
 0x104   :  { %v7710_v3 = vpack.c.bf16 %v264_v1, %v263_v0  ;;  %v266_v4 = vld [vmem:[#allocation14 + $0x18] sm:$0xff]  ;;  %7742 = vmatprep.subr.bf16.mxu1 %v9447_v5  ;;  %v247_v6 = vld [vmem:[#allocation13] sm:$0xff]  ;;  %v248_v7 = vld [vmem:[#allocation13 + $0x8] sm:$0xff]  ;;  %5852 = vmatprep.mubr.msk.f32.mxu1 %vm9448_vm0, %v9449_v8  ;;  %s382_s20 = sld [smem:[#allocation9]]  ;;  %s10991_s4 = sld [smem:[#allocation46_spill]] }
 0x105   :  { %v7714_v9 = vpack.c.bf16 %v266_v4, %v265_v2  ;;  %v9752_v10 = vpack.c.bf16 %v248_v7, %v247_v6  ;;  %v267_v11 = vld [vmem:[#allocation14 + $0x20] sm:$0xff]  ;;  %v268_v12 = vld [vmem:[#allocation14 + $0x28] sm:$0xff]  ;;  %v249_v13 = vld [vmem:[#allocation13 + $0x10] sm:$0xff]  ;;  %s9837_s29 = sld [smem:[#allocation4]]  ;;  %s4769_s26 = sld [smem:[#allocation9 + $0x1]] }
 0x106   :  { %7711 = vmatprep.subr.bf16.mxu0 %v7710_v3  ;;  %v250_v14 = vld [vmem:[#allocation13 + $0x18] sm:$0xff]  ;;  %v7718_v16 = vpack.c.bf16 %v268_v12, %v267_v11  ;;  %v251_v17 = vld [vmem:[#allocation13 + $0x20] sm:$0xff]  ;;  %v252_v18 = vld [vmem:[#allocation13 + $0x28] sm:$0xff]  ;;  %s9891_s24 = sld [smem:[#allocation4 + $0x1]]  ;;  %s4771_s7 = sld [smem:[#allocation9 + $0x2]] }
 0x107   :  { %7713 = vmatpush3.bf16.msra.mxu0 %v7710_v3  ;;  %7744 = vmatpush3.bf16.msra.mxu1 %v9752_v10  ;;  %v9755_v15 = vpack.c.bf16 %v250_v14, %v249_v13  ;;  %v269_v19 = vld [vmem:[#allocation14 + $0x30] sm:$0xff]  ;;  %v270_v20 = vld [vmem:[#allocation14 + $0x38] sm:$0xff]  ;;  %v9759_v21 = vpack.c.bf16 %v252_v18, %v251_v17  ;;  %v271_v26 = vld [vmem:[#allocation14 + $0x40] sm:$0xff]  ;;  %s9932_s2 = sld [smem:[#allocation4 + $0x2]]  ;;  %s4773_s27 = sld [smem:[#allocation9 + $0x3]] }
 0x108   :  { %7715 = vmatprep.subr.bf16.mxu0 %v7714_v9  ;;  %7745 = vmatprep.subr.bf16.mxu1 %v9447_v5  ;;  %v7722_v22 = vpack.c.bf16 %v270_v20, %v269_v19  ;;  %v253_v23 = vld [vmem:[#allocation13 + $0x30] sm:$0xff]  ;;  %v254_v24 = vld [vmem:[#allocation13 + $0x38] sm:$0xff]  ;;  %v272_v27 = vld [vmem:[#allocation14 + $0x48] sm:$0xff]  ;;  %s9973_s6 = sld [smem:[#allocation4 + $0x3]]  ;;  %s4775_s16 = sld [smem:[#allocation9 + $0x4]] }
 0x109   :  { %v298_v25 = vld [vmem:[#allocation11] sm:$0xff]  ;;  %v245_v28 = vld [vmem:[#allocation10] sm:$0xff]  ;;  %v9763_v29 = vpack.c.bf16 %v254_v24, %v253_v23  ;;  %v7726_v30 = vpack.c.bf16 %v272_v27, %v271_v26  ;;  %v255_v31 = vld [vmem:[#allocation13 + $0x40] sm:$0xff]  ;;  %s10055_s3 = sld [smem:[#allocation4 + $0x5]]  ;;  %s4779_s15 = sld [smem:[#allocation9 + $0x6]] }
 0x10a   :  { %5817 = vmatprep.mubr.f32.mxu0 %v298_v25  ;;  %246 = vst [vmem:[#allocation2] sm:$0xff] %v245_v28  ;;  %v256_v32 = vld [vmem:[#allocation13 + $0x48] sm:$0xff]  ;;  %v273_v33 = vld [vmem:[#allocation14 + $0x50] sm:$0xff]  ;;  %v274_v34 = vld [vmem:[#allocation14 + $0x58] sm:$0xff]  ;;  %s385_s28 = scalar_lea.vmem [#allocation2], %s382_s20  ;;  %s10014_s20 = sld [smem:[#allocation4 + $0x4]] }
 0x10b   :  { %7717 = vmatpush3.bf16.msra.mxu0 %v7714_v9  ;;  %7747 = vmatpush3.bf16.msra.mxu1 %v9755_v15  ;;  %v9767_v35 = vpack.c.bf16 %v256_v32, %v255_v31  ;;  %v7730_v36 = vpack.c.bf16 %v274_v34, %v273_v33  ;;  %v257_v37 = vld [vmem:[#allocation13 + $0x50] sm:$0xff]  ;;  %v258_v38 = vld [vmem:[#allocation13 + $0x58] sm:$0xff]  ;;  %v275_v39 = vld [vmem:[#allocation14 + $0x60] sm:$0xff]  ;;  %s383_s0 = scalar_lea.vmem [#allocation2], %s9837_s29  ;;  %s535_s13 = scalar_lea.vmem [#allocation2], %s4769_s26 }
 0x10c   :  { %7719 = vmatprep.subr.bf16.mxu0 %v7718_v16  ;;  %7748 = vmatprep.subr.bf16.mxu1 %v9447_v5  ;;  %v276_v40 = vld [vmem:[#allocation14 + $0x68] sm:$0xff]  ;;  %v9771_v41 = vpack.c.bf16 %v258_v38, %v257_v37  ;;  %v259_v43 = vld [vmem:[#allocation13 + $0x60] sm:$0xff]  ;;  %v277_v45 = vld [vmem:[#allocation14 + $0x70] sm:$0xff]  ;;  %s533_s1 = scalar_lea.vmem [#allocation2], %s9891_s24  ;;  %s685_s12 = scalar_lea.vmem [#allocation2], %s4771_s7 }
 0x10d   :  { %v7734_v42 = vpack.c.bf16 %v276_v40, %v275_v39  ;;  %v260_v44 = vld [vmem:[#allocation13 + $0x68] sm:$0xff]  ;;  %v278_v46 = vld [vmem:[#allocation14 + $0x78] sm:$0xff]  ;;  %v261_v49 = vld [vmem:[#allocation13 + $0x70] sm:$0xff]  ;;  %s683_s8 = scalar_lea.vmem [#allocation2], %s9932_s2  ;;  %s835_s10 = scalar_lea.vmem [#allocation2], %s4773_s27 }
 0x10e   :  { %v9775_v47 = vpack.c.bf16 %v260_v44, %v259_v43  ;;  %v7738_v48 = vpack.c.bf16 %v278_v46, %v277_v45  ;;  %v262_v50 = vld [vmem:[#allocation13 + $0x78] sm:$0xff]  ;;  %v279_v52 = vld [vmem:[#allocation16] sm:$0xff]  ;;  %v280_v53 = vld [vmem:[#allocation16 + $0x8] sm:$0xff]  ;;  %s833_s18 = scalar_lea.vmem [#allocation2], %s9973_s6  ;;  %s985_s5 = scalar_lea.vmem [#allocation2], %s4775_s16 }
 0x10f   :  { %7721 = vmatpush3.bf16.msra.mxu0 %v7718_v16  ;;  %7750 = vmatpush3.bf16.msra.mxu1 %v9759_v21  ;;  %v9779_v51 = vpack.c.bf16 %v262_v50, %v261_v49  ;;  %v299_v54 = vld [vmem:[#allocation11 + $0x8] sm:$0xff]  ;;  %v9783_v56 = vpack.c.bf16 %v280_v53, %v279_v52  ;;  %v281_v57 = vld [vmem:[#allocation16 + $0x10] sm:$0xff]  ;;  %v283_v60 = vld [vmem:[#allocation16 + $0x20] sm:$0xff]  ;;  %s4777_s29 = sld [smem:[#allocation9 + $0x5]]  ;;  %s1133_s21 = scalar_lea.vmem [#allocation2], %s10055_s3 }
 0x110   :  { %7723 = vmatprep.subr.bf16.mxu0 %v7722_v22  ;;  %7751 = vmatprep.subr.bf16.mxu1 %v9447_v5  ;;  %v282_v58 = vld [vmem:[#allocation16 + $0x18] sm:$0xff]  ;;  %v284_v61 = vld [vmem:[#allocation16 + $0x28] sm:$0xff]  ;;  %v285_v63 = vld [vmem:[#allocation16 + $0x30] sm:$0xff]  ;;  %s10096_s23 = sld [smem:[#allocation4 + $0x6]]  ;;  %s4781_s26 = sld [smem:[#allocation9 + $0x7]] }
 0x111   :  { %v386_v55 = vld [vmem:[%s385_s28] sm:$0x1]  ;;  %v9788_v59 = vpack.c.bf16 %v282_v58, %v281_v57  ;;  %v9798_v62 = vpack.c.bf16 %v284_v61, %v283_v60  ;;  %v286_v0 = vld [vmem:[#allocation16 + $0x38] sm:$0xff]  ;;  %v287_v2 = vld [vmem:[#allocation16 + $0x40] sm:$0xff]  ;;  %s983_s28 = scalar_lea.vmem [#allocation2], %s10014_s20  ;;  %s10137_s24 = sld [smem:[#allocation4 + $0x7]] }
 0x112   :  { %v9804_v1 = vpack.c.bf16 %v286_v0, %v285_v63  ;;  %v288_v3 = vld [vmem:[#allocation16 + $0x48] sm:$0xff]  ;;  %v289_v6 = vld [vmem:[#allocation16 + $0x50] sm:$0xff]  ;;  %v290_v7 = vld [vmem:[#allocation16 + $0x58] sm:$0xff]  ;;  %s4783_s7 = sld [smem:[#allocation9 + $0x8]]  ;;  %s4785_s27 = sld [smem:[#allocation9 + $0x9]] }
 0x113   :  { %7725 = vmatpush3.bf16.msra.mxu0 %v7722_v22  ;;  %7753 = vmatpush3.bf16.msra.mxu1 %v9763_v29  ;;  %v9810_v4 = vpack.c.bf16 %v288_v3, %v287_v2  ;;  %v9825_v9 = vpack.c.bf16 %v290_v7, %v289_v6  ;;  %v291_v11 = vld [vmem:[#allocation16 + $0x60] sm:$0xff]  ;;  %v292_v12 = vld [vmem:[#allocation16 + $0x68] sm:$0xff]  ;;  %v293_v14 = vld [vmem:[#allocation16 + $0x70] sm:$0xff]  ;;  %s10178_s2 = sld [smem:[#allocation4 + $0x8]]  ;;  %s10219_s6 = sld [smem:[#allocation4 + $0x9]] }
 0x114   :  { %7727 = vmatprep.subr.bf16.mxu0 %v7726_v30  ;;  %7754 = vmatprep.subr.bf16.mxu1 %v9447_v5  ;;  %v9829_v13 = vpack.c.bf16 %v292_v12, %v291_v11  ;;  %v294_v16 = vld [vmem:[#allocation16 + $0x78] sm:$0xff]  ;;  %v4767_v18 = vld [vmem:[%s10955_s9] ss:$0 sm:$0xff]  ;;  %s4787_s16 = sld [smem:[#allocation9 + $0xa]]  ;;  %s4789_s3 = sld [smem:[#allocation9 + $0xb]] }
 0x115   :  { %v9833_v17 = vpack.c.bf16 %v294_v16, %v293_v14  ;;  %v9845_v24 = vld [vmem:[%s10991_s4] sm:$0x1]  ;;  %s1135_s30 = scalar_lea.vmem [#allocation2], %s4777_s29  ;;  %s10259_s20 = sld [smem:[#allocation4 + $0xa]] }
 0x116   :  { %v384_v28 = vld [vmem:[%s383_s0] sm:$0x1]  ;;  %s1283_s25 = scalar_lea.vmem [#allocation2], %s10096_s23  ;;  %s10293_s23 = sld [smem:[#allocation4 + $0xb]] }
 0x117   :  { %7729 = vmatpush3.bf16.msra.mxu0 %v7726_v30  ;;  %7756 = vmatpush3.bf16.msra.mxu1 %v9767_v35  ;;  %v9870_v33 = vld [vmem:[%s10957_s11] sm:$0x1] }
 0x118   :  { %7731 = vmatprep.subr.bf16.mxu0 %v7730_v36  ;;  %7757 = vmatprep.subr.bf16.mxu1 %v9447_v5 }
 0x11b   :  { %7733 = vmatpush3.bf16.msra.mxu0 %v7730_v36  ;;  %7759 = vmatpush3.bf16.msra.mxu1 %v9771_v41 }
 0x11c   :  { %7735 = vmatprep.subr.bf16.mxu0 %v7734_v42  ;;  %7760 = vmatprep.subr.bf16.mxu1 %v9447_v5 }
 0x11f   :  { %7737 = vmatpush3.bf16.msra.mxu0 %v7734_v42  ;;  %7762 = vmatpush3.bf16.msra.mxu1 %v9775_v47 }
 0x120   :  { %7739 = vmatprep.subr.bf16.mxu0 %v7738_v48  ;;  %7763 = vmatprep.subr.bf16.mxu1 %v9447_v5 }
 0x123   :  { %7741 = vmatpush3.bf16.msra.mxu0 %v7738_v48  ;;  %7765 = vmatpush3.bf16.msra.mxu1 %v9779_v51 }
 0x124   :  { %7766 = vmatprep.subr.bf16.mxu0 %v9447_v5  ;;  %7790 = vmatprep.subr.bf16.mxu1 %v9447_v5 }
 0x126   :  { %5818 = vmatmul.mubr.f32.vlgmr.msra.gmra.mrb[0].mxu0 %v299_v54  ;;  %5853 = vmatmul.mubr.f32.vlgmr.msra.gmra.mrb[0].mxu1 %v386_v55 }
 0x127   :  { %7768 = vmatpush3.bf16.msra.mxu0 %v9783_v56  ;;  %5887 = vmatprep.mubr.msk.f32.mxu0 %vm9448_vm0, %v9449_v8 }
 0x128   :  { %7769 = vmatprep.subr.bf16.mxu0 %v9447_v5  ;;  %7792 = vmatpush3.bf16.msra.mxu1 %v9752_v10 }
 0x129   :  { %7793 = vmatprep.subr.bf16.mxu1 %v9447_v5  ;;  %5922 = vmatprep.mubr.msk.f32.mxu1 %vm9448_vm0, %v9449_v8 }
 0x12b   :  { %7771 = vmatpush3.bf16.msra.mxu0 %v9788_v59 }
 0x12c   :  { %7772 = vmatprep.subr.bf16.mxu0 %v9447_v5  ;;  %7795 = vmatpush3.bf16.msra.mxu1 %v9755_v15 }
 0x12d   :  { %7796 = vmatprep.subr.bf16.mxu1 %v9447_v5 }
 0x12f   :  { %7774 = vmatpush3.bf16.msra.mxu0 %v9798_v62 }
 0x130   :  { %7775 = vmatprep.subr.bf16.mxu0 %v9447_v5  ;;  %7798 = vmatpush3.bf16.msra.mxu1 %v9759_v21 }
 0x131   :  { %7799 = vmatprep.subr.bf16.mxu1 %v9447_v5 }
 0x133   :  { %7777 = vmatpush3.bf16.msra.mxu0 %v9804_v1 }
 0x134   :  { %7778 = vmatprep.subr.bf16.mxu0 %v9447_v5  ;;  %7801 = vmatpush3.bf16.msra.mxu1 %v9763_v29 }
 0x135   :  { %7802 = vmatprep.subr.bf16.mxu1 %v9447_v5 }
 0x137   :  { %7780 = vmatpush3.bf16.msra.mxu0 %v9810_v4 }
 0x138   :  { %7781 = vmatprep.subr.bf16.mxu0 %v9447_v5  ;;  %7804 = vmatpush3.bf16.msra.mxu1 %v9767_v35 }
 0x139   :  { %7805 = vmatprep.subr.bf16.mxu1 %v9447_v5 }
 0x13b   :  { %7783 = vmatpush3.bf16.msra.mxu0 %v9825_v9 }
 0x13c   :  { %7807 = vmatpush3.bf16.msra.mxu1 %v9771_v41  ;;  %7784 = vmatprep.subr.bf16.mxu0 %v9447_v5 }
 0x13d   :  { %7808 = vmatprep.subr.bf16.mxu1 %v9447_v5 }
 0x13f   :  { %7786 = vmatpush3.bf16.msra.mxu0 %v9829_v13 }
 0x140   :  { %7810 = vmatpush3.bf16.msra.mxu1 %v9775_v47  ;;  %7787 = vmatprep.subr.bf16.mxu0 %v9447_v5 }
 0x141   :  { %7811 = vmatprep.subr.bf16.mxu1 %v9447_v5 }
 0x143   :  { %7789 = vmatpush3.bf16.msra.mxu0 %v9833_v17 }
 0x144   :  { %7813 = vmatpush3.bf16.msra.mxu1 %v9779_v51  ;;  %7814 = vmatprep.subr.bf16.mxu0 %v9447_v5 }
 0x145   :  { %7838 = vmatprep.subr.bf16.mxu1 %v9447_v5 }
 0x1f9   :  { %v5819_v19 = vpop.f32.mrb[0].mxu0  ;;  %v453_v20 = vpop.f32.mrb[0].mxu1 }
 0x1fa   :  { %v376_v22 = vadd.f32 %v5819_v19, %v4767_v18  ;;  %v370_v23 = vpop.f32.mrb[1].mxu0  ;;  %v5854_v25 = vpop.f32.mrb[1].mxu1  ;;  %v454_v27 = vadd.f32 %v453_v20, %v9845_v24 }
 0x1fb   :  { %v371_v26 = vadd.f32 %v4767_v18, %v370_v23 }
 0x1fc   :  { %380 = vst [vmem:[#allocation3 + $0x8] sm:$0xff] %v376_v22  ;;  %v457_v30 = vadd.f32 %v454_v27, %v384_v28 }
 0x1fd   :  { %379 = vst [vmem:[#allocation3] sm:$0xff] %v371_v26 }
 0x204   :  { %v458_v31 = vld [vmem:[#allocation3] sm:$0x1]  ;;  %v608_v45 = vld [vmem:[#allocation3 + $0x1] sm:$0x1]  ;;  %v758_v60 = vld [vmem:[#allocation3 + $0x2] sm:$0x1] }
 0x205   :  { %v459_v32 = vadd.f32 %v458_v31, %v457_v30  ;;  %v908_v16 = vld [vmem:[#allocation3 + $0x3] sm:$0x1]  ;;  %v1058_v31 = vld [vmem:[#allocation3 + $0x4] sm:$0x1] }
 0x207   :  { %5888 = vmatmul.mubr.f32.vlgmr.msra.gmra.mrb[2].mxu0 %v459_v32 }
 0x208   :  { %7816 = vmatpush3.bf16.msra.mxu0 %v9783_v56  ;;  %5957 = vmatprep.mubr.msk.f32.mxu0 %vm9448_vm0, %v9449_v8 }
 0x209   :  { %7817 = vmatprep.subr.bf16.mxu0 %v9447_v5 }
 0x20c   :  { %7819 = vmatpush3.bf16.msra.mxu0 %v9788_v59 }
 0x20d   :  { %7820 = vmatprep.subr.bf16.mxu0 %v9447_v5 }
 0x210   :  { %7822 = vmatpush3.bf16.msra.mxu0 %v9798_v62 }
 0x211   :  { %7823 = vmatprep.subr.bf16.mxu0 %v9447_v5 }
 0x214   :  { %7825 = vmatpush3.bf16.msra.mxu0 %v9804_v1 }
 0x215   :  { %7826 = vmatprep.subr.bf16.mxu0 %v9447_v5 }
 0x218   :  { %7828 = vmatpush3.bf16.msra.mxu0 %v9810_v4 }
 0x219   :  { %7829 = vmatprep.subr.bf16.mxu0 %v9447_v5 }
 0x21c   :  { %7831 = vmatpush3.bf16.msra.mxu0 %v9825_v9 }
 0x21d   :  { %7832 = vmatprep.subr.bf16.mxu0 %v9447_v5 }
 0x220   :  { %7834 = vmatpush3.bf16.msra.mxu0 %v9829_v13 }
 0x221   :  { %7835 = vmatprep.subr.bf16.mxu0 %v9447_v5 }
 0x224   :  { %7837 = vmatpush3.bf16.msra.mxu0 %v9833_v17 }
 0x225   :  { %7862 = vmatprep.subr.bf16.mxu0 %v9447_v5 }
 0x2da   :  { %v526_v34 = vpop.f32.mrb[2].mxu0 }
 0x2db   :  { %v527_v36 = vadd.f32 %v526_v34, %v9870_v33  ;;  %v5889_v37 = vpop.f32.mrb[3].mxu0 }
 0x2dd   :  { %530 = vst [vmem:[%s383_s0] sm:$0x1] %v527_v36  ;;  %s1285_s0 = scalar_lea.vmem [#allocation2], %s4779_s15 }
 0x2e4   :  { %v536_v38 = vld [vmem:[%s535_s13] sm:$0x1]  ;;  %s1435_s13 = scalar_lea.vmem [#allocation2], %s4781_s26  ;;  %s2319_s26 = sld [smem:[#allocation9]] }
 0x2e5   :  { %5923 = vmatmul.mubr.f32.vlgmr.msra.gmra.mrb[2].mxu1 %v536_v38  ;;  %v534_v43 = vld [vmem:[%s533_s1] sm:$0x1] }
 0x2e6   :  { %7840 = vmatpush3.bf16.msra.mxu1 %v9752_v10  ;;  %5992 = vmatprep.mubr.msk.f32.mxu1 %vm9448_vm0, %v9449_v8 }
 0x2e7   :  { %7841 = vmatprep.subr.bf16.mxu1 %v9447_v5 }
 0x2ea   :  { %7843 = vmatpush3.bf16.msra.mxu1 %v9755_v15 }
 0x2eb   :  { %7844 = vmatprep.subr.bf16.mxu1 %v9447_v5 }
 0x2ee   :  { %7846 = vmatpush3.bf16.msra.mxu1 %v9759_v21 }
 0x2ef   :  { %7847 = vmatprep.subr.bf16.mxu1 %v9447_v5 }
 0x2f2   :  { %7849 = vmatpush3.bf16.msra.mxu1 %v9763_v29 }
 0x2f3   :  { %7850 = vmatprep.subr.bf16.mxu1 %v9447_v5 }
 0x2f6   :  { %7852 = vmatpush3.bf16.msra.mxu1 %v9767_v35 }
 0x2f7   :  { %7853 = vmatprep.subr.bf16.mxu1 %v9447_v5 }
 0x2fa   :  { %7855 = vmatpush3.bf16.msra.mxu1 %v9771_v41 }
 0x2fb   :  { %7856 = vmatprep.subr.bf16.mxu1 %v9447_v5 }
 0x2fe   :  { %7858 = vmatpush3.bf16.msra.mxu1 %v9775_v47 }
 0x2ff   :  { %7859 = vmatprep.subr.bf16.mxu1 %v9447_v5 }
 0x302   :  { %7861 = vmatpush3.bf16.msra.mxu1 %v9779_v51 }
 0x303   :  { %7886 = vmatprep.subr.bf16.mxu1 %v9447_v5 }
 0x3b8   :  { %v603_v39 = vpop.f32.mrb[2].mxu1 }
 0x3b9   :  { %v604_v40 = vadd.f32 %v603_v39, %v9845_v24  ;;  %v5924_v42 = vpop.f32.mrb[3].mxu1 }
 0x3bb   :  { %v607_v44 = vadd.f32 %v604_v40, %v534_v43 }
 0x3bd   :  { %v609_v46 = vadd.f32 %v608_v45, %v607_v44  ;;  %v1208_v45 = vld [vmem:[#allocation3 + $0x5] sm:$0x1] }
 0x3bf   :  { %5958 = vmatmul.mubr.f32.vlgmr.msra.gmra.mrb[4].mxu0 %v609_v46 }
 0x3c0   :  { %7864 = vmatpush3.bf16.msra.mxu0 %v9783_v56  ;;  %6027 = vmatprep.mubr.msk.f32.mxu0 %vm9448_vm0, %v9449_v8 }
 0x3c1   :  { %7865 = vmatprep.subr.bf16.mxu0 %v9447_v5 }
 0x3c4   :  { %7867 = vmatpush3.bf16.msra.mxu0 %v9788_v59 }
 0x3c5   :  { %7868 = vmatprep.subr.bf16.mxu0 %v9447_v5 }
 0x3c8   :  { %7870 = vmatpush3.bf16.msra.mxu0 %v9798_v62 }
 0x3c9   :  { %7871 = vmatprep.subr.bf16.mxu0 %v9447_v5 }
 0x3cc   :  { %7873 = vmatpush3.bf16.msra.mxu0 %v9804_v1 }
 0x3cd   :  { %7874 = vmatprep.subr.bf16.mxu0 %v9447_v5 }
 0x3d0   :  { %7876 = vmatpush3.bf16.msra.mxu0 %v9810_v4 }
 0x3d1   :  { %7877 = vmatprep.subr.bf16.mxu0 %v9447_v5 }
 0x3d4   :  { %7879 = vmatpush3.bf16.msra.mxu0 %v9825_v9 }
 0x3d5   :  { %7880 = vmatprep.subr.bf16.mxu0 %v9447_v5 }
 0x3d8   :  { %7882 = vmatpush3.bf16.msra.mxu0 %v9829_v13 }
 0x3d9   :  { %7883 = vmatprep.subr.bf16.mxu0 %v9447_v5 }
 0x3dc   :  { %7885 = vmatpush3.bf16.msra.mxu0 %v9833_v17 }
 0x3dd   :  { %7910 = vmatprep.subr.bf16.mxu0 %v9447_v5 }
 0x492   :  { %v676_v48 = vpop.f32.mrb[4].mxu0 }
 0x493   :  { %v677_v49 = vadd.f32 %v676_v48, %v9870_v33  ;;  %v5959_v50 = vpop.f32.mrb[5].mxu0 }
 0x495   :  { %680 = vst [vmem:[%s533_s1] sm:$0x1] %v677_v49  ;;  %s1433_s1 = scalar_lea.vmem [#allocation2], %s10137_s24 }
 0x49c   :  { %v686_v52 = vld [vmem:[%s685_s12] sm:$0x1]  ;;  %s1585_s12 = scalar_lea.vmem [#allocation2], %s4783_s7  ;;  %s4802_s7 = sld [smem:[#allocation9 + $0x6]] }
 0x49d   :  { %5993 = vmatmul.mubr.f32.vlgmr.msra.gmra.mrb[4].mxu1 %v686_v52  ;;  %v684_v57 = vld [vmem:[%s683_s8] sm:$0x1] }
 0x49e   :  { %7888 = vmatpush3.bf16.msra.mxu1 %v9752_v10  ;;  %6062 = vmatprep.mubr.msk.f32.mxu1 %vm9448_vm0, %v9449_v8 }
 0x49f   :  { %7889 = vmatprep.subr.bf16.mxu1 %v9447_v5 }
 0x4a2   :  { %7891 = vmatpush3.bf16.msra.mxu1 %v9755_v15 }
 0x4a3   :  { %7892 = vmatprep.subr.bf16.mxu1 %v9447_v5 }
 0x4a6   :  { %7894 = vmatpush3.bf16.msra.mxu1 %v9759_v21 }
 0x4a7   :  { %7895 = vmatprep.subr.bf16.mxu1 %v9447_v5 }
 0x4aa   :  { %7897 = vmatpush3.bf16.msra.mxu1 %v9763_v29 }
 0x4ab   :  { %7898 = vmatprep.subr.bf16.mxu1 %v9447_v5 }
 0x4ae   :  { %7900 = vmatpush3.bf16.msra.mxu1 %v9767_v35 }
 0x4af   :  { %7901 = vmatprep.subr.bf16.mxu1 %v9447_v5 }
 0x4b2   :  { %7903 = vmatpush3.bf16.msra.mxu1 %v9771_v41 }
 0x4b3   :  { %7904 = vmatprep.subr.bf16.mxu1 %v9447_v5 }
 0x4b6   :  { %7906 = vmatpush3.bf16.msra.mxu1 %v9775_v47 }
 0x4b7   :  { %7907 = vmatprep.subr.bf16.mxu1 %v9447_v5 }
 0x4ba   :  { %7909 = vmatpush3.bf16.msra.mxu1 %v9779_v51 }
 0x4bb   :  { %7934 = vmatprep.subr.bf16.mxu1 %v9447_v5 }
 0x570   :  { %v753_v53 = vpop.f32.mrb[4].mxu1 }
 0x571   :  { %v754_v54 = vadd.f32 %v753_v53, %v9845_v24  ;;  %v5994_v55 = vpop.f32.mrb[5].mxu1 }
 0x573   :  { %v757_v58 = vadd.f32 %v754_v54, %v684_v57 }
 0x575   :  { %v759_v61 = vadd.f32 %v758_v60, %v757_v58  ;;  %v1358_v60 = vld [vmem:[#allocation3 + $0x6] sm:$0x1] }
 0x577   :  { %6028 = vmatmul.mubr.f32.vlgmr.msra.gmra.mrb[6].mxu0 %v759_v61 }
 0x578   :  { %7912 = vmatpush3.bf16.msra.mxu0 %v9783_v56  ;;  %6097 = vmatprep.mubr.msk.f32.mxu0 %vm9448_vm0, %v9449_v8 }
 0x579   :  { %7913 = vmatprep.subr.bf16.mxu0 %v9447_v5 }
 0x57c   :  { %7915 = vmatpush3.bf16.msra.mxu0 %v9788_v59 }
 0x57d   :  { %7916 = vmatprep.subr.bf16.mxu0 %v9447_v5 }
 0x580   :  { %7918 = vmatpush3.bf16.msra.mxu0 %v9798_v62 }
 0x581   :  { %7919 = vmatprep.subr.bf16.mxu0 %v9447_v5 }
 0x584   :  { %7921 = vmatpush3.bf16.msra.mxu0 %v9804_v1 }
 0x585   :  { %7922 = vmatprep.subr.bf16.mxu0 %v9447_v5 }
 0x588   :  { %7924 = vmatpush3.bf16.msra.mxu0 %v9810_v4 }
 0x589   :  { %7925 = vmatprep.subr.bf16.mxu0 %v9447_v5 }
 0x58c   :  { %7927 = vmatpush3.bf16.msra.mxu0 %v9825_v9 }
 0x58d   :  { %7928 = vmatprep.subr.bf16.mxu0 %v9447_v5 }
 0x590   :  { %7930 = vmatpush3.bf16.msra.mxu0 %v9829_v13 }
 0x591   :  { %7931 = vmatprep.subr.bf16.mxu0 %v9447_v5 }
 0x594   :  { %7933 = vmatpush3.bf16.msra.mxu0 %v9833_v17 }
 0x595   :  { %7958 = vmatprep.subr.bf16.mxu0 %v9447_v5 }
 0x64a   :  { %v826_v63 = vpop.f32.mrb[6].mxu0 }
 0x64b   :  { %v827_v0 = vadd.f32 %v826_v63, %v9870_v33  ;;  %v6029_v2 = vpop.f32.mrb[7].mxu0 }
 0x64d   :  { %830 = vst [vmem:[%s683_s8] sm:$0x1] %v827_v0  ;;  %s1583_s8 = scalar_lea.vmem [#allocation2], %s10178_s2 }
 0x654   :  { %v836_v3 = vld [vmem:[%s835_s10] sm:$0x1]  ;;  %s1735_s10 = scalar_lea.vmem [#allocation2], %s4785_s27  ;;  %s4804_s27 = sld [smem:[#allocation9 + $0x7]] }
 0x655   :  { %6063 = vmatmul.mubr.f32.vlgmr.msra.gmra.mrb[6].mxu1 %v836_v3  ;;  %v834_v12 = vld [vmem:[%s833_s18] sm:$0x1] }
 0x656   :  { %7936 = vmatpush3.bf16.msra.mxu1 %v9752_v10  ;;  %6132 = vmatprep.mubr.msk.f32.mxu1 %vm9448_vm0, %v9449_v8 }
 0x657   :  { %7937 = vmatprep.subr.bf16.mxu1 %v9447_v5 }
 0x65a   :  { %7939 = vmatpush3.bf16.msra.mxu1 %v9755_v15 }
 0x65b   :  { %7940 = vmatprep.subr.bf16.mxu1 %v9447_v5 }
 0x65e   :  { %7942 = vmatpush3.bf16.msra.mxu1 %v9759_v21 }
 0x65f   :  { %7943 = vmatprep.subr.bf16.mxu1 %v9447_v5 }
 0x662   :  { %7945 = vmatpush3.bf16.msra.mxu1 %v9763_v29 }
 0x663   :  { %7946 = vmatprep.subr.bf16.mxu1 %v9447_v5 }
 0x666   :  { %7948 = vmatpush3.bf16.msra.mxu1 %v9767_v35 }
 0x667   :  { %7949 = vmatprep.subr.bf16.mxu1 %v9447_v5 }
 0x66a   :  { %7951 = vmatpush3.bf16.msra.mxu1 %v9771_v41 }
 0x66b   :  { %7952 = vmatprep.subr.bf16.mxu1 %v9447_v5 }
 0x66e   :  { %7954 = vmatpush3.bf16.msra.mxu1 %v9775_v47 }
 0x66f   :  { %7955 = vmatprep.subr.bf16.mxu1 %v9447_v5 }
 0x672   :  { %7957 = vmatpush3.bf16.msra.mxu1 %v9779_v51 }
 0x673   :  { %7982 = vmatprep.subr.bf16.mxu1 %v9447_v5 }
 0x728   :  { %v903_v6 = vpop.f32.mrb[6].mxu1 }
 0x729   :  { %v904_v7 = vadd.f32 %v903_v6, %v9845_v24  ;;  %v6064_v11 = vpop.f32.mrb[7].mxu1 }
 0x72b   :  { %v907_v14 = vadd.f32 %v904_v7, %v834_v12 }
 0x72d   :  { %v909_v18 = vadd.f32 %v908_v16, %v907_v14  ;;  %v1508_v16 = vld [vmem:[#allocation3 + $0x7] sm:$0x1] }
 0x72f   :  { %6098 = vmatmul.mubr.f32.vlgmr.msra.gmra.mrb[8].mxu0 %v909_v18 }
 0x730   :  { %7960 = vmatpush3.bf16.msra.mxu0 %v9783_v56  ;;  %6167 = vmatprep.mubr.msk.f32.mxu0 %vm9448_vm0, %v9449_v8 }
 0x731   :  { %7961 = vmatprep.subr.bf16.mxu0 %v9447_v5 }
 0x734   :  { %7963 = vmatpush3.bf16.msra.mxu0 %v9788_v59 }
 0x735   :  { %7964 = vmatprep.subr.bf16.mxu0 %v9447_v5 }
 0x738   :  { %7966 = vmatpush3.bf16.msra.mxu0 %v9798_v62 }
 0x739   :  { %7967 = vmatprep.subr.bf16.mxu0 %v9447_v5 }
 0x73c   :  { %7969 = vmatpush3.bf16.msra.mxu0 %v9804_v1 }
 0x73d   :  { %7970 = vmatprep.subr.bf16.mxu0 %v9447_v5 }
 0x740   :  { %7972 = vmatpush3.bf16.msra.mxu0 %v9810_v4 }
 0x741   :  { %7973 = vmatprep.subr.bf16.mxu0 %v9447_v5 }
 0x744   :  { %7975 = vmatpush3.bf16.msra.mxu0 %v9825_v9 }
 0x745   :  { %7976 = vmatprep.subr.bf16.mxu0 %v9447_v5 }
 0x748   :  { %7978 = vmatpush3.bf16.msra.mxu0 %v9829_v13 }
 0x749   :  { %7979 = vmatprep.subr.bf16.mxu0 %v9447_v5 }
 0x74c   :  { %7981 = vmatpush3.bf16.msra.mxu0 %v9833_v17 }
 0x74d   :  { %8006 = vmatprep.subr.bf16.mxu0 %v9447_v5 }
 0x802   :  { %v976_v19 = vpop.f32.mrb[8].mxu0 }
 0x803   :  { %v977_v20 = vadd.f32 %v976_v19, %v9870_v33  ;;  %v6099_v22 = vpop.f32.mrb[9].mxu0 }
 0x805   :  { %980 = vst [vmem:[%s833_s18] sm:$0x1] %v977_v20  ;;  %s1733_s18 = scalar_lea.vmem [#allocation2], %s10219_s6 }
 0x80c   :  { %v986_v23 = vld [vmem:[%s985_s5] sm:$0x1]  ;;  %s1885_s5 = scalar_lea.vmem [#allocation2], %s4787_s16 }
 0x80d   :  { %6133 = vmatmul.mubr.f32.vlgmr.msra.gmra.mrb[8].mxu1 %v986_v23  ;;  %v984_v28 = vld [vmem:[%s983_s28] sm:$0x1] }
 0x80e   :  { %7984 = vmatpush3.bf16.msra.mxu1 %v9752_v10  ;;  %6202 = vmatprep.mubr.msk.f32.mxu1 %vm9448_vm0, %v9449_v8 }
 0x80f   :  { %7985 = vmatprep.subr.bf16.mxu1 %v9447_v5 }
 0x812   :  { %7987 = vmatpush3.bf16.msra.mxu1 %v9755_v15 }
 0x813   :  { %7988 = vmatprep.subr.bf16.mxu1 %v9447_v5 }
 0x816   :  { %7990 = vmatpush3.bf16.msra.mxu1 %v9759_v21 }
 0x817   :  { %7991 = vmatprep.subr.bf16.mxu1 %v9447_v5 }
 0x81a   :  { %7993 = vmatpush3.bf16.msra.mxu1 %v9763_v29 }
 0x81b   :  { %7994 = vmatprep.subr.bf16.mxu1 %v9447_v5 }
 0x81e   :  { %7996 = vmatpush3.bf16.msra.mxu1 %v9767_v35 }
 0x81f   :  { %7997 = vmatprep.subr.bf16.mxu1 %v9447_v5 }
 0x822   :  { %7999 = vmatpush3.bf16.msra.mxu1 %v9771_v41 }
 0x823   :  { %8000 = vmatprep.subr.bf16.mxu1 %v9447_v5 }
 0x826   :  { %8002 = vmatpush3.bf16.msra.mxu1 %v9775_v47 }
 0x827   :  { %8003 = vmatprep.subr.bf16.mxu1 %v9447_v5 }
 0x82a   :  { %8005 = vmatpush3.bf16.msra.mxu1 %v9779_v51 }
 0x82b   :  { %8030 = vmatprep.subr.bf16.mxu1 %v9447_v5 }
 0x8e0   :  { %v1053_v25 = vpop.f32.mrb[8].mxu1 }
 0x8e1   :  { %v1054_v26 = vadd.f32 %v1053_v25, %v9845_v24  ;;  %v6134_v27 = vpop.f32.mrb[9].mxu1 }
 0x8e3   :  { %v1057_v30 = vadd.f32 %v1054_v26, %v984_v28 }
 0x8e5   :  { %v1059_v32 = vadd.f32 %v1058_v31, %v1057_v30  ;;  %v1658_v31 = vld [vmem:[#allocation3 + $0x8] sm:$0x1] }
 0x8e7   :  { %6168 = vmatmul.mubr.f32.vlgmr.msra.gmra.mrb[10].mxu0 %v1059_v32 }
 0x8e8   :  { %8008 = vmatpush3.bf16.msra.mxu0 %v9783_v56  ;;  %6237 = vmatprep.mubr.msk.f32.mxu0 %vm9448_vm0, %v9449_v8 }
 0x8e9   :  { %8009 = vmatprep.subr.bf16.mxu0 %v9447_v5 }
 0x8ec   :  { %8011 = vmatpush3.bf16.msra.mxu0 %v9788_v59 }
 0x8ed   :  { %8012 = vmatprep.subr.bf16.mxu0 %v9447_v5 }
 0x8f0   :  { %8014 = vmatpush3.bf16.msra.mxu0 %v9798_v62 }
 0x8f1   :  { %8015 = vmatprep.subr.bf16.mxu0 %v9447_v5 }
 0x8f4   :  { %8017 = vmatpush3.bf16.msra.mxu0 %v9804_v1 }
 0x8f5   :  { %8018 = vmatprep.subr.bf16.mxu0 %v9447_v5 }
 0x8f8   :  { %8020 = vmatpush3.bf16.msra.mxu0 %v9810_v4 }
 0x8f9   :  { %8021 = vmatprep.subr.bf16.mxu0 %v9447_v5 }
 0x8fc   :  { %8023 = vmatpush3.bf16.msra.mxu0 %v9825_v9 }
 0x8fd   :  { %8024 = vmatprep.subr.bf16.mxu0 %v9447_v5 }
 0x900   :  { %8026 = vmatpush3.bf16.msra.mxu0 %v9829_v13 }
 0x901   :  { %8027 = vmatprep.subr.bf16.mxu0 %v9447_v5 }
 0x904   :  { %8029 = vmatpush3.bf16.msra.mxu0 %v9833_v17 }
 0x905   :  { %8054 = vmatprep.subr.bf16.mxu0 %v9447_v5 }
 0x9ba   :  { %v1126_v34 = vpop.f32.mrb[10].mxu0 }
 0x9bb   :  { %v1127_v36 = vadd.f32 %v1126_v34, %v9870_v33  ;;  %v6169_v37 = vpop.f32.mrb[11].mxu0 }
 0x9bd   :  { %1130 = vst [vmem:[%s983_s28] sm:$0x1] %v1127_v36  ;;  %s10483_s28 = sld [smem:[#allocation4 + $0x2]] }
 0x9c3   :  { %s2620_s29 = scalar_lea.vmem [#allocation2], %s10483_s28 }
 0x9c4   :  { %v1136_v38 = vld [vmem:[%s1135_s30] sm:$0x1]  ;;  %s1883_s30 = scalar_lea.vmem [#allocation2], %s10259_s20 }
 0x9c5   :  { %6203 = vmatmul.mubr.f32.vlgmr.msra.gmra.mrb[10].mxu1 %v1136_v38  ;;  %v1134_v43 = vld [vmem:[%s1133_s21] sm:$0x1] }
 0x9c6   :  { %8032 = vmatpush3.bf16.msra.mxu1 %v9752_v10  ;;  %6272 = vmatprep.mubr.msk.f32.mxu1 %vm9448_vm0, %v9449_v8 }
 0x9c7   :  { %8033 = vmatprep.subr.bf16.mxu1 %v9447_v5 }
 0x9ca   :  { %8035 = vmatpush3.bf16.msra.mxu1 %v9755_v15 }
 0x9cb   :  { %8036 = vmatprep.subr.bf16.mxu1 %v9447_v5 }
 0x9ce   :  { %8038 = vmatpush3.bf16.msra.mxu1 %v9759_v21 }
 0x9cf   :  { %8039 = vmatprep.subr.bf16.mxu1 %v9447_v5 }
 0x9d2   :  { %8041 = vmatpush3.bf16.msra.mxu1 %v9763_v29 }
 0x9d3   :  { %8042 = vmatprep.subr.bf16.mxu1 %v9447_v5 }
 0x9d6   :  { %8044 = vmatpush3.bf16.msra.mxu1 %v9767_v35 }
 0x9d7   :  { %8045 = vmatprep.subr.bf16.mxu1 %v9447_v5 }
 0x9da   :  { %8047 = vmatpush3.bf16.msra.mxu1 %v9771_v41 }
 0x9db   :  { %8048 = vmatprep.subr.bf16.mxu1 %v9447_v5 }
 0x9de   :  { %8050 = vmatpush3.bf16.msra.mxu1 %v9775_v47 }
 0x9df   :  { %8051 = vmatprep.subr.bf16.mxu1 %v9447_v5 }
 0x9e2   :  { %8053 = vmatpush3.bf16.msra.mxu1 %v9779_v51 }
 0x9e3   :  { %8078 = vmatprep.subr.bf16.mxu1 %v9447_v5 }
 0xa98   :  { %v1203_v39 = vpop.f32.mrb[10].mxu1 }
 0xa99   :  { %v1204_v40 = vadd.f32 %v1203_v39, %v9845_v24  ;;  %v6204_v42 = vpop.f32.mrb[11].mxu1 }
 0xa9b   :  { %v1207_v44 = vadd.f32 %v1204_v40, %v1134_v43 }
 0xa9d   :  { %v1209_v46 = vadd.f32 %v1208_v45, %v1207_v44  ;;  %v1808_v45 = vld [vmem:[#allocation3 + $0x9] sm:$0x1] }
 0xa9f   :  { %6238 = vmatmul.mubr.f32.vlgmr.msra.gmra.mrb[12].mxu0 %v1209_v46 }
 0xaa0   :  { %8056 = vmatpush3.bf16.msra.mxu0 %v9783_v56  ;;  %6307 = vmatprep.mubr.msk.f32.mxu0 %vm9448_vm0, %v9449_v8 }
 0xaa1   :  { %8057 = vmatprep.subr.bf16.mxu0 %v9447_v5 }
 0xaa4   :  { %8059 = vmatpush3.bf16.msra.mxu0 %v9788_v59 }
 0xaa5   :  { %8060 = vmatprep.subr.bf16.mxu0 %v9447_v5 }
 0xaa8   :  { %8062 = vmatpush3.bf16.msra.mxu0 %v9798_v62 }
 0xaa9   :  { %8063 = vmatprep.subr.bf16.mxu0 %v9447_v5 }
 0xaac   :  { %8065 = vmatpush3.bf16.msra.mxu0 %v9804_v1 }
 0xaad   :  { %8066 = vmatprep.subr.bf16.mxu0 %v9447_v5 }
 0xab0   :  { %8068 = vmatpush3.bf16.msra.mxu0 %v9810_v4 }
 0xab1   :  { %8069 = vmatprep.subr.bf16.mxu0 %v9447_v5 }
 0xab4   :  { %8071 = vmatpush3.bf16.msra.mxu0 %v9825_v9 }
 0xab5   :  { %8072 = vmatprep.subr.bf16.mxu0 %v9447_v5 }
 0xab8   :  { %8074 = vmatpush3.bf16.msra.mxu0 %v9829_v13 }
 0xab9   :  { %8075 = vmatprep.subr.bf16.mxu0 %v9447_v5 }
 0xabc   :  { %8077 = vmatpush3.bf16.msra.mxu0 %v9833_v17 }
 0xabd   :  { %8102 = vmatprep.subr.bf16.mxu0 %v9447_v5 }
 0xb72   :  { %v1276_v48 = vpop.f32.mrb[12].mxu0 }
 0xb73   :  { %v1277_v49 = vadd.f32 %v1276_v48, %v9870_v33  ;;  %v6239_v50 = vpop.f32.mrb[13].mxu0 }
 0xb75   :  { %1280 = vst [vmem:[%s1133_s21] sm:$0x1] %v1277_v49  ;;  %s10524_s21 = sld [smem:[#allocation4 + $0x3]] }
 0xb7b   :  { %s2770_s15 = scalar_lea.vmem [#allocation2], %s10524_s21 }
 0xb7c   :  { %v1286_v52 = vld [vmem:[%s1285_s0] sm:$0x1]  ;;  %s2035_s0 = scalar_lea.vmem [#allocation2], %s4789_s3 }
 0xb7d   :  { %6273 = vmatmul.mubr.f32.vlgmr.msra.gmra.mrb[12].mxu1 %v1286_v52  ;;  %v1284_v57 = vld [vmem:[%s1283_s25] sm:$0x1]  ;;  %v2202_v52 = vld [vmem:[#allocation14 + $0x98] sm:$0xff] }
 0xb7e   :  { %8080 = vmatpush3.bf16.msra.mxu1 %v9752_v10  ;;  %6342 = vmatprep.mubr.msk.f32.mxu1 %vm9448_vm0, %v9449_v8 }
 0xb7f   :  { %8081 = vmatprep.subr.bf16.mxu1 %v9447_v5 }
 0xb82   :  { %8083 = vmatpush3.bf16.msra.mxu1 %v9755_v15 }
 0xb83   :  { %8084 = vmatprep.subr.bf16.mxu1 %v9447_v5 }
 0xb86   :  { %8086 = vmatpush3.bf16.msra.mxu1 %v9759_v21 }
 0xb87   :  { %8087 = vmatprep.subr.bf16.mxu1 %v9447_v5 }
 0xb8a   :  { %8089 = vmatpush3.bf16.msra.mxu1 %v9763_v29 }
 0xb8b   :  { %8090 = vmatprep.subr.bf16.mxu1 %v9447_v5 }
 0xb8e   :  { %8092 = vmatpush3.bf16.msra.mxu1 %v9767_v35 }
 0xb8f   :  { %8093 = vmatprep.subr.bf16.mxu1 %v9447_v5 }
 0xb92   :  { %8095 = vmatpush3.bf16.msra.mxu1 %v9771_v41 }
 0xb93   :  { %8096 = vmatprep.subr.bf16.mxu1 %v9447_v5 }
 0xb96   :  { %8098 = vmatpush3.bf16.msra.mxu1 %v9775_v47 }
 0xb97   :  { %8099 = vmatprep.subr.bf16.mxu1 %v9447_v5 }
 0xb9a   :  { %8101 = vmatpush3.bf16.msra.mxu1 %v9779_v51 }
 0xb9b   :  { %8126 = vmatprep.subr.bf16.mxu1 %v9447_v5 }
 0xc50   :  { %v1353_v53 = vpop.f32.mrb[12].mxu1 }
 0xc51   :  { %v1354_v54 = vadd.f32 %v1353_v53, %v9845_v24  ;;  %v6274_v55 = vpop.f32.mrb[13].mxu1 }
 0xc52   :  { %v2204_v55 = vld [vmem:[#allocation14 + $0xa8] sm:$0xff] }
 0xc53   :  { %v1357_v58 = vadd.f32 %v1354_v54, %v1284_v57  ;;  %v2203_v54 = vld [vmem:[#allocation14 + $0xa0] sm:$0xff] }
 0xc54   :  { %v8326_v57 = vpack.c.bf16 %v2204_v55, %v2203_v54  ;;  %v2223_v54 = vld [vmem:[#allocation16 + $0xb8] sm:$0xff] }
 0xc55   :  { %v1359_v61 = vadd.f32 %v1358_v60, %v1357_v58  ;;  %v2205_v58 = vld [vmem:[#allocation14 + $0xb0] sm:$0xff]  ;;  %v2206_v60 = vld [vmem:[#allocation14 + $0xb8] sm:$0xff] }
 0xc57   :  { %6308 = vmatmul.mubr.f32.vlgmr.msra.gmra.mrb[14].mxu0 %v1359_v61  ;;  %v8330_v61 = vpack.c.bf16 %v2206_v60, %v2205_v58  ;;  %v2225_v58 = vld [vmem:[#allocation16 + $0xc8] sm:$0xff] }
 0xc58   :  { %8104 = vmatpush3.bf16.msra.mxu0 %v9783_v56  ;;  %6377 = vmatprep.mubr.msk.f32.mxu0 %vm9448_vm0, %v9449_v8 }
 0xc59   :  { %8105 = vmatprep.subr.bf16.mxu0 %v9447_v5 }
 0xc5c   :  { %8107 = vmatpush3.bf16.msra.mxu0 %v9788_v59 }
 0xc5d   :  { %8108 = vmatprep.subr.bf16.mxu0 %v9447_v5 }
 0xc60   :  { %8110 = vmatpush3.bf16.msra.mxu0 %v9798_v62 }
 0xc61   :  { %8111 = vmatprep.subr.bf16.mxu0 %v9447_v5 }
 0xc64   :  { %8113 = vmatpush3.bf16.msra.mxu0 %v9804_v1 }
 0xc65   :  { %8114 = vmatprep.subr.bf16.mxu0 %v9447_v5 }
 0xc68   :  { %8116 = vmatpush3.bf16.msra.mxu0 %v9810_v4 }
 0xc69   :  { %8117 = vmatprep.subr.bf16.mxu0 %v9447_v5 }
 0xc6c   :  { %8119 = vmatpush3.bf16.msra.mxu0 %v9825_v9 }
 0xc6d   :  { %8120 = vmatprep.subr.bf16.mxu0 %v9447_v5 }
 0xc70   :  { %8122 = vmatpush3.bf16.msra.mxu0 %v9829_v13 }
 0xc71   :  { %8123 = vmatprep.subr.bf16.mxu0 %v9447_v5 }
 0xc74   :  { %8125 = vmatpush3.bf16.msra.mxu0 %v9833_v17 }
 0xc75   :  { %8150 = vmatprep.subr.bf16.mxu0 %v9447_v5 }
 0xd2a   :  { %v1426_v63 = vpop.f32.mrb[14].mxu0 }
 0xd2b   :  { %v1427_v0 = vadd.f32 %v1426_v63, %v9870_v33  ;;  %v6309_v2 = vpop.f32.mrb[15].mxu0  ;;  %v2207_v63 = vld [vmem:[#allocation14 + $0xc0] sm:$0xff] }
 0xd2d   :  { %1430 = vst [vmem:[%s1283_s25] sm:$0x1] %v1427_v0  ;;  %v2208_v0 = vld [vmem:[#allocation14 + $0xc8] sm:$0xff]  ;;  %s2033_s25 = scalar_lea.vmem [#allocation2], %s10293_s23 }
 0xd2e   :  { %v8334_v2 = vpack.c.bf16 %v2208_v0, %v2207_v63  ;;  %v2227_v63 = vld [vmem:[#allocation16 + $0xd8] sm:$0xff] }
 0xd34   :  { %v1436_v3 = vld [vmem:[%s1435_s13] sm:$0x1]  ;;  %s2322_s13 = scalar_lea.vmem [#allocation2], %s2319_s26 }
 0xd35   :  { %6343 = vmatmul.mubr.f32.vlgmr.msra.gmra.mrb[14].mxu1 %v1436_v3  ;;  %v1434_v12 = vld [vmem:[%s1433_s1] sm:$0x1]  ;;  %v2209_v3 = vld [vmem:[#allocation14 + $0xd0] sm:$0xff] }
 0xd36   :  { %8128 = vmatpush3.bf16.msra.mxu1 %v9752_v10  ;;  %6412 = vmatprep.mubr.msk.f32.mxu1 %vm9448_vm0, %v9449_v8 }
 0xd37   :  { %8129 = vmatprep.subr.bf16.mxu1 %v9447_v5 }
 0xd3a   :  { %8131 = vmatpush3.bf16.msra.mxu1 %v9755_v15 }
 0xd3b   :  { %8132 = vmatprep.subr.bf16.mxu1 %v9447_v5 }
 0xd3e   :  { %8134 = vmatpush3.bf16.msra.mxu1 %v9759_v21 }
 0xd3f   :  { %8135 = vmatprep.subr.bf16.mxu1 %v9447_v5 }
 0xd42   :  { %8137 = vmatpush3.bf16.msra.mxu1 %v9763_v29 }
 0xd43   :  { %8138 = vmatprep.subr.bf16.mxu1 %v9447_v5 }
 0xd46   :  { %8140 = vmatpush3.bf16.msra.mxu1 %v9767_v35 }
 0xd47   :  { %8141 = vmatprep.subr.bf16.mxu1 %v9447_v5 }
 0xd4a   :  { %8143 = vmatpush3.bf16.msra.mxu1 %v9771_v41 }
 0xd4b   :  { %8144 = vmatprep.subr.bf16.mxu1 %v9447_v5 }
 0xd4e   :  { %8146 = vmatpush3.bf16.msra.mxu1 %v9775_v47 }
 0xd4f   :  { %8147 = vmatprep.subr.bf16.mxu1 %v9447_v5 }
 0xd52   :  { %8149 = vmatpush3.bf16.msra.mxu1 %v9779_v51 }
 0xd53   :  { %8174 = vmatprep.subr.bf16.mxu1 %v9447_v5 }
 0xe08   :  { %v1503_v6 = vpop.f32.mrb[14].mxu1 }
 0xe09   :  { %v1504_v7 = vadd.f32 %v1503_v6, %v9845_v24  ;;  %v6344_v11 = vpop.f32.mrb[15].mxu1  ;;  %v2210_v6 = vld [vmem:[#allocation14 + $0xd8] sm:$0xff] }
 0xe0a   :  { %v2211_v11 = vld [vmem:[#allocation14 + $0xe0] sm:$0xff] }
 0xe0b   :  { %v1507_v14 = vadd.f32 %v1504_v7, %v1434_v12  ;;  %v8338_v7 = vpack.c.bf16 %v2210_v6, %v2209_v3  ;;  %v2212_v12 = vld [vmem:[#allocation14 + $0xe8] sm:$0xff] }
 0xe0d   :  { %v1509_v18 = vadd.f32 %v1508_v16, %v1507_v14  ;;  %v8342_v14 = vpack.c.bf16 %v2212_v12, %v2211_v11  ;;  %v2213_v16 = vld [vmem:[#allocation14 + $0xf0] sm:$0xff] }
 0xe0f   :  { %6378 = vmatmul.mubr.f32.vlgmr.msra.gmra.mrb[16].mxu0 %v1509_v18  ;;  %v2214_v18 = vld [vmem:[#allocation14 + $0xf8] sm:$0xff] }
 0xe10   :  { %8152 = vmatpush3.bf16.msra.mxu0 %v9783_v56  ;;  %6447 = vmatprep.mubr.msk.f32.mxu0 %vm9448_vm0, %v9449_v8 }
 0xe11   :  { %8153 = vmatprep.subr.bf16.mxu0 %v9447_v5 }
 0xe14   :  { %8155 = vmatpush3.bf16.msra.mxu0 %v9788_v59 }
 0xe15   :  { %8156 = vmatprep.subr.bf16.mxu0 %v9447_v5 }
 0xe18   :  { %8158 = vmatpush3.bf16.msra.mxu0 %v9798_v62 }
 0xe19   :  { %8159 = vmatprep.subr.bf16.mxu0 %v9447_v5 }
 0xe1c   :  { %8161 = vmatpush3.bf16.msra.mxu0 %v9804_v1 }
 0xe1d   :  { %8162 = vmatprep.subr.bf16.mxu0 %v9447_v5 }
 0xe20   :  { %8164 = vmatpush3.bf16.msra.mxu0 %v9810_v4 }
 0xe21   :  { %8165 = vmatprep.subr.bf16.mxu0 %v9447_v5 }
 0xe24   :  { %8167 = vmatpush3.bf16.msra.mxu0 %v9825_v9 }
 0xe25   :  { %8168 = vmatprep.subr.bf16.mxu0 %v9447_v5 }
 0xe28   :  { %8170 = vmatpush3.bf16.msra.mxu0 %v9829_v13 }
 0xe29   :  { %8171 = vmatprep.subr.bf16.mxu0 %v9447_v5 }
 0xe2c   :  { %8173 = vmatpush3.bf16.msra.mxu0 %v9833_v17 }
 0xe2d   :  { %8198 = vmatprep.subr.bf16.mxu0 %v9447_v5 }
 0xee2   :  { %v1576_v19 = vpop.f32.mrb[16].mxu0 }
 0xee3   :  { %v1577_v20 = vadd.f32 %v1576_v19, %v9870_v33  ;;  %v6379_v22 = vpop.f32.mrb[17].mxu0  ;;  %v8346_v19 = vpack.c.bf16 %v2214_v18, %v2213_v16  ;;  %v2228_v18 = vld [vmem:[#allocation16 + $0xe0] sm:$0xff] }
 0xee5   :  { %1580 = vst [vmem:[%s1433_s1] sm:$0x1] %v1577_v20  ;;  %s10606_s1 = sld [smem:[#allocation4 + $0x5]] }
 0xeec   :  { %v1586_v23 = vld [vmem:[%s1585_s12] sm:$0x1]  ;;  %s3222_s12 = scalar_lea.vmem [#allocation2], %s4802_s7 }
 0xeed   :  { %6413 = vmatmul.mubr.f32.vlgmr.msra.gmra.mrb[16].mxu1 %v1586_v23  ;;  %v1584_v28 = vld [vmem:[%s1583_s8] sm:$0x1] }
 0xeee   :  { %8176 = vmatpush3.bf16.msra.mxu1 %v9752_v10  ;;  %6482 = vmatprep.mubr.msk.f32.mxu1 %vm9448_vm0, %v9449_v8 }
 0xeef   :  { %8177 = vmatprep.subr.bf16.mxu1 %v9447_v5 }
 0xef2   :  { %8179 = vmatpush3.bf16.msra.mxu1 %v9755_v15 }
 0xef3   :  { %8180 = vmatprep.subr.bf16.mxu1 %v9447_v5 }
 0xef6   :  { %8182 = vmatpush3.bf16.msra.mxu1 %v9759_v21 }
 0xef7   :  { %8183 = vmatprep.subr.bf16.mxu1 %v9447_v5 }
 0xefa   :  { %8185 = vmatpush3.bf16.msra.mxu1 %v9763_v29 }
 0xefb   :  { %8186 = vmatprep.subr.bf16.mxu1 %v9447_v5 }
 0xefe   :  { %8188 = vmatpush3.bf16.msra.mxu1 %v9767_v35 }
 0xeff   :  { %8189 = vmatprep.subr.bf16.mxu1 %v9447_v5 }
 0xf02   :  { %8191 = vmatpush3.bf16.msra.mxu1 %v9771_v41 }
 0xf03   :  { %8192 = vmatprep.subr.bf16.mxu1 %v9447_v5 }
 0xf06   :  { %8194 = vmatpush3.bf16.msra.mxu1 %v9775_v47 }
 0xf07   :  { %8195 = vmatprep.subr.bf16.mxu1 %v9447_v5 }
 0xf0a   :  { %8197 = vmatpush3.bf16.msra.mxu1 %v9779_v51 }
 0xf0b   :  { %8222 = vmatprep.subr.bf16.mxu1 %v9447_v5 }
 0xfc0   :  { %v1653_v25 = vpop.f32.mrb[16].mxu1 }
 0xfc1   :  { %v1654_v26 = vadd.f32 %v1653_v25, %v9845_v24  ;;  %v6414_v27 = vpop.f32.mrb[17].mxu1  ;;  %v2182_v25 = vld [vmem:[#allocation13 + $0x80] sm:$0xff] }
 0xfc3   :  { %v1657_v30 = vadd.f32 %v1654_v26, %v1584_v28  ;;  %v2183_v26 = vld [vmem:[#allocation13 + $0x88] sm:$0xff] }
 0xfc5   :  { %v1659_v32 = vadd.f32 %v1658_v31, %v1657_v30  ;;  %v2108_v30 = vld [vmem:[#allocation3 + $0xb] sm:$0x1]  ;;  %v10299_v31 = vpack.c.bf16 %v2183_v26, %v2182_v25  ;;  %v10396_v26 = vld [vmem:[%s10991_s4 + $0x1] sm:$0x1] }
 0xfc7   :  { %6448 = vmatmul.mubr.f32.vlgmr.msra.gmra.mrb[18].mxu0 %v1659_v32 }
 0xfc8   :  { %8200 = vmatpush3.bf16.msra.mxu0 %v9783_v56  ;;  %6517 = vmatprep.mubr.msk.f32.mxu0 %vm9448_vm0, %v9449_v8 }
 0xfc9   :  { %8201 = vmatprep.subr.bf16.mxu0 %v9447_v5 }
 0xfcc   :  { %8203 = vmatpush3.bf16.msra.mxu0 %v9788_v59 }
 0xfcd   :  { %8204 = vmatprep.subr.bf16.mxu0 %v9447_v5 }
 0xfd0   :  { %8206 = vmatpush3.bf16.msra.mxu0 %v9798_v62 }
 0xfd1   :  { %8207 = vmatprep.subr.bf16.mxu0 %v9447_v5 }
 0xfd4   :  { %8209 = vmatpush3.bf16.msra.mxu0 %v9804_v1 }
 0xfd5   :  { %8210 = vmatprep.subr.bf16.mxu0 %v9447_v5 }
 0xfd8   :  { %8212 = vmatpush3.bf16.msra.mxu0 %v9810_v4 }
 0xfd9   :  { %8213 = vmatprep.subr.bf16.mxu0 %v9447_v5 }
 0xfdc   :  { %8215 = vmatpush3.bf16.msra.mxu0 %v9825_v9 }
 0xfdd   :  { %8216 = vmatprep.subr.bf16.mxu0 %v9447_v5 }
 0xfe0   :  { %8218 = vmatpush3.bf16.msra.mxu0 %v9829_v13 }
 0xfe1   :  { %8219 = vmatprep.subr.bf16.mxu0 %v9447_v5 }
 0xfe4   :  { %8221 = vmatpush3.bf16.msra.mxu0 %v9833_v17 }
 0xfe5   :  { %8246 = vmatprep.subr.bf16.mxu0 %v9447_v5 }
0x109a   :  { %v1726_v34 = vpop.f32.mrb[18].mxu0 }
0x109b   :  { %v1727_v36 = vadd.f32 %v1726_v34, %v9870_v33  ;;  %v6449_v37 = vpop.f32.mrb[19].mxu0  ;;  %v2184_v34 = vld [vmem:[#allocation13 + $0x90] sm:$0xff] }
0x109d   :  { %1730 = vst [vmem:[%s1583_s8] sm:$0x1] %v1727_v36  ;;  %v2185_v36 = vld [vmem:[#allocation13 + $0x98] sm:$0xff] }
0x109e   :  { %v10302_v37 = vpack.c.bf16 %v2185_v36, %v2184_v34 }
0x10a4   :  { %v1736_v38 = vld [vmem:[%s1735_s10] sm:$0x1]  ;;  %s4792_s10 = sld [smem:[#allocation9 + $0x1]] }
0x10a5   :  { %6483 = vmatmul.mubr.f32.vlgmr.msra.gmra.mrb[18].mxu1 %v1736_v38  ;;  %v1734_v43 = vld [vmem:[%s1733_s18] sm:$0x1]  ;;  %v2186_v38 = vld [vmem:[#allocation13 + $0xa0] sm:$0xff] }
0x10a6   :  { %8224 = vmatpush3.bf16.msra.mxu1 %v9752_v10  ;;  %6552 = vmatprep.mubr.msk.f32.mxu1 %vm9448_vm0, %v9449_v8 }
0x10a7   :  { %8225 = vmatprep.subr.bf16.mxu1 %v9447_v5 }
0x10aa   :  { %8227 = vmatpush3.bf16.msra.mxu1 %v9755_v15  ;;  %s2472_s6 = scalar_lea.vmem [#allocation2], %s4792_s10  ;;  %s3372_s10 = scalar_lea.vmem [#allocation2], %s4804_s27 }
0x10ab   :  { %8228 = vmatprep.subr.bf16.mxu1 %v9447_v5 }
0x10ae   :  { %8230 = vmatpush3.bf16.msra.mxu1 %v9759_v21 }
0x10af   :  { %8231 = vmatprep.subr.bf16.mxu1 %v9447_v5 }
0x10b2   :  { %8233 = vmatpush3.bf16.msra.mxu1 %v9763_v29 }
0x10b3   :  { %8234 = vmatprep.subr.bf16.mxu1 %v9447_v5 }
0x10b6   :  { %8236 = vmatpush3.bf16.msra.mxu1 %v9767_v35 }
0x10b7   :  { %8237 = vmatprep.subr.bf16.mxu1 %v9447_v5 }
0x10ba   :  { %8239 = vmatpush3.bf16.msra.mxu1 %v9771_v41 }
0x10bb   :  { %8240 = vmatprep.subr.bf16.mxu1 %v9447_v5 }
0x10be   :  { %8242 = vmatpush3.bf16.msra.mxu1 %v9775_v47 }
0x10bf   :  { %8243 = vmatprep.subr.bf16.mxu1 %v9447_v5 }
0x10c2   :  { %8245 = vmatpush3.bf16.msra.mxu1 %v9779_v51 }
0x10c3   :  { %8270 = vmatprep.subr.bf16.mxu1 %v9447_v5 }
0x1178   :  { %v1803_v39 = vpop.f32.mrb[18].mxu1 }
0x1179   :  { %v1804_v40 = vadd.f32 %v1803_v39, %v9845_v24  ;;  %v6484_v42 = vpop.f32.mrb[19].mxu1  ;;  %v2187_v39 = vld [vmem:[#allocation13 + $0xa8] sm:$0xff] }
0x117a   :  { %v2188_v42 = vld [vmem:[#allocation13 + $0xb0] sm:$0xff] }
0x117b   :  { %v1807_v44 = vadd.f32 %v1804_v40, %v1734_v43  ;;  %v10308_v40 = vpack.c.bf16 %v2187_v39, %v2186_v38  ;;  %v2189_v43 = vld [vmem:[#allocation13 + $0xb8] sm:$0xff]  ;;  %v10421_v39 = vld [vmem:[%s10957_s11 + $0x1] sm:$0x1] }
0x117d   :  { %v1809_v46 = vadd.f32 %v1808_v45, %v1807_v44  ;;  %v10312_v44 = vpack.c.bf16 %v2189_v43, %v2188_v42  ;;  %v2190_v45 = vld [vmem:[#allocation13 + $0xc0] sm:$0xff] }
0x117f   :  { %6518 = vmatmul.mubr.f32.vlgmr.msra.gmra.mrb[20].mxu0 %v1809_v46  ;;  %v2191_v46 = vld [vmem:[#allocation13 + $0xc8] sm:$0xff] }
0x1180   :  { %8248 = vmatpush3.bf16.msra.mxu0 %v9783_v56  ;;  %6587 = vmatprep.mubr.msk.f32.mxu0 %vm9448_vm0, %v9449_v8 }
0x1181   :  { %8249 = vmatprep.subr.bf16.mxu0 %v9447_v5 }
0x1184   :  { %8251 = vmatpush3.bf16.msra.mxu0 %v9788_v59 }
0x1185   :  { %8252 = vmatprep.subr.bf16.mxu0 %v9447_v5 }
0x1188   :  { %8254 = vmatpush3.bf16.msra.mxu0 %v9798_v62 }
0x1189   :  { %8255 = vmatprep.subr.bf16.mxu0 %v9447_v5 }
0x118c   :  { %8257 = vmatpush3.bf16.msra.mxu0 %v9804_v1 }
0x118d   :  { %8258 = vmatprep.subr.bf16.mxu0 %v9447_v5 }
0x1190   :  { %8260 = vmatpush3.bf16.msra.mxu0 %v9810_v4 }
0x1191   :  { %8261 = vmatprep.subr.bf16.mxu0 %v9447_v5 }
0x1194   :  { %8263 = vmatpush3.bf16.msra.mxu0 %v9825_v9 }
0x1195   :  { %8264 = vmatprep.subr.bf16.mxu0 %v9447_v5 }
0x1198   :  { %8266 = vmatpush3.bf16.msra.mxu0 %v9829_v13 }
0x1199   :  { %8267 = vmatprep.subr.bf16.mxu0 %v9447_v5 }
0x119c   :  { %8269 = vmatpush3.bf16.msra.mxu0 %v9833_v17 }
0x119d   :  { %8294 = vmatprep.subr.bf16.mxu0 %v9447_v5 }
0x1252   :  { %v1876_v24 = vpop.f32.mrb[20].mxu0 }
0x1253   :  { %v1877_v48 = vadd.f32 %v1876_v24, %v9870_v33  ;;  %v6519_v49 = vpop.f32.mrb[21].mxu0  ;;  %v10316_v24 = vpack.c.bf16 %v2191_v46, %v2190_v45 }
0x1254   :  { %v2193_v49 = vld [vmem:[#allocation13 + $0xd8] sm:$0xff] }
0x1255   :  { %1880 = vst [vmem:[%s1733_s18] sm:$0x1] %v1877_v48  ;;  %v2192_v48 = vld [vmem:[#allocation13 + $0xd0] sm:$0xff]  ;;  %s10442_s18 = sld [smem:[#allocation4 + $0x1]] }
0x125b   :  { %s2470_s16 = scalar_lea.vmem [#allocation2], %s10442_s18 }
0x125c   :  { %v1886_v50 = vld [vmem:[%s1885_s5] sm:$0x1]  ;;  %s4794_s5 = sld [smem:[#allocation9 + $0x2]] }
0x125d   :  { %6553 = vmatmul.mubr.f32.vlgmr.msra.gmra.mrb[20].mxu1 %v1886_v50  ;;  %v10321_v50 = vpack.c.bf16 %v2193_v49, %v2192_v48 }
0x125e   :  { %8272 = vmatpush3.bf16.msra.mxu1 %v9752_v10  ;;  %6622 = vmatprep.mubr.msk.f32.mxu1 %vm9448_vm0, %v9449_v8 }
0x125f   :  { %8273 = vmatprep.subr.bf16.mxu1 %v9447_v5 }
0x1262   :  { %8275 = vmatpush3.bf16.msra.mxu1 %v9755_v15  ;;  %v10264_v15 = vld [vmem:[%s10991_s4] sm:$0x1]  ;;  %s2622_s20 = scalar_lea.vmem [#allocation2], %s4794_s5 }
0x1263   :  { %8276 = vmatprep.subr.bf16.mxu1 %v9447_v5 }
0x1266   :  { %8278 = vmatpush3.bf16.msra.mxu1 %v9759_v21 }
0x1267   :  { %8279 = vmatprep.subr.bf16.mxu1 %v9447_v5 }
0x126a   :  { %8281 = vmatpush3.bf16.msra.mxu1 %v9763_v29 }
0x126b   :  { %8282 = vmatprep.subr.bf16.mxu1 %v9447_v5 }
0x126e   :  { %8284 = vmatpush3.bf16.msra.mxu1 %v9767_v35  ;;  %v1884_v35 = vld [vmem:[%s1883_s30] sm:$0x1] }
0x126f   :  { %8285 = vmatprep.subr.bf16.mxu1 %v9447_v5 }
0x1272   :  { %8287 = vmatpush3.bf16.msra.mxu1 %v9771_v41 }
0x1273   :  { %8288 = vmatprep.subr.bf16.mxu1 %v9447_v5 }
0x1276   :  { %8290 = vmatpush3.bf16.msra.mxu1 %v9775_v47  ;;  %v1958_v47 = vld [vmem:[#allocation3 + $0xa] sm:$0x1] }
0x1277   :  { %8291 = vmatprep.subr.bf16.mxu1 %v9447_v5 }
0x127a   :  { %8293 = vmatpush3.bf16.msra.mxu1 %v9779_v51 }
0x1330   :  { %v1953_v10 = vpop.f32.mrb[20].mxu1 }
0x1331   :  { %v1954_v21 = vadd.f32 %v10264_v15, %v1953_v10  ;;  %v6554_v29 = vpop.f32.mrb[21].mxu1  ;;  %v2235_v10 = vld [vmem:[#allocation11] sm:$0xff] }
0x1332   :  { %v2195_v29 = vld [vmem:[#allocation13 + $0xe8] sm:$0xff] }
0x1333   :  { %v1957_v41 = vadd.f32 %v1954_v21, %v1884_v35  ;;  %v2194_v21 = vld [vmem:[#allocation13 + $0xe0] sm:$0xff]  ;;  %v2196_v35 = vld [vmem:[#allocation13 + $0xf0] sm:$0xff] }
0x1335   :  { %v1959_v33 = vadd.f32 %v1958_v47, %v1957_v41  ;;  %v2197_v41 = vld [vmem:[#allocation13 + $0xf8] sm:$0xff]  ;;  %v10325_v47 = vpack.c.bf16 %v2195_v29, %v2194_v21 }
0x1337   :  { %6588 = vmatmul.mubr.f32.vlgmr.msra.gmra.mrb[22].mxu0 %v1959_v33  ;;  %v10330_v33 = vpack.c.bf16 %v2197_v41, %v2196_v35 }
0x1338   :  { %8296 = vmatpush3.bf16.msra.mxu0 %v9783_v56  ;;  %6657 = vmatprep.mubr.msk.f32.mxu0 %vm9448_vm0, %v9449_v8  ;;  %v10289_v56 = vld [vmem:[%s10957_s11] sm:$0x1] }
0x1339   :  { %8297 = vmatprep.subr.bf16.mxu0 %v9447_v5 }
0x133c   :  { %8299 = vmatpush3.bf16.msra.mxu0 %v9788_v59 }
0x133d   :  { %8300 = vmatprep.subr.bf16.mxu0 %v9447_v5 }
0x1340   :  { %8302 = vmatpush3.bf16.msra.mxu0 %v9798_v62 }
0x1341   :  { %8303 = vmatprep.subr.bf16.mxu0 %v9447_v5 }
0x1344   :  { %8305 = vmatpush3.bf16.msra.mxu0 %v9804_v1 }
0x1345   :  { %8306 = vmatprep.subr.bf16.mxu0 %v9447_v5 }
0x1348   :  { %8308 = vmatpush3.bf16.msra.mxu0 %v9810_v4  ;;  %v2199_v4 = vld [vmem:[#allocation14 + $0x80] sm:$0xff] }
0x1349   :  { %8309 = vmatprep.subr.bf16.mxu0 %v9447_v5 }
0x134c   :  { %8311 = vmatpush3.bf16.msra.mxu0 %v9825_v9  ;;  %v2200_v9 = vld [vmem:[#allocation14 + $0x88] sm:$0xff] }
0x134d   :  { %8312 = vmatprep.subr.bf16.mxu0 %v9447_v5 }
0x1350   :  { %8314 = vmatpush3.bf16.msra.mxu0 %v9829_v13  ;;  %v2201_v13 = vld [vmem:[#allocation14 + $0x90] sm:$0xff] }
0x1351   :  { %8315 = vmatprep.subr.bf16.mxu0 %v9447_v5  ;;  %v8322_v53 = vpack.c.bf16 %v2202_v52, %v2201_v13  ;;  %v2220_v13 = vld [vmem:[#allocation16 + $0xa0] sm:$0xff] }
0x1354   :  { %8317 = vmatpush3.bf16.msra.mxu0 %v9833_v17  ;;  %v8318_v17 = vpack.c.bf16 %v2200_v9, %v2199_v4  ;;  %v2219_v4 = vld [vmem:[#allocation16 + $0x98] sm:$0xff] }
0x1355   :  { %8350 = vmatprep.subr.bf16.mxu0 %v9447_v5 }
0x1356   :  { %8319 = vmatprep.subr.bf16.mxu1 %v8318_v17 }
0x140a   :  { %v2026_v51 = vpop.f32.mrb[22].mxu0 }
0x140b   :  { %v2027_v59 = vadd.f32 %v10289_v56, %v2026_v51  ;;  %v6589_v62 = vpop.f32.mrb[23].mxu0  ;;  %v2216_v51 = vld [vmem:[#allocation16 + $0x80] sm:$0xff] }
0x140c   :  { %v2218_v62 = vld [vmem:[#allocation16 + $0x90] sm:$0xff] }
0x140d   :  { %2030 = vst [vmem:[%s1883_s30] sm:$0x1] %v2027_v59  ;;  %v2217_v59 = vld [vmem:[#allocation16 + $0x88] sm:$0xff]  ;;  %v10338_v9 = vpack.c.bf16 %v2219_v4, %v2218_v62  ;;  %s4796_s30 = sld [smem:[#allocation9 + $0x3]] }
0x1413   :  { %s2772_s3 = scalar_lea.vmem [#allocation2], %s4796_s30 }
0x1414   :  { %v2036_v1 = vld [vmem:[%s2035_s0] sm:$0x1]  ;;  %s4798_s0 = sld [smem:[#allocation9 + $0x4]] }
0x1415   :  { %6623 = vmatmul.mubr.f32.vlgmr.msra.gmra.mrb[22].mxu1 %v2036_v1  ;;  %v2034_v27 = vld [vmem:[%s2033_s25] sm:$0x1]  ;;  %v10334_v1 = vpack.c.bf16 %v2217_v59, %v2216_v51 }
0x1416   :  { %8321 = vmatpush3.bf16.msra.mxu1 %v8318_v17  ;;  %6692 = vmatprep.mubr.f32.mxu1 %v2235_v10  ;;  %v2221_v17 = vld [vmem:[#allocation16 + $0xa8] sm:$0xff] }
0x1417   :  { %8323 = vmatprep.subr.bf16.mxu1 %v8322_v53  ;;  %v10342_v52 = vpack.c.bf16 %v2221_v17, %v2220_v13 }
0x141a   :  { %8325 = vmatpush3.bf16.msra.mxu1 %v8322_v53  ;;  %v2222_v53 = vld [vmem:[#allocation16 + $0xb0] sm:$0xff]  ;;  %s2922_s23 = scalar_lea.vmem [#allocation2], %s4798_s0 }
0x141b   :  { %8327 = vmatprep.subr.bf16.mxu1 %v8326_v57  ;;  %v10346_v55 = vpack.c.bf16 %v2223_v54, %v2222_v53 }
0x141e   :  { %8329 = vmatpush3.bf16.msra.mxu1 %v8326_v57  ;;  %v2224_v57 = vld [vmem:[#allocation16 + $0xc0] sm:$0xff] }
0x141f   :  { %8331 = vmatprep.subr.bf16.mxu1 %v8330_v61  ;;  %v10351_v60 = vpack.c.bf16 %v2225_v58, %v2224_v57 }
0x1422   :  { %8333 = vmatpush3.bf16.msra.mxu1 %v8330_v61  ;;  %v2226_v61 = vld [vmem:[#allocation16 + $0xd0] sm:$0xff] }
0x1423   :  { %8335 = vmatprep.subr.bf16.mxu1 %v8334_v2  ;;  %v10354_v0 = vpack.c.bf16 %v2227_v63, %v2226_v61 }
0x1426   :  { %8337 = vmatpush3.bf16.msra.mxu1 %v8334_v2 }
0x1427   :  { %8339 = vmatprep.subr.bf16.mxu1 %v8338_v7 }
0x142a   :  { %8341 = vmatpush3.bf16.msra.mxu1 %v8338_v7 }
0x142b   :  { %8343 = vmatprep.subr.bf16.mxu1 %v8342_v14 }
0x142e   :  { %8345 = vmatpush3.bf16.msra.mxu1 %v8342_v14 }
0x142f   :  { %8347 = vmatprep.subr.bf16.mxu1 %v8346_v19 }
0x1432   :  { %8349 = vmatpush3.bf16.msra.mxu1 %v8346_v19  ;;  %v2229_v19 = vld [vmem:[#allocation16 + $0xe8] sm:$0xff] }
0x1433   :  { %8374 = vmatprep.subr.bf16.mxu1 %v9447_v5 }
0x14e8   :  { %v2103_v20 = vpop.f32.mrb[22].mxu1 }
0x14e9   :  { %v2104_v22 = vadd.f32 %v10264_v15, %v2103_v20  ;;  %v6624_v23 = vpop.f32.mrb[23].mxu1  ;;  %v2236_v15 = vld [vmem:[#allocation11 + $0x8] sm:$0xff]  ;;  %v10383_v20 = vpack.c.bf16 %v2229_v19, %v2228_v18 }
0x14ea   :  { %6693 = vmatmul.mubr.f32.vlgmr.msra.gmra.mrb[24].mxu1 %v2236_v15  ;;  %v2231_v23 = vld [vmem:[#allocation16 + $0xf8] sm:$0xff] }
0x14eb   :  { %v2107_v28 = vadd.f32 %v2104_v22, %v2034_v27  ;;  %6762 = vmatprep.mubr.msk.f32.mxu1 %vm9448_vm0, %v9449_v8  ;;  %8376 = vmatpush3.bf16.msra.mxu1 %v10334_v1  ;;  %v2230_v22 = vld [vmem:[#allocation16 + $0xf0] sm:$0xff] }
0x14ec   :  { %8377 = vmatprep.subr.bf16.mxu1 %v9447_v5  ;;  %v10387_v25 = vpack.c.bf16 %v2231_v23, %v2230_v22 }
0x14ed   :  { %v2109_v32 = vadd.f32 %v2108_v30, %v2107_v28 }
0x14ef   :  { %6658 = vmatmul.mubr.f32.vlgmr.msra.gmra.mrb[24].mxu0 %v2109_v32  ;;  %8379 = vmatpush3.bf16.msra.mxu1 %v10338_v9 }
0x14f0   :  { %8352 = vmatpush3.bf16.msra.mxu0 %v10299_v31  ;;  %6727 = vmatprep.mubr.msk.f32.mxu0 %vm9448_vm0, %v9449_v8 }
0x14f1   :  { %8353 = vmatprep.subr.bf16.mxu0 %v9447_v5  ;;  %8380 = vmatprep.subr.bf16.mxu1 %v9447_v5 }
0x14f3   :  { %8382 = vmatpush3.bf16.msra.mxu1 %v10342_v52 }
0x14f4   :  { %8355 = vmatpush3.bf16.msra.mxu0 %v10302_v37  ;;  %8383 = vmatprep.subr.bf16.mxu1 %v9447_v5 }
0x14f5   :  { %8356 = vmatprep.subr.bf16.mxu0 %v9447_v5 }
0x14f7   :  { %8385 = vmatpush3.bf16.msra.mxu1 %v10346_v55 }
0x14f8   :  { %8358 = vmatpush3.bf16.msra.mxu0 %v10308_v40  ;;  %8386 = vmatprep.subr.bf16.mxu1 %v9447_v5 }
0x14f9   :  { %8359 = vmatprep.subr.bf16.mxu0 %v9447_v5 }
0x14fb   :  { %8388 = vmatpush3.bf16.msra.mxu1 %v10351_v60 }
0x14fc   :  { %8361 = vmatpush3.bf16.msra.mxu0 %v10312_v44  ;;  %8389 = vmatprep.subr.bf16.mxu1 %v9447_v5 }
0x14fd   :  { %8362 = vmatprep.subr.bf16.mxu0 %v9447_v5 }
0x14ff   :  { %8391 = vmatpush3.bf16.msra.mxu1 %v10354_v0 }
0x1500   :  { %8364 = vmatpush3.bf16.msra.mxu0 %v10316_v24  ;;  %8392 = vmatprep.subr.bf16.mxu1 %v9447_v5 }
0x1501   :  { %8365 = vmatprep.subr.bf16.mxu0 %v9447_v5 }
0x1503   :  { %8394 = vmatpush3.bf16.msra.mxu1 %v10383_v20 }
0x1504   :  { %8367 = vmatpush3.bf16.msra.mxu0 %v10321_v50  ;;  %8395 = vmatprep.subr.bf16.mxu1 %v9447_v5 }
0x1505   :  { %8368 = vmatprep.subr.bf16.mxu0 %v9447_v5 }
0x1507   :  { %8397 = vmatpush3.bf16.msra.mxu1 %v10387_v25 }
0x1508   :  { %8370 = vmatpush3.bf16.msra.mxu0 %v10325_v47  ;;  %8422 = vmatprep.subr.bf16.mxu1 %v9447_v5 }
0x1509   :  { %8371 = vmatprep.subr.bf16.mxu0 %v9447_v5 }
0x150c   :  { %8373 = vmatpush3.bf16.msra.mxu0 %v10330_v33 }
0x150d   :  { %8398 = vmatprep.subr.bf16.mxu0 %v9447_v5 }
0x15bd   :  { %v6694_v11 = vpop.f32.mrb[24].mxu1 }
0x15be   :  { %v2307_v14 = vpop.f32.mrb[25].mxu1 }
0x15c2   :  { %v2176_v2 = vpop.f32.mrb[24].mxu0 }
0x15c3   :  { %v2177_v3 = vadd.f32 %v10289_v56, %v2176_v2  ;;  %v6659_v6 = vpop.f32.mrb[25].mxu0  ;;  %v4790_v56 = vld [vmem:[%s10955_s9 + $0x1] ss:$0 sm:$0xff]  ;;  %s10391_s9 = sld [smem:[#allocation4]] }
0x15c4   :  { %v2313_v12 = vadd.f32 %v6694_v11, %v4790_v56  ;;  %v2308_v16 = vadd.f32 %v4790_v56, %v2307_v14 }
0x15c5   :  { %2180 = vst [vmem:[%s2033_s25] sm:$0x1] %v2177_v3  ;;  %s10565_s25 = sld [smem:[#allocation4 + $0x4]] }
0x15c6   :  { %2317 = vst [vmem:[#allocation3 + $0x8] sm:$0xff] %v2313_v12  ;;  %2316 = vst [vmem:[#allocation3] sm:$0xff] %v2308_v16 }
0x15c9   :  { %s2320_s2 = scalar_lea.vmem [#allocation2], %s10391_s9  ;;  %s3070_s9 = scalar_lea.vmem [#allocation2], %s10606_s1 }
0x15cb   :  { %s2920_s26 = scalar_lea.vmem [#allocation2], %s10565_s25 }
0x15cc   :  { %v2323_v7 = vld [vmem:[%s2322_s13] sm:$0x1]  ;;  %s4800_s13 = sld [smem:[#allocation9 + $0x5]] }
0x15cd   :  { %6728 = vmatmul.mubr.f32.vlgmr.msra.gmra.mrb[26].mxu0 %v2323_v7  ;;  %v2321_v32 = vld [vmem:[%s2320_s2] sm:$0x1]  ;;  %v2395_v34 = vld [vmem:[#allocation3] sm:$0x1]  ;;  %v2545_v29 = vld [vmem:[#allocation3 + $0x1] sm:$0x1] }
0x15ce   :  { %8400 = vmatpush3.bf16.msra.mxu0 %v10299_v31  ;;  %6797 = vmatprep.mubr.msk.f32.mxu0 %vm9448_vm0, %v9449_v8  ;;  %v2695_v57 = vld [vmem:[#allocation3 + $0x2] sm:$0x1]  ;;  %v2845_v14 = vld [vmem:[#allocation3 + $0x3] sm:$0x1] }
0x15cf   :  { %8401 = vmatprep.subr.bf16.mxu0 %v9447_v5 }
0x15d2   :  { %8403 = vmatpush3.bf16.msra.mxu0 %v10302_v37  ;;  %s3072_s24 = scalar_lea.vmem [#allocation2], %s4800_s13 }
0x15d3   :  { %8404 = vmatprep.subr.bf16.mxu0 %v9447_v5 }
0x15d6   :  { %8406 = vmatpush3.bf16.msra.mxu0 %v10308_v40 }
0x15d7   :  { %8407 = vmatprep.subr.bf16.mxu0 %v9447_v5 }
0x15da   :  { %8409 = vmatpush3.bf16.msra.mxu0 %v10312_v44 }
0x15db   :  { %8410 = vmatprep.subr.bf16.mxu0 %v9447_v5 }
0x15de   :  { %8412 = vmatpush3.bf16.msra.mxu0 %v10316_v24 }
0x15df   :  { %8413 = vmatprep.subr.bf16.mxu0 %v9447_v5 }
0x15e2   :  { %8415 = vmatpush3.bf16.msra.mxu0 %v10321_v50 }
0x15e3   :  { %8416 = vmatprep.subr.bf16.mxu0 %v9447_v5 }
0x15e6   :  { %8418 = vmatpush3.bf16.msra.mxu0 %v10325_v47 }
0x15e7   :  { %8419 = vmatprep.subr.bf16.mxu0 %v9447_v5 }
0x15ea   :  { %8421 = vmatpush3.bf16.msra.mxu0 %v10330_v33 }
0x15eb   :  { %8446 = vmatprep.subr.bf16.mxu0 %v9447_v5 }
0x16a0   :  { %v2390_v27 = vpop.f32.mrb[26].mxu0 }
0x16a1   :  { %v2391_v28 = vadd.f32 %v2390_v27, %v10396_v26  ;;  %v6729_v30 = vpop.f32.mrb[27].mxu0 }
0x16a3   :  { %v2394_v36 = vadd.f32 %v2391_v28, %v2321_v32 }
0x16a5   :  { %v2396_v38 = vadd.f32 %v2395_v34, %v2394_v36  ;;  %v2995_v36 = vld [vmem:[#allocation3 + $0x4] sm:$0x1] }
0x16a7   :  { %6763 = vmatmul.mubr.f32.vlgmr.msra.gmra.mrb[26].mxu1 %v2396_v38 }
0x16a8   :  { %8424 = vmatpush3.bf16.msra.mxu1 %v10334_v1  ;;  %6832 = vmatprep.mubr.msk.f32.mxu1 %vm9448_vm0, %v9449_v8 }
0x16a9   :  { %8425 = vmatprep.subr.bf16.mxu1 %v9447_v5 }
0x16ac   :  { %8427 = vmatpush3.bf16.msra.mxu1 %v10338_v9 }
0x16ad   :  { %8428 = vmatprep.subr.bf16.mxu1 %v9447_v5 }
0x16b0   :  { %8430 = vmatpush3.bf16.msra.mxu1 %v10342_v52 }
0x16b1   :  { %8431 = vmatprep.subr.bf16.mxu1 %v9447_v5 }
0x16b4   :  { %8433 = vmatpush3.bf16.msra.mxu1 %v10346_v55 }
0x16b5   :  { %8434 = vmatprep.subr.bf16.mxu1 %v9447_v5 }
0x16b8   :  { %8436 = vmatpush3.bf16.msra.mxu1 %v10351_v60 }
0x16b9   :  { %8437 = vmatprep.subr.bf16.mxu1 %v9447_v5 }
0x16bc   :  { %8439 = vmatpush3.bf16.msra.mxu1 %v10354_v0 }
0x16bd   :  { %8440 = vmatprep.subr.bf16.mxu1 %v9447_v5 }
0x16c0   :  { %8442 = vmatpush3.bf16.msra.mxu1 %v10383_v20 }
0x16c1   :  { %8443 = vmatprep.subr.bf16.mxu1 %v9447_v5 }
0x16c4   :  { %8445 = vmatpush3.bf16.msra.mxu1 %v10387_v25 }
0x16c5   :  { %8470 = vmatprep.subr.bf16.mxu1 %v9447_v5 }
0x177a   :  { %v2463_v42 = vpop.f32.mrb[26].mxu1 }
0x177b   :  { %v2464_v43 = vadd.f32 %v2463_v42, %v10421_v39  ;;  %v6764_v45 = vpop.f32.mrb[27].mxu1 }
0x177d   :  { %2467 = vst [vmem:[%s2320_s2] sm:$0x1] %v2464_v43  ;;  %s10647_s2 = sld [smem:[#allocation4 + $0x6]] }
0x1783   :  { %s3220_s8 = scalar_lea.vmem [#allocation2], %s10647_s2  ;;  %s10863_s2 = sld [smem:[#allocation4 + $0xb]] }
0x1784   :  { %v2473_v46 = vld [vmem:[%s2472_s6] sm:$0x1]  ;;  %s10688_s6 = sld [smem:[#allocation4 + $0x7]] }
0x1785   :  { %6798 = vmatmul.mubr.f32.vlgmr.msra.gmra.mrb[28].mxu0 %v2473_v46  ;;  %v2471_v15 = vld [vmem:[%s2470_s16] sm:$0x1] }
0x1786   :  { %8448 = vmatpush3.bf16.msra.mxu0 %v10299_v31  ;;  %6867 = vmatprep.mubr.msk.f32.mxu0 %vm9448_vm0, %v9449_v8 }
0x1787   :  { %8449 = vmatprep.subr.bf16.mxu0 %v9447_v5 }
0x178a   :  { %8451 = vmatpush3.bf16.msra.mxu0 %v10302_v37  ;;  %s3370_s18 = scalar_lea.vmem [#allocation2], %s10688_s6  ;;  %s10993_s6 = sld [smem:[#allocation44_spill]] }
0x178b   :  { %8452 = vmatprep.subr.bf16.mxu0 %v9447_v5 }
0x178e   :  { %8454 = vmatpush3.bf16.msra.mxu0 %v10308_v40 }
0x178f   :  { %8455 = vmatprep.subr.bf16.mxu0 %v9447_v5 }
0x1792   :  { %8457 = vmatpush3.bf16.msra.mxu0 %v10312_v44 }
0x1793   :  { %8458 = vmatprep.subr.bf16.mxu0 %v9447_v5 }
0x1796   :  { %8460 = vmatpush3.bf16.msra.mxu0 %v10316_v24 }
0x1797   :  { %8461 = vmatprep.subr.bf16.mxu0 %v9447_v5 }
0x179a   :  { %8463 = vmatpush3.bf16.msra.mxu0 %v10321_v50 }
0x179b   :  { %8464 = vmatprep.subr.bf16.mxu0 %v9447_v5 }
0x179e   :  { %8466 = vmatpush3.bf16.msra.mxu0 %v10325_v47 }
0x179f   :  { %8467 = vmatprep.subr.bf16.mxu0 %v9447_v5 }
0x17a2   :  { %8469 = vmatpush3.bf16.msra.mxu0 %v10330_v33 }
0x17a3   :  { %8494 = vmatprep.subr.bf16.mxu0 %v9447_v5 }
0x1858   :  { %v2540_v48 = vpop.f32.mrb[28].mxu0 }
0x1859   :  { %v2541_v49 = vadd.f32 %v2540_v48, %v10396_v26  ;;  %v6799_v10 = vpop.f32.mrb[29].mxu0 }
0x185b   :  { %v2544_v21 = vadd.f32 %v2541_v49, %v2471_v15 }
0x185d   :  { %v2546_v35 = vadd.f32 %v2545_v29, %v2544_v21  ;;  %v3145_v29 = vld [vmem:[#allocation3 + $0x5] sm:$0x1] }
0x185f   :  { %6833 = vmatmul.mubr.f32.vlgmr.msra.gmra.mrb[28].mxu1 %v2546_v35 }
0x1860   :  { %8472 = vmatpush3.bf16.msra.mxu1 %v10334_v1  ;;  %6902 = vmatprep.mubr.msk.f32.mxu1 %vm9448_vm0, %v9449_v8 }
0x1861   :  { %8473 = vmatprep.subr.bf16.mxu1 %v9447_v5 }
0x1864   :  { %8475 = vmatpush3.bf16.msra.mxu1 %v10338_v9 }
0x1865   :  { %8476 = vmatprep.subr.bf16.mxu1 %v9447_v5 }
0x1868   :  { %8478 = vmatpush3.bf16.msra.mxu1 %v10342_v52 }
0x1869   :  { %8479 = vmatprep.subr.bf16.mxu1 %v9447_v5 }
0x186c   :  { %8481 = vmatpush3.bf16.msra.mxu1 %v10346_v55 }
0x186d   :  { %8482 = vmatprep.subr.bf16.mxu1 %v9447_v5 }
0x1870   :  { %8484 = vmatpush3.bf16.msra.mxu1 %v10351_v60 }
0x1871   :  { %8485 = vmatprep.subr.bf16.mxu1 %v9447_v5 }
0x1874   :  { %8487 = vmatpush3.bf16.msra.mxu1 %v10354_v0 }
0x1875   :  { %8488 = vmatprep.subr.bf16.mxu1 %v9447_v5 }
0x1878   :  { %8490 = vmatpush3.bf16.msra.mxu1 %v10383_v20 }
0x1879   :  { %8491 = vmatprep.subr.bf16.mxu1 %v9447_v5 }
0x187c   :  { %8493 = vmatpush3.bf16.msra.mxu1 %v10387_v25 }
0x187d   :  { %8518 = vmatprep.subr.bf16.mxu1 %v9447_v5 }
0x1932   :  { %v2613_v41 = vpop.f32.mrb[28].mxu1 }
0x1933   :  { %v2614_v51 = vadd.f32 %v2613_v41, %v10421_v39  ;;  %v6834_v59 = vpop.f32.mrb[29].mxu1 }
0x1935   :  { %2617 = vst [vmem:[%s2470_s16] sm:$0x1] %v2614_v51  ;;  %s4806_s16 = sld [smem:[#allocation9 + $0x8]] }
0x193b   :  { %s3522_s5 = scalar_lea.vmem [#allocation2], %s4806_s16 }
0x193c   :  { %v2623_v62 = vld [vmem:[%s2622_s20] sm:$0x1]  ;;  %s10729_s20 = sld [smem:[#allocation4 + $0x8]] }
0x193d   :  { %6868 = vmatmul.mubr.f32.vlgmr.msra.gmra.mrb[30].mxu0 %v2623_v62  ;;  %v2621_v53 = vld [vmem:[%s2620_s29] sm:$0x1] }
0x193e   :  { %8496 = vmatpush3.bf16.msra.mxu0 %v10299_v31  ;;  %6937 = vmatprep.mubr.msk.f32.mxu0 %vm9448_vm0, %v9449_v8 }
0x193f   :  { %8497 = vmatprep.subr.bf16.mxu0 %v9447_v5 }
0x1942   :  { %8499 = vmatpush3.bf16.msra.mxu0 %v10302_v37  ;;  %s3520_s28 = scalar_lea.vmem [#allocation2], %s10729_s20 }
0x1943   :  { %8500 = vmatprep.subr.bf16.mxu0 %v9447_v5 }
0x1946   :  { %8502 = vmatpush3.bf16.msra.mxu0 %v10308_v40 }
0x1947   :  { %8503 = vmatprep.subr.bf16.mxu0 %v9447_v5 }
0x194a   :  { %8505 = vmatpush3.bf16.msra.mxu0 %v10312_v44 }
0x194b   :  { %8506 = vmatprep.subr.bf16.mxu0 %v9447_v5 }
0x194e   :  { %8508 = vmatpush3.bf16.msra.mxu0 %v10316_v24 }
0x194f   :  { %8509 = vmatprep.subr.bf16.mxu0 %v9447_v5 }
0x1952   :  { %8511 = vmatpush3.bf16.msra.mxu0 %v10321_v50 }
0x1953   :  { %8512 = vmatprep.subr.bf16.mxu0 %v9447_v5 }
0x1956   :  { %8514 = vmatpush3.bf16.msra.mxu0 %v10325_v47 }
0x1957   :  { %8515 = vmatprep.subr.bf16.mxu0 %v9447_v5 }
0x195a   :  { %8517 = vmatpush3.bf16.msra.mxu0 %v10330_v33 }
0x195b   :  { %8542 = vmatprep.subr.bf16.mxu0 %v9447_v5 }
0x1a10   :  { %v2690_v4 = vpop.f32.mrb[30].mxu0 }
0x1a11   :  { %v2691_v13 = vadd.f32 %v2690_v4, %v10396_v26  ;;  %v6869_v17 = vpop.f32.mrb[31].mxu0 }
0x1a13   :  { %v2694_v54 = vadd.f32 %v2691_v13, %v2621_v53 }
0x1a15   :  { %v2696_v58 = vadd.f32 %v2695_v57, %v2694_v54  ;;  %v3295_v57 = vld [vmem:[#allocation3 + $0x6] sm:$0x1] }
0x1a17   :  { %6903 = vmatmul.mubr.f32.vlgmr.msra.gmra.mrb[30].mxu1 %v2696_v58 }
0x1a18   :  { %8520 = vmatpush3.bf16.msra.mxu1 %v10334_v1  ;;  %6972 = vmatprep.mubr.msk.f32.mxu1 %vm9448_vm0, %v9449_v8 }
0x1a19   :  { %8521 = vmatprep.subr.bf16.mxu1 %v9447_v5 }
0x1a1c   :  { %8523 = vmatpush3.bf16.msra.mxu1 %v10338_v9 }
0x1a1d   :  { %8524 = vmatprep.subr.bf16.mxu1 %v9447_v5 }
0x1a20   :  { %8526 = vmatpush3.bf16.msra.mxu1 %v10342_v52 }
0x1a21   :  { %8527 = vmatprep.subr.bf16.mxu1 %v9447_v5 }
0x1a24   :  { %8529 = vmatpush3.bf16.msra.mxu1 %v10346_v55 }
0x1a25   :  { %8530 = vmatprep.subr.bf16.mxu1 %v9447_v5 }
0x1a28   :  { %8532 = vmatpush3.bf16.msra.mxu1 %v10351_v60 }
0x1a29   :  { %8533 = vmatprep.subr.bf16.mxu1 %v9447_v5 }
0x1a2c   :  { %8535 = vmatpush3.bf16.msra.mxu1 %v10354_v0 }
0x1a2d   :  { %8536 = vmatprep.subr.bf16.mxu1 %v9447_v5 }
0x1a30   :  { %8538 = vmatpush3.bf16.msra.mxu1 %v10383_v20 }
0x1a31   :  { %8539 = vmatprep.subr.bf16.mxu1 %v9447_v5 }
0x1a34   :  { %8541 = vmatpush3.bf16.msra.mxu1 %v10387_v25 }
0x1a35   :  { %8566 = vmatprep.subr.bf16.mxu1 %v9447_v5 }
0x1aea   :  { %v2763_v61 = vpop.f32.mrb[30].mxu1 }
0x1aeb   :  { %v2764_v63 = vadd.f32 %v2763_v61, %v10421_v39  ;;  %v6904_v2 = vpop.f32.mrb[31].mxu1 }
0x1aed   :  { %2767 = vst [vmem:[%s2620_s29] sm:$0x1] %v2764_v63  ;;  %s4808_s29 = sld [smem:[#allocation9 + $0x9]] }
0x1af3   :  { %s3672_s30 = scalar_lea.vmem [#allocation2], %s4808_s29 }
0x1af4   :  { %v2773_v3 = vld [vmem:[%s2772_s3] sm:$0x1]  ;;  %s10770_s3 = sld [smem:[#allocation4 + $0x9]] }
0x1af5   :  { %6938 = vmatmul.mubr.f32.vlgmr.msra.gmra.mrb[32].mxu0 %v2773_v3  ;;  %v2771_v11 = vld [vmem:[%s2770_s15] sm:$0x1] }
0x1af6   :  { %8544 = vmatpush3.bf16.msra.mxu0 %v10299_v31  ;;  %7007 = vmatprep.mubr.msk.f32.mxu0 %vm9448_vm0, %v9449_v8 }
0x1af7   :  { %8545 = vmatprep.subr.bf16.mxu0 %v9447_v5 }
0x1afa   :  { %8547 = vmatpush3.bf16.msra.mxu0 %v10302_v37  ;;  %s3670_s21 = scalar_lea.vmem [#allocation2], %s10770_s3 }
0x1afb   :  { %8548 = vmatprep.subr.bf16.mxu0 %v9447_v5 }
0x1afe   :  { %8550 = vmatpush3.bf16.msra.mxu0 %v10308_v40 }
0x1aff   :  { %8551 = vmatprep.subr.bf16.mxu0 %v9447_v5 }
0x1b02   :  { %8553 = vmatpush3.bf16.msra.mxu0 %v10312_v44 }
0x1b03   :  { %8554 = vmatprep.subr.bf16.mxu0 %v9447_v5 }
0x1b06   :  { %8556 = vmatpush3.bf16.msra.mxu0 %v10316_v24 }
0x1b07   :  { %8557 = vmatprep.subr.bf16.mxu0 %v9447_v5 }
0x1b0a   :  { %8559 = vmatpush3.bf16.msra.mxu0 %v10321_v50 }
0x1b0b   :  { %8560 = vmatprep.subr.bf16.mxu0 %v9447_v5 }
0x1b0e   :  { %8562 = vmatpush3.bf16.msra.mxu0 %v10325_v47 }
0x1b0f   :  { %8563 = vmatprep.subr.bf16.mxu0 %v9447_v5 }
0x1b12   :  { %8565 = vmatpush3.bf16.msra.mxu0 %v10330_v33 }
0x1b13   :  { %8590 = vmatprep.subr.bf16.mxu0 %v9447_v5 }
0x1bc8   :  { %v2840_v6 = vpop.f32.mrb[32].mxu0 }
0x1bc9   :  { %v2841_v7 = vadd.f32 %v2840_v6, %v10396_v26  ;;  %v6939_v56 = vpop.f32.mrb[33].mxu0 }
0x1bcb   :  { %v2844_v12 = vadd.f32 %v2841_v7, %v2771_v11 }
0x1bcd   :  { %v2846_v16 = vadd.f32 %v2845_v14, %v2844_v12  ;;  %v3445_v14 = vld [vmem:[#allocation3 + $0x7] sm:$0x1] }
0x1bcf   :  { %6973 = vmatmul.mubr.f32.vlgmr.msra.gmra.mrb[32].mxu1 %v2846_v16 }
0x1bd0   :  { %8568 = vmatpush3.bf16.msra.mxu1 %v10334_v1  ;;  %7042 = vmatprep.mubr.msk.f32.mxu1 %vm9448_vm0, %v9449_v8 }
0x1bd1   :  { %8569 = vmatprep.subr.bf16.mxu1 %v9447_v5 }
0x1bd4   :  { %8571 = vmatpush3.bf16.msra.mxu1 %v10338_v9 }
0x1bd5   :  { %8572 = vmatprep.subr.bf16.mxu1 %v9447_v5 }
0x1bd8   :  { %8574 = vmatpush3.bf16.msra.mxu1 %v10342_v52 }
0x1bd9   :  { %8575 = vmatprep.subr.bf16.mxu1 %v9447_v5 }
0x1bdc   :  { %8577 = vmatpush3.bf16.msra.mxu1 %v10346_v55 }
0x1bdd   :  { %8578 = vmatprep.subr.bf16.mxu1 %v9447_v5 }
0x1be0   :  { %8580 = vmatpush3.bf16.msra.mxu1 %v10351_v60 }
0x1be1   :  { %8581 = vmatprep.subr.bf16.mxu1 %v9447_v5 }
0x1be4   :  { %8583 = vmatpush3.bf16.msra.mxu1 %v10354_v0 }
0x1be5   :  { %8584 = vmatprep.subr.bf16.mxu1 %v9447_v5 }
0x1be8   :  { %8586 = vmatpush3.bf16.msra.mxu1 %v10383_v20 }
0x1be9   :  { %8587 = vmatprep.subr.bf16.mxu1 %v9447_v5 }
0x1bec   :  { %8589 = vmatpush3.bf16.msra.mxu1 %v10387_v25 }
0x1bed   :  { %8614 = vmatprep.subr.bf16.mxu1 %v9447_v5 }
0x1ca2   :  { %v2913_v18 = vpop.f32.mrb[32].mxu1 }
0x1ca3   :  { %v2914_v19 = vadd.f32 %v2913_v18, %v10421_v39  ;;  %v6974_v22 = vpop.f32.mrb[33].mxu1 }
0x1ca5   :  { %2917 = vst [vmem:[%s2770_s15] sm:$0x1] %v2914_v19  ;;  %s4810_s15 = sld [smem:[#allocation9 + $0xa]] }
0x1cab   :  { %s3822_s0 = scalar_lea.vmem [#allocation2], %s4810_s15 }
0x1cac   :  { %v2923_v23 = vld [vmem:[%s2922_s23] sm:$0x1]  ;;  %s10811_s23 = sld [smem:[#allocation4 + $0xa]] }
0x1cad   :  { %7008 = vmatmul.mubr.f32.vlgmr.msra.gmra.mrb[34].mxu0 %v2923_v23  ;;  %v2921_v32 = vld [vmem:[%s2920_s26] sm:$0x1] }
0x1cae   :  { %8592 = vmatpush3.bf16.msra.mxu0 %v10299_v31  ;;  %7077 = vmatprep.mubr.msk.f32.mxu0 %vm9448_vm0, %v9449_v8 }
0x1caf   :  { %8593 = vmatprep.subr.bf16.mxu0 %v9447_v5 }
0x1cb2   :  { %8595 = vmatpush3.bf16.msra.mxu0 %v10302_v37  ;;  %s3820_s13 = scalar_lea.vmem [#allocation2], %s10811_s23 }
0x1cb3   :  { %8596 = vmatprep.subr.bf16.mxu0 %v9447_v5 }
0x1cb6   :  { %8598 = vmatpush3.bf16.msra.mxu0 %v10308_v40 }
0x1cb7   :  { %8599 = vmatprep.subr.bf16.mxu0 %v9447_v5 }
0x1cba   :  { %8601 = vmatpush3.bf16.msra.mxu0 %v10312_v44 }
0x1cbb   :  { %8602 = vmatprep.subr.bf16.mxu0 %v9447_v5 }
0x1cbe   :  { %8604 = vmatpush3.bf16.msra.mxu0 %v10316_v24 }
0x1cbf   :  { %8605 = vmatprep.subr.bf16.mxu0 %v9447_v5 }
0x1cc2   :  { %8607 = vmatpush3.bf16.msra.mxu0 %v10321_v50 }
0x1cc3   :  { %8608 = vmatprep.subr.bf16.mxu0 %v9447_v5 }
0x1cc6   :  { %8610 = vmatpush3.bf16.msra.mxu0 %v10325_v47 }
0x1cc7   :  { %8611 = vmatprep.subr.bf16.mxu0 %v9447_v5 }
0x1cca   :  { %8613 = vmatpush3.bf16.msra.mxu0 %v10330_v33 }
0x1ccb   :  { %8638 = vmatprep.subr.bf16.mxu0 %v9447_v5 }
0x1d80   :  { %v2990_v27 = vpop.f32.mrb[34].mxu0 }
0x1d81   :  { %v2991_v28 = vadd.f32 %v2990_v27, %v10396_v26  ;;  %v7009_v30 = vpop.f32.mrb[35].mxu0 }
0x1d83   :  { %v2994_v34 = vadd.f32 %v2991_v28, %v2921_v32 }
0x1d85   :  { %v2996_v38 = vadd.f32 %v2995_v36, %v2994_v34  ;;  %v3595_v36 = vld [vmem:[#allocation3 + $0x8] sm:$0x1] }
0x1d87   :  { %7043 = vmatmul.mubr.f32.vlgmr.msra.gmra.mrb[34].mxu1 %v2996_v38 }
0x1d88   :  { %8616 = vmatpush3.bf16.msra.mxu1 %v10334_v1  ;;  %7112 = vmatprep.mubr.msk.f32.mxu1 %vm9448_vm0, %v9449_v8 }
0x1d89   :  { %8617 = vmatprep.subr.bf16.mxu1 %v9447_v5 }
0x1d8c   :  { %8619 = vmatpush3.bf16.msra.mxu1 %v10338_v9 }
0x1d8d   :  { %8620 = vmatprep.subr.bf16.mxu1 %v9447_v5 }
0x1d90   :  { %8622 = vmatpush3.bf16.msra.mxu1 %v10342_v52 }
0x1d91   :  { %8623 = vmatprep.subr.bf16.mxu1 %v9447_v5 }
0x1d94   :  { %8625 = vmatpush3.bf16.msra.mxu1 %v10346_v55 }
0x1d95   :  { %8626 = vmatprep.subr.bf16.mxu1 %v9447_v5 }
0x1d98   :  { %8628 = vmatpush3.bf16.msra.mxu1 %v10351_v60 }
0x1d99   :  { %8629 = vmatprep.subr.bf16.mxu1 %v9447_v5 }
0x1d9c   :  { %8631 = vmatpush3.bf16.msra.mxu1 %v10354_v0 }
0x1d9d   :  { %8632 = vmatprep.subr.bf16.mxu1 %v9447_v5 }
0x1da0   :  { %8634 = vmatpush3.bf16.msra.mxu1 %v10383_v20 }
0x1da1   :  { %8635 = vmatprep.subr.bf16.mxu1 %v9447_v5 }
0x1da4   :  { %8637 = vmatpush3.bf16.msra.mxu1 %v10387_v25 }
0x1da5   :  { %8662 = vmatprep.subr.bf16.mxu1 %v9447_v5 }
0x1e5a   :  { %v3063_v42 = vpop.f32.mrb[34].mxu1 }
0x1e5b   :  { %v3064_v43 = vadd.f32 %v3063_v42, %v10421_v39  ;;  %v7044_v45 = vpop.f32.mrb[35].mxu1 }
0x1e5d   :  { %3067 = vst [vmem:[%s2920_s26] sm:$0x1] %v3064_v43 }
0x1e64   :  { %v3073_v46 = vld [vmem:[%s3072_s24] sm:$0x1] }
0x1e65   :  { %7078 = vmatmul.mubr.f32.vlgmr.msra.gmra.mrb[36].mxu0 %v3073_v46  ;;  %v3071_v15 = vld [vmem:[%s3070_s9] sm:$0x1] }
0x1e66   :  { %8640 = vmatpush3.bf16.msra.mxu0 %v10299_v31  ;;  %7147 = vmatprep.mubr.msk.f32.mxu0 %vm9448_vm0, %v9449_v8 }
0x1e67   :  { %8641 = vmatprep.subr.bf16.mxu0 %v9447_v5 }
0x1e6a   :  { %8643 = vmatpush3.bf16.msra.mxu0 %v10302_v37 }
0x1e6b   :  { %8644 = vmatprep.subr.bf16.mxu0 %v9447_v5 }
0x1e6e   :  { %8646 = vmatpush3.bf16.msra.mxu0 %v10308_v40 }
0x1e6f   :  { %8647 = vmatprep.subr.bf16.mxu0 %v9447_v5 }
0x1e72   :  { %8649 = vmatpush3.bf16.msra.mxu0 %v10312_v44 }
0x1e73   :  { %8650 = vmatprep.subr.bf16.mxu0 %v9447_v5 }
0x1e76   :  { %8652 = vmatpush3.bf16.msra.mxu0 %v10316_v24 }
0x1e77   :  { %8653 = vmatprep.subr.bf16.mxu0 %v9447_v5 }
0x1e7a   :  { %8655 = vmatpush3.bf16.msra.mxu0 %v10321_v50 }
0x1e7b   :  { %8656 = vmatprep.subr.bf16.mxu0 %v9447_v5 }
0x1e7e   :  { %8658 = vmatpush3.bf16.msra.mxu0 %v10325_v47 }
0x1e7f   :  { %8659 = vmatprep.subr.bf16.mxu0 %v9447_v5 }
0x1e82   :  { %8661 = vmatpush3.bf16.msra.mxu0 %v10330_v33 }
0x1e83   :  { %8686 = vmatprep.subr.bf16.mxu0 %v9447_v5 }
0x1f38   :  { %v3140_v48 = vpop.f32.mrb[36].mxu0 }
0x1f39   :  { %v3141_v49 = vadd.f32 %v3140_v48, %v10396_v26  ;;  %v7079_v10 = vpop.f32.mrb[37].mxu0 }
0x1f3b   :  { %v3144_v21 = vadd.f32 %v3141_v49, %v3071_v15 }
0x1f3d   :  { %v3146_v35 = vadd.f32 %v3145_v29, %v3144_v21  ;;  %v3745_v29 = vld [vmem:[#allocation3 + $0x9] sm:$0x1] }
0x1f3f   :  { %7113 = vmatmul.mubr.f32.vlgmr.msra.gmra.mrb[36].mxu1 %v3146_v35 }
0x1f40   :  { %8664 = vmatpush3.bf16.msra.mxu1 %v10334_v1  ;;  %7182 = vmatprep.mubr.msk.f32.mxu1 %vm9448_vm0, %v9449_v8 }
0x1f41   :  { %8665 = vmatprep.subr.bf16.mxu1 %v9447_v5 }
0x1f44   :  { %8667 = vmatpush3.bf16.msra.mxu1 %v10338_v9 }
0x1f45   :  { %8668 = vmatprep.subr.bf16.mxu1 %v9447_v5 }
0x1f48   :  { %8670 = vmatpush3.bf16.msra.mxu1 %v10342_v52 }
0x1f49   :  { %8671 = vmatprep.subr.bf16.mxu1 %v9447_v5 }
0x1f4c   :  { %8673 = vmatpush3.bf16.msra.mxu1 %v10346_v55 }
0x1f4d   :  { %8674 = vmatprep.subr.bf16.mxu1 %v9447_v5 }
0x1f50   :  { %8676 = vmatpush3.bf16.msra.mxu1 %v10351_v60 }
0x1f51   :  { %8677 = vmatprep.subr.bf16.mxu1 %v9447_v5 }
0x1f54   :  { %8679 = vmatpush3.bf16.msra.mxu1 %v10354_v0 }
0x1f55   :  { %8680 = vmatprep.subr.bf16.mxu1 %v9447_v5 }
0x1f58   :  { %8682 = vmatpush3.bf16.msra.mxu1 %v10383_v20 }
0x1f59   :  { %8683 = vmatprep.subr.bf16.mxu1 %v9447_v5 }
0x1f5c   :  { %8685 = vmatpush3.bf16.msra.mxu1 %v10387_v25 }
0x1f5d   :  { %8710 = vmatprep.subr.bf16.mxu1 %v9447_v5 }
0x2012   :  { %v3213_v41 = vpop.f32.mrb[36].mxu1 }
0x2013   :  { %v3214_v51 = vadd.f32 %v3213_v41, %v10421_v39  ;;  %v7114_v59 = vpop.f32.mrb[37].mxu1 }
0x2015   :  { %3217 = vst [vmem:[%s3070_s9] sm:$0x1] %v3214_v51 }
0x201c   :  { %v3223_v62 = vld [vmem:[%s3222_s12] sm:$0x1]  ;;  %s10992_s12 = sld [smem:[#allocation42_spill]] }
0x201d   :  { %7148 = vmatmul.mubr.f32.vlgmr.msra.gmra.mrb[38].mxu0 %v3223_v62  ;;  %v3221_v53 = vld [vmem:[%s3220_s8] sm:$0x1]  ;;  %v4139_v62 = vld [vmem:[#allocation19 + $0x18] sm:$0xff] }
0x201e   :  { %8688 = vmatpush3.bf16.msra.mxu0 %v10299_v31  ;;  %7217 = vmatprep.mubr.msk.f32.mxu0 %vm9448_vm0, %v9449_v8 }
0x201f   :  { %8689 = vmatprep.subr.bf16.mxu0 %v9447_v5 }
0x2022   :  { %8691 = vmatpush3.bf16.msra.mxu0 %v10302_v37 }
0x2023   :  { %8692 = vmatprep.subr.bf16.mxu0 %v9447_v5 }
0x2026   :  { %8694 = vmatpush3.bf16.msra.mxu0 %v10308_v40 }
0x2027   :  { %8695 = vmatprep.subr.bf16.mxu0 %v9447_v5 }
0x202a   :  { %8697 = vmatpush3.bf16.msra.mxu0 %v10312_v44 }
0x202b   :  { %8698 = vmatprep.subr.bf16.mxu0 %v9447_v5 }
0x202e   :  { %8700 = vmatpush3.bf16.msra.mxu0 %v10316_v24 }
0x202f   :  { %8701 = vmatprep.subr.bf16.mxu0 %v9447_v5 }
0x2032   :  { %8703 = vmatpush3.bf16.msra.mxu0 %v10321_v50 }
0x2033   :  { %8704 = vmatprep.subr.bf16.mxu0 %v9447_v5 }
0x2036   :  { %8706 = vmatpush3.bf16.msra.mxu0 %v10325_v47 }
0x2037   :  { %8707 = vmatprep.subr.bf16.mxu0 %v9447_v5 }
0x203a   :  { %8709 = vmatpush3.bf16.msra.mxu0 %v10330_v33 }
0x203b   :  { %8734 = vmatprep.subr.bf16.mxu0 %v9447_v5 }
0x20f0   :  { %v3290_v4 = vpop.f32.mrb[38].mxu0 }
0x20f1   :  { %v3291_v13 = vadd.f32 %v3290_v4, %v10396_v26  ;;  %v7149_v17 = vpop.f32.mrb[39].mxu0 }
0x20f2   :  { %v4141_v17 = vld [vmem:[#allocation19 + $0x28] sm:$0xff] }
0x20f3   :  { %v3294_v54 = vadd.f32 %v3291_v13, %v3221_v53  ;;  %v4140_v13 = vld [vmem:[#allocation19 + $0x20] sm:$0xff] }
0x20f4   :  { %v8933_v53 = vpack.c.bf16 %v4141_v17, %v4140_v13  ;;  %v4323_v13 = vld [vmem:[#allocation22 + $0x18] sm:$0xff]  ;;  %v4340_v17 = vld [vmem:[#allocation22 + $0xa0] sm:$0xff] }
0x20f5   :  { %v3296_v58 = vadd.f32 %v3295_v57, %v3294_v54  ;;  %v4142_v54 = vld [vmem:[#allocation19 + $0x30] sm:$0xff]  ;;  %v4143_v57 = vld [vmem:[#allocation19 + $0x38] sm:$0xff] }
0x20f7   :  { %7183 = vmatmul.mubr.f32.vlgmr.msra.gmra.mrb[38].mxu1 %v3296_v58  ;;  %v8936_v58 = vpack.c.bf16 %v4143_v57, %v4142_v54 }
0x20f8   :  { %8712 = vmatpush3.bf16.msra.mxu1 %v10334_v1  ;;  %7252 = vmatprep.mubr.msk.f32.mxu1 %vm9448_vm0, %v9449_v8 }
0x20f9   :  { %8713 = vmatprep.subr.bf16.mxu1 %v9447_v5 }
0x20fc   :  { %8715 = vmatpush3.bf16.msra.mxu1 %v10338_v9 }
0x20fd   :  { %8716 = vmatprep.subr.bf16.mxu1 %v9447_v5 }
0x2100   :  { %8718 = vmatpush3.bf16.msra.mxu1 %v10342_v52 }
0x2101   :  { %8719 = vmatprep.subr.bf16.mxu1 %v9447_v5 }
0x2104   :  { %8721 = vmatpush3.bf16.msra.mxu1 %v10346_v55 }
0x2105   :  { %8722 = vmatprep.subr.bf16.mxu1 %v9447_v5 }
0x2108   :  { %8724 = vmatpush3.bf16.msra.mxu1 %v10351_v60 }
0x2109   :  { %8725 = vmatprep.subr.bf16.mxu1 %v9447_v5 }
0x210c   :  { %8727 = vmatpush3.bf16.msra.mxu1 %v10354_v0 }
0x210d   :  { %8728 = vmatprep.subr.bf16.mxu1 %v9447_v5 }
0x2110   :  { %8730 = vmatpush3.bf16.msra.mxu1 %v10383_v20 }
0x2111   :  { %8731 = vmatprep.subr.bf16.mxu1 %v9447_v5 }
0x2114   :  { %8733 = vmatpush3.bf16.msra.mxu1 %v10387_v25 }
0x2115   :  { %8758 = vmatprep.subr.bf16.mxu1 %v9447_v5 }
0x21ca   :  { %v3363_v61 = vpop.f32.mrb[38].mxu1 }
0x21cb   :  { %v3364_v63 = vadd.f32 %v3363_v61, %v10421_v39  ;;  %v7184_v2 = vpop.f32.mrb[39].mxu1  ;;  %v4144_v61 = vld [vmem:[#allocation19 + $0x40] sm:$0xff] }
0x21cd   :  { %3367 = vst [vmem:[%s3220_s8] sm:$0x1] %v3364_v63  ;;  %v4145_v63 = vld [vmem:[#allocation19 + $0x48] sm:$0xff]  ;;  %s3970_s8 = scalar_lea.vmem [#allocation2], %s10863_s2 }
0x21ce   :  { %v8939_v2 = vpack.c.bf16 %v4145_v63, %v4144_v61  ;;  %v4325_v61 = vld [vmem:[#allocation22 + $0x28] sm:$0xff] }
0x21d4   :  { %v3373_v3 = vld [vmem:[%s3372_s10] sm:$0x1] }
0x21d5   :  { %7218 = vmatmul.mubr.f32.vlgmr.msra.gmra.mrb[40].mxu0 %v3373_v3  ;;  %v3371_v11 = vld [vmem:[%s3370_s18] sm:$0x1]  ;;  %v4146_v3 = vld [vmem:[#allocation19 + $0x50] sm:$0xff] }
0x21d6   :  { %8736 = vmatpush3.bf16.msra.mxu0 %v10299_v31  ;;  %7287 = vmatprep.mubr.msk.f32.mxu0 %vm9448_vm0, %v9449_v8 }
0x21d7   :  { %8737 = vmatprep.subr.bf16.mxu0 %v9447_v5 }
0x21da   :  { %8739 = vmatpush3.bf16.msra.mxu0 %v10302_v37 }
0x21db   :  { %8740 = vmatprep.subr.bf16.mxu0 %v9447_v5 }
0x21de   :  { %8742 = vmatpush3.bf16.msra.mxu0 %v10308_v40 }
0x21df   :  { %8743 = vmatprep.subr.bf16.mxu0 %v9447_v5 }
0x21e2   :  { %8745 = vmatpush3.bf16.msra.mxu0 %v10312_v44 }
0x21e3   :  { %8746 = vmatprep.subr.bf16.mxu0 %v9447_v5 }
0x21e6   :  { %8748 = vmatpush3.bf16.msra.mxu0 %v10316_v24 }
0x21e7   :  { %8749 = vmatprep.subr.bf16.mxu0 %v9447_v5 }
0x21ea   :  { %8751 = vmatpush3.bf16.msra.mxu0 %v10321_v50 }
0x21eb   :  { %8752 = vmatprep.subr.bf16.mxu0 %v9447_v5 }
0x21ee   :  { %8754 = vmatpush3.bf16.msra.mxu0 %v10325_v47 }
0x21ef   :  { %8755 = vmatprep.subr.bf16.mxu0 %v9447_v5 }
0x21f2   :  { %8757 = vmatpush3.bf16.msra.mxu0 %v10330_v33 }
0x21f3   :  { %8782 = vmatprep.subr.bf16.mxu0 %v9447_v5 }
0x22a8   :  { %v3440_v6 = vpop.f32.mrb[40].mxu0 }
0x22a9   :  { %v3441_v7 = vadd.f32 %v3440_v6, %v10396_v26  ;;  %v7219_v56 = vpop.f32.mrb[41].mxu0  ;;  %v4147_v6 = vld [vmem:[#allocation19 + $0x58] sm:$0xff] }
0x22aa   :  { %v4148_v56 = vld [vmem:[#allocation19 + $0x60] sm:$0xff] }
0x22ab   :  { %v3444_v12 = vadd.f32 %v3441_v7, %v3371_v11  ;;  %v8942_v7 = vpack.c.bf16 %v4147_v6, %v4146_v3  ;;  %v4149_v11 = vld [vmem:[#allocation19 + $0x68] sm:$0xff]  ;;  %v4343_v3 = vld [vmem:[#allocation22 + $0xb8] sm:$0xff] }
0x22ad   :  { %v3446_v16 = vadd.f32 %v3445_v14, %v3444_v12  ;;  %v8945_v12 = vpack.c.bf16 %v4149_v11, %v4148_v56  ;;  %v4150_v14 = vld [vmem:[#allocation19 + $0x70] sm:$0xff]  ;;  %v4327_v11 = vld [vmem:[#allocation22 + $0x38] sm:$0xff] }
0x22ae   :  { %v4326_v56 = vld [vmem:[#allocation22 + $0x30] sm:$0xff] }
0x22af   :  { %7253 = vmatmul.mubr.f32.vlgmr.msra.gmra.mrb[40].mxu1 %v3446_v16  ;;  %v4151_v16 = vld [vmem:[#allocation19 + $0x78] sm:$0xff] }
0x22b0   :  { %8760 = vmatpush3.bf16.msra.mxu1 %v10334_v1  ;;  %7322 = vmatprep.mubr.msk.f32.mxu1 %vm9448_vm0, %v9449_v8 }
0x22b1   :  { %8761 = vmatprep.subr.bf16.mxu1 %v9447_v5 }
0x22b4   :  { %8763 = vmatpush3.bf16.msra.mxu1 %v10338_v9 }
0x22b5   :  { %8764 = vmatprep.subr.bf16.mxu1 %v9447_v5 }
0x22b8   :  { %8766 = vmatpush3.bf16.msra.mxu1 %v10342_v52 }
0x22b9   :  { %8767 = vmatprep.subr.bf16.mxu1 %v9447_v5 }
0x22bc   :  { %8769 = vmatpush3.bf16.msra.mxu1 %v10346_v55 }
0x22bd   :  { %8770 = vmatprep.subr.bf16.mxu1 %v9447_v5 }
0x22c0   :  { %8772 = vmatpush3.bf16.msra.mxu1 %v10351_v60 }
0x22c1   :  { %8773 = vmatprep.subr.bf16.mxu1 %v9447_v5 }
0x22c4   :  { %8775 = vmatpush3.bf16.msra.mxu1 %v10354_v0 }
0x22c5   :  { %8776 = vmatprep.subr.bf16.mxu1 %v9447_v5 }
0x22c8   :  { %8778 = vmatpush3.bf16.msra.mxu1 %v10383_v20 }
0x22c9   :  { %8779 = vmatprep.subr.bf16.mxu1 %v9447_v5 }
0x22cc   :  { %8781 = vmatpush3.bf16.msra.mxu1 %v10387_v25 }
0x22cd   :  { %8806 = vmatprep.subr.bf16.mxu1 %v9447_v5 }
0x2382   :  { %v3513_v18 = vpop.f32.mrb[40].mxu1 }
0x2383   :  { %v3514_v19 = vadd.f32 %v3513_v18, %v10421_v39  ;;  %v7254_v22 = vpop.f32.mrb[41].mxu1  ;;  %v8948_v18 = vpack.c.bf16 %v4151_v16, %v4150_v14  ;;  %v4344_v14 = vld [vmem:[#allocation22 + $0xc0] sm:$0xff]  ;;  %v4345_v16 = vld [vmem:[#allocation22 + $0xc8] sm:$0xff] }
0x2384   :  { %v4120_v22 = vld [vmem:[#allocation17 + $0x8] sm:$0xff] }
0x2385   :  { %3517 = vst [vmem:[%s3370_s18] sm:$0x1] %v3514_v19  ;;  %v4119_v19 = vld [vmem:[#allocation17] sm:$0xff] }
0x238c   :  { %v3523_v23 = vld [vmem:[%s3522_s5] sm:$0x1] }
0x238d   :  { %7288 = vmatmul.mubr.f32.vlgmr.msra.gmra.mrb[42].mxu0 %v3523_v23  ;;  %v3521_v32 = vld [vmem:[%s3520_s28] sm:$0x1] }
0x238e   :  { %8784 = vmatpush3.bf16.msra.mxu0 %v10299_v31  ;;  %7357 = vmatprep.mubr.msk.f32.mxu0 %vm9448_vm0, %v9449_v8  ;;  %v4135_v23 = vld [vmem:[%s10992_s12] sm:$0xff] }
0x238f   :  { %8785 = vmatprep.subr.bf16.mxu0 %v9447_v5 }
0x2392   :  { %8787 = vmatpush3.bf16.msra.mxu0 %v10302_v37 }
0x2393   :  { %8788 = vmatprep.subr.bf16.mxu0 %v9447_v5 }
0x2396   :  { %8790 = vmatpush3.bf16.msra.mxu0 %v10308_v40 }
0x2397   :  { %8791 = vmatprep.subr.bf16.mxu0 %v9447_v5 }
0x239a   :  { %8793 = vmatpush3.bf16.msra.mxu0 %v10312_v44 }
0x239b   :  { %8794 = vmatprep.subr.bf16.mxu0 %v9447_v5 }
0x239e   :  { %8796 = vmatpush3.bf16.msra.mxu0 %v10316_v24 }
0x239f   :  { %8797 = vmatprep.subr.bf16.mxu0 %v9447_v5 }
0x23a2   :  { %8799 = vmatpush3.bf16.msra.mxu0 %v10321_v50 }
0x23a3   :  { %8800 = vmatprep.subr.bf16.mxu0 %v9447_v5 }
0x23a6   :  { %8802 = vmatpush3.bf16.msra.mxu0 %v10325_v47 }
0x23a7   :  { %8803 = vmatprep.subr.bf16.mxu0 %v9447_v5 }
0x23aa   :  { %8805 = vmatpush3.bf16.msra.mxu0 %v10330_v33 }
0x23ab   :  { %8830 = vmatprep.subr.bf16.mxu0 %v9447_v5 }
0x2460   :  { %v3590_v27 = vpop.f32.mrb[42].mxu0 }
0x2461   :  { %v3591_v28 = vadd.f32 %v3590_v27, %v10396_v26  ;;  %v7289_v30 = vpop.f32.mrb[43].mxu0  ;;  %v8951_v27 = vpack.c.bf16 %v4120_v22, %v4119_v19  ;;  %v8988_v22 = vpack.c.bf16 %v4327_v11, %v4326_v56  ;;  %v4508_v56 = vld [vmem:[#allocation23 + $0x8] sm:$0xff]  ;;  %v4509_v11 = vld [vmem:[#allocation23 + $0x10] sm:$0xff] }
0x2462   :  { %v4122_v30 = vld [vmem:[#allocation17 + $0x18] sm:$0xff] }
0x2463   :  { %v3594_v34 = vadd.f32 %v3591_v28, %v3521_v32  ;;  %v4121_v28 = vld [vmem:[#allocation17 + $0x10] sm:$0xff] }
0x2464   :  { %v8954_v32 = vpack.c.bf16 %v4122_v30, %v4121_v28  ;;  %v4329_v28 = vld [vmem:[#allocation22 + $0x48] sm:$0xff] }
0x2465   :  { %v3596_v38 = vadd.f32 %v3595_v36, %v3594_v34  ;;  %v4123_v34 = vld [vmem:[#allocation17 + $0x20] sm:$0xff]  ;;  %v4124_v36 = vld [vmem:[#allocation17 + $0x28] sm:$0xff] }
0x2467   :  { %7323 = vmatmul.mubr.f32.vlgmr.msra.gmra.mrb[42].mxu1 %v3596_v38  ;;  %v8957_v38 = vpack.c.bf16 %v4124_v36, %v4123_v34  ;;  %v4347_v34 = vld [vmem:[#allocation22 + $0xd8] sm:$0xff] }
0x2468   :  { %8808 = vmatpush3.bf16.msra.mxu1 %v10334_v1  ;;  %7392 = vmatprep.mubr.msk.f32.mxu1 %vm9448_vm0, %v9449_v8 }
0x2469   :  { %8809 = vmatprep.subr.bf16.mxu1 %v9447_v5 }
0x246c   :  { %8811 = vmatpush3.bf16.msra.mxu1 %v10338_v9 }
0x246d   :  { %8812 = vmatprep.subr.bf16.mxu1 %v9447_v5 }
0x2470   :  { %8814 = vmatpush3.bf16.msra.mxu1 %v10342_v52 }
0x2471   :  { %8815 = vmatprep.subr.bf16.mxu1 %v9447_v5 }
0x2474   :  { %8817 = vmatpush3.bf16.msra.mxu1 %v10346_v55 }
0x2475   :  { %8818 = vmatprep.subr.bf16.mxu1 %v9447_v5 }
0x2478   :  { %8820 = vmatpush3.bf16.msra.mxu1 %v10351_v60 }
0x2479   :  { %8821 = vmatprep.subr.bf16.mxu1 %v9447_v5 }
0x247c   :  { %8823 = vmatpush3.bf16.msra.mxu1 %v10354_v0 }
0x247d   :  { %8824 = vmatprep.subr.bf16.mxu1 %v9447_v5 }
0x2480   :  { %8826 = vmatpush3.bf16.msra.mxu1 %v10383_v20 }
0x2481   :  { %8827 = vmatprep.subr.bf16.mxu1 %v9447_v5 }
0x2484   :  { %8829 = vmatpush3.bf16.msra.mxu1 %v10387_v25 }
0x2485   :  { %8854 = vmatprep.subr.bf16.mxu1 %v9447_v5 }
0x253a   :  { %v3663_v42 = vpop.f32.mrb[42].mxu1 }
0x253b   :  { %v3664_v43 = vadd.f32 %v3663_v42, %v10421_v39  ;;  %v7324_v45 = vpop.f32.mrb[43].mxu1  ;;  %v4125_v42 = vld [vmem:[#allocation17 + $0x30] sm:$0xff] }
0x253d   :  { %3667 = vst [vmem:[%s3520_s28] sm:$0x1] %v3664_v43  ;;  %v4126_v43 = vld [vmem:[#allocation17 + $0x38] sm:$0xff] }
0x253e   :  { %v8960_v45 = vpack.c.bf16 %v4126_v43, %v4125_v42  ;;  %v4330_v42 = vld [vmem:[#allocation22 + $0x50] sm:$0xff]  ;;  %v4331_v43 = vld [vmem:[#allocation22 + $0x58] sm:$0xff] }
0x2544   :  { %v3673_v46 = vld [vmem:[%s3672_s30] sm:$0x1] }
0x2545   :  { %7358 = vmatmul.mubr.f32.vlgmr.msra.gmra.mrb[44].mxu0 %v3673_v46  ;;  %v3671_v15 = vld [vmem:[%s3670_s21] sm:$0x1]  ;;  %v4127_v46 = vld [vmem:[#allocation17 + $0x40] sm:$0xff] }
0x2546   :  { %8832 = vmatpush3.bf16.msra.mxu0 %v10299_v31  ;;  %7427 = vmatprep.mubr.msk.f32.mxu0 %vm9448_vm0, %v9449_v8 }
0x2547   :  { %8833 = vmatprep.subr.bf16.mxu0 %v9447_v5 }
0x254a   :  { %8835 = vmatpush3.bf16.msra.mxu0 %v10302_v37 }
0x254b   :  { %8836 = vmatprep.subr.bf16.mxu0 %v9447_v5 }
0x254e   :  { %8838 = vmatpush3.bf16.msra.mxu0 %v10308_v40 }
0x254f   :  { %8839 = vmatprep.subr.bf16.mxu0 %v9447_v5 }
0x2552   :  { %8841 = vmatpush3.bf16.msra.mxu0 %v10312_v44 }
0x2553   :  { %8842 = vmatprep.subr.bf16.mxu0 %v9447_v5 }
0x2556   :  { %8844 = vmatpush3.bf16.msra.mxu0 %v10316_v24 }
0x2557   :  { %8845 = vmatprep.subr.bf16.mxu0 %v9447_v5 }
0x255a   :  { %8847 = vmatpush3.bf16.msra.mxu0 %v10321_v50 }
0x255b   :  { %8848 = vmatprep.subr.bf16.mxu0 %v9447_v5 }
0x255e   :  { %8850 = vmatpush3.bf16.msra.mxu0 %v10325_v47 }
0x255f   :  { %8851 = vmatprep.subr.bf16.mxu0 %v9447_v5 }
0x2562   :  { %8853 = vmatpush3.bf16.msra.mxu0 %v10330_v33 }
0x2563   :  { %8878 = vmatprep.subr.bf16.mxu0 %v9447_v5 }
0x2618   :  { %v3740_v48 = vpop.f32.mrb[44].mxu0 }
0x2619   :  { %v3741_v49 = vadd.f32 %v3740_v48, %v10396_v26  ;;  %v7359_v10 = vpop.f32.mrb[45].mxu0  ;;  %v4128_v48 = vld [vmem:[#allocation17 + $0x48] sm:$0xff] }
0x261b   :  { %v3744_v21 = vadd.f32 %v3741_v49, %v3671_v15  ;;  %v8963_v49 = vpack.c.bf16 %v4128_v48, %v4127_v46  ;;  %v4349_v46 = vld [vmem:[#allocation22 + $0xe8] sm:$0xff]  ;;  %v8996_v48 = vpack.c.bf16 %v4331_v43, %v4330_v42  ;;  %v4518_v42 = vld [vmem:[#allocation23 + $0x58] sm:$0xff] }
0x261d   :  { %v3746_v35 = vadd.f32 %v3745_v29, %v3744_v21 }
0x261f   :  { %7393 = vmatmul.mubr.f32.vlgmr.msra.gmra.mrb[44].mxu1 %v3746_v35 }
0x2620   :  { %8856 = vmatpush3.bf16.msra.mxu1 %v10334_v1  ;;  %7462 = vmatprep.mubr.msk.f32.mxu1 %vm9448_vm0, %v9449_v8 }
0x2621   :  { %8857 = vmatprep.subr.bf16.mxu1 %v9447_v5 }
0x2624   :  { %8859 = vmatpush3.bf16.msra.mxu1 %v10338_v9 }
0x2625   :  { %8860 = vmatprep.subr.bf16.mxu1 %v9447_v5 }
0x2628   :  { %8862 = vmatpush3.bf16.msra.mxu1 %v10342_v52 }
0x2629   :  { %8863 = vmatprep.subr.bf16.mxu1 %v9447_v5 }
0x262c   :  { %8865 = vmatpush3.bf16.msra.mxu1 %v10346_v55 }
0x262d   :  { %8866 = vmatprep.subr.bf16.mxu1 %v9447_v5 }
0x2630   :  { %8868 = vmatpush3.bf16.msra.mxu1 %v10351_v60 }
0x2631   :  { %8869 = vmatprep.subr.bf16.mxu1 %v9447_v5 }
0x2634   :  { %8871 = vmatpush3.bf16.msra.mxu1 %v10354_v0 }
0x2635   :  { %8872 = vmatprep.subr.bf16.mxu1 %v9447_v5 }
0x2638   :  { %8874 = vmatpush3.bf16.msra.mxu1 %v10383_v20 }
0x2639   :  { %8875 = vmatprep.subr.bf16.mxu1 %v9447_v5 }
0x263c   :  { %8877 = vmatpush3.bf16.msra.mxu1 %v10387_v25 }
0x263d   :  { %8902 = vmatprep.subr.bf16.mxu1 %v9447_v5 }
0x26f2   :  { %v3813_v26 = vpop.f32.mrb[44].mxu1 }
0x26f3   :  { %v3814_v41 = vadd.f32 %v3813_v26, %v10421_v39  ;;  %v7394_v51 = vpop.f32.mrb[45].mxu1  ;;  %v4045_v26 = vld [vmem:[#allocation3 + $0xb] sm:$0x1] }
0x26f4   :  { %v4129_v51 = vld [vmem:[#allocation17 + $0x50] sm:$0xff] }
0x26f5   :  { %3817 = vst [vmem:[%s3670_s21] sm:$0x1] %v3814_v41 }
0x26fc   :  { %v3823_v59 = vld [vmem:[%s3822_s0] sm:$0x1] }
0x26fd   :  { %7428 = vmatmul.mubr.f32.vlgmr.msra.gmra.mrb[46].mxu0 %v3823_v59  ;;  %v4130_v59 = vld [vmem:[#allocation17 + $0x58] sm:$0xff] }
0x26fe   :  { %8880 = vmatpush3.bf16.msra.mxu0 %v10299_v31  ;;  %7497 = vmatprep.mubr.msk.f32.mxu0 %vm9448_vm0, %v9449_v8 }
0x26ff   :  { %8881 = vmatprep.subr.bf16.mxu0 %v9447_v5 }
0x2702   :  { %8883 = vmatpush3.bf16.msra.mxu0 %v10302_v37  ;;  %v10816_v37 = vld [vmem:[%s10991_s4 + $0x1] sm:$0x1]  ;;  %s4812_s4 = sld [smem:[#allocation9 + $0xb]] }
0x2703   :  { %8884 = vmatprep.subr.bf16.mxu0 %v9447_v5 }
0x2706   :  { %8886 = vmatpush3.bf16.msra.mxu0 %v10308_v40 }
0x2707   :  { %8887 = vmatprep.subr.bf16.mxu0 %v9447_v5 }
0x2708   :  { %s3972_s9 = scalar_lea.vmem [#allocation2], %s4812_s4 }
0x270a   :  { %8889 = vmatpush3.bf16.msra.mxu0 %v10312_v44 }
0x270b   :  { %8890 = vmatprep.subr.bf16.mxu0 %v9447_v5 }
0x270e   :  { %8892 = vmatpush3.bf16.msra.mxu0 %v10316_v24  ;;  %v3821_v24 = vld [vmem:[%s3820_s13] sm:$0x1] }
0x270f   :  { %8893 = vmatprep.subr.bf16.mxu0 %v9447_v5 }
0x2712   :  { %8895 = vmatpush3.bf16.msra.mxu0 %v10321_v50 }
0x2713   :  { %8896 = vmatprep.subr.bf16.mxu0 %v9447_v5 }
0x2716   :  { %8898 = vmatpush3.bf16.msra.mxu0 %v10325_v47  ;;  %v3895_v47 = vld [vmem:[#allocation3 + $0xa] sm:$0x1] }
0x2717   :  { %8899 = vmatprep.subr.bf16.mxu0 %v9447_v5 }
0x271a   :  { %8901 = vmatpush3.bf16.msra.mxu0 %v10330_v33 }
0x271b   :  { %8926 = vmatprep.subr.bf16.mxu0 %v9447_v5 }
0x27d0   :  { %v3890_v31 = vpop.f32.mrb[46].mxu0 }
0x27d1   :  { %v3891_v40 = vadd.f32 %v10816_v37, %v3890_v31  ;;  %v7429_v44 = vpop.f32.mrb[47].mxu0  ;;  %v8966_v31 = vpack.c.bf16 %v4130_v59, %v4129_v51  ;;  %v4335_v51 = vld [vmem:[#allocation22 + $0x78] sm:$0xff] }
0x27d2   :  { %v4132_v44 = vld [vmem:[#allocation17 + $0x68] sm:$0xff] }
0x27d3   :  { %v3894_v50 = vadd.f32 %v3891_v40, %v3821_v24  ;;  %v4131_v40 = vld [vmem:[#allocation17 + $0x60] sm:$0xff] }
0x27d4   :  { %v8969_v24 = vpack.c.bf16 %v4132_v44, %v4131_v40  ;;  %v4304_v40 = vld [vmem:[#allocation20] sm:$0xff]  ;;  %v4305_v44 = vld [vmem:[#allocation20 + $0x8] sm:$0xff] }
0x27d5   :  { %v3896_v39 = vadd.f32 %v3895_v47, %v3894_v50  ;;  %v4133_v50 = vld [vmem:[#allocation17 + $0x70] sm:$0xff]  ;;  %v4134_v47 = vld [vmem:[#allocation17 + $0x78] sm:$0xff] }
0x27d7   :  { %7463 = vmatmul.mubr.f32.vlgmr.msra.gmra.mrb[46].mxu1 %v3896_v39  ;;  %v4336_v39 = vld [vmem:[#allocation22 + $0x80] sm:$0xff] }
0x27d8   :  { %8904 = vmatpush3.bf16.msra.mxu1 %v10334_v1  ;;  %7532 = vmatprep.mubr.msk.f32.mxu1 %vm9448_vm0, %v9449_v8  ;;  %v10840_v1 = vld [vmem:[%s10957_s11 + $0x1] sm:$0x1] }
0x27d9   :  { %8905 = vmatprep.subr.bf16.mxu1 %v9447_v5 }
0x27dc   :  { %8907 = vmatpush3.bf16.msra.mxu1 %v10338_v9 }
0x27dd   :  { %8908 = vmatprep.subr.bf16.mxu1 %v9447_v5 }
0x27e0   :  { %8910 = vmatpush3.bf16.msra.mxu1 %v10342_v52 }
0x27e1   :  { %8911 = vmatprep.subr.bf16.mxu1 %v9447_v5 }
0x27e4   :  { %8913 = vmatpush3.bf16.msra.mxu1 %v10346_v55 }
0x27e5   :  { %8914 = vmatprep.subr.bf16.mxu1 %v9447_v5 }
0x27e8   :  { %8916 = vmatpush3.bf16.msra.mxu1 %v10351_v60  ;;  %v4136_v60 = vld [vmem:[#allocation19] sm:$0xff] }
0x27e9   :  { %8917 = vmatprep.subr.bf16.mxu1 %v9447_v5 }
0x27ec   :  { %8919 = vmatpush3.bf16.msra.mxu1 %v10354_v0  ;;  %v4137_v0 = vld [vmem:[#allocation19 + $0x8] sm:$0xff] }
0x27ed   :  { %8920 = vmatprep.subr.bf16.mxu1 %v9447_v5 }
0x27f0   :  { %8922 = vmatpush3.bf16.msra.mxu1 %v10383_v20  ;;  %v4138_v20 = vld [vmem:[#allocation19 + $0x10] sm:$0xff] }
0x27f1   :  { %8923 = vmatprep.subr.bf16.mxu1 %v9447_v5  ;;  %v8930_v4 = vpack.c.bf16 %v4139_v62, %v4138_v20  ;;  %v4353_v20 = vlaneseq }
0x27f3   :  { %v4354_v63 = vshrl.u32 %v4353_v20, 7 }
0x27f4   :  { %8925 = vmatpush3.bf16.msra.mxu1 %v10387_v25  ;;  %v8927_v25 = vpack.c.bf16 %v4137_v0, %v4136_v60  ;;  %v4338_v60 = vld [vmem:[#allocation22 + $0x90] sm:$0xff]  ;;  %v4339_v0 = vld [vmem:[#allocation22 + $0x98] sm:$0xff] }
0x27f5   :  { %v8978_v62 = vpack.c.bf16 %v4339_v0, %v4338_v60  ;;  %v4355_v59 = vsub.s32 0, %v4354_v63 }
0x28aa   :  { %v3963_v33 = vpop.f32.mrb[46].mxu1 }
0x28ab   :  { %v3964_v9 = vadd.f32 %v10840_v1, %v3963_v33  ;;  %v7464_v52 = vpop.f32.mrb[47].mxu1  ;;  %v4337_v33 = vld [vmem:[#allocation22 + $0x88] sm:$0xff] }
0x28ac   :  { %v8974_v52 = vpack.c.bf16 %v4337_v33, %v4336_v39  ;;  %v4308_v33 = vld [vmem:[#allocation20 + $0x20] sm:$0xff] }
0x28ad   :  { %3967 = vst [vmem:[%s3820_s13] sm:$0x1] %v3964_v9  ;;  %v4320_v9 = vld [vmem:[#allocation22] sm:$0xff] }
0x28ae   :  { %8975 = vmatprep.subr.bf16.mxu1 %v8974_v52 }
0x28b4   :  { %v3973_v55 = vld [vmem:[%s3972_s9] sm:$0x1] }
0x28b5   :  { %7498 = vmatmul.mubr.f32.vlgmr.msra.gmra.mrb[48].mxu0 %v3973_v55  ;;  %v3971_v29 = vld [vmem:[%s3970_s8] sm:$0x1] }
0x28b6   :  { %7567 = vmatprep.mubr.msk.f32.mxu0 %vm9448_vm0, %v9449_v8  ;;  %8928 = vmatpush3.bf16.msra.mxu0 %v8927_v25  ;;  %v4321_v55 = vld [vmem:[#allocation22 + $0x8] sm:$0xff] }
0x28b7   :  { %8929 = vmatprep.subr.bf16.mxu0 %v9447_v5  ;;  %v8976_v25 = vpack.c.bf16 %v4321_v55, %v4320_v9  ;;  %v4309_v9 = vld [vmem:[#allocation20 + $0x28] sm:$0xff] }
0x28b8   :  { %v9013_v52 = vpack.c.bf16 %v4309_v9, %v4308_v33  ;;  %v4596_v33 = vld [vmem:[#allocation25 + $0x8] sm:$0xff]  ;;  %v4597_v9 = vld [vmem:[#allocation25 + $0x10] sm:$0xff] }
0x28ba   :  { %8931 = vmatpush3.bf16.msra.mxu0 %v8930_v4  ;;  %v4322_v4 = vld [vmem:[#allocation22 + $0x10] sm:$0xff] }
0x28bb   :  { %8932 = vmatprep.subr.bf16.mxu0 %v9447_v5  ;;  %v8980_v54 = vpack.c.bf16 %v4323_v13, %v4322_v4  ;;  %v4312_v13 = vld [vmem:[#allocation20 + $0x40] sm:$0xff] }
0x28be   :  { %8934 = vmatpush3.bf16.msra.mxu0 %v8933_v53  ;;  %v4341_v53 = vld [vmem:[#allocation22 + $0xa8] sm:$0xff] }
0x28bf   :  { %8935 = vmatprep.subr.bf16.mxu0 %v9447_v5  ;;  %v8982_v57 = vpack.c.bf16 %v4341_v53, %v4340_v17  ;;  %v4313_v17 = vld [vmem:[#allocation20 + $0x48] sm:$0xff] }
0x28c0   :  { %v9019_v53 = vpack.c.bf16 %v4313_v17, %v4312_v13  ;;  %v4603_v13 = vld [vmem:[#allocation25 + $0x40] sm:$0xff]  ;;  %v4604_v17 = vld [vmem:[#allocation25 + $0x48] sm:$0xff] }
0x28c2   :  { %8937 = vmatpush3.bf16.msra.mxu0 %v8936_v58  ;;  %v4324_v58 = vld [vmem:[#allocation22 + $0x20] sm:$0xff] }
0x28c3   :  { %8938 = vmatprep.subr.bf16.mxu0 %v9447_v5  ;;  %v8984_v6 = vpack.c.bf16 %v4325_v61, %v4324_v58  ;;  %v4316_v58 = vld [vmem:[#allocation20 + $0x60] sm:$0xff]  ;;  %v4317_v61 = vld [vmem:[#allocation20 + $0x68] sm:$0xff] }
0x28c6   :  { %8940 = vmatpush3.bf16.msra.mxu0 %v8939_v2  ;;  %v4342_v2 = vld [vmem:[#allocation22 + $0xb0] sm:$0xff] }
0x28c7   :  { %8941 = vmatprep.subr.bf16.mxu0 %v9447_v5 }
0x28ca   :  { %8943 = vmatpush3.bf16.msra.mxu0 %v8942_v7  ;;  %v8986_v7 = vpack.c.bf16 %v4343_v3, %v4342_v2  ;;  %v4318_v2 = vld [vmem:[#allocation20 + $0x70] sm:$0xff]  ;;  %v4319_v3 = vld [vmem:[#allocation20 + $0x78] sm:$0xff] }
0x28cb   :  { %8944 = vmatprep.subr.bf16.mxu0 %v9447_v5 }
0x28ce   :  { %8946 = vmatpush3.bf16.msra.mxu0 %v8945_v12  ;;  %v4359_v12 = vsub.s32 1, %v4354_v63  ;;  %v9025_v63 = vpack.c.bf16 %v4317_v61, %v4316_v58  ;;  %v4607_v58 = vld [vmem:[#allocation25 + $0x60] sm:$0xff]  ;;  %v4608_v61 = vld [vmem:[#allocation25 + $0x68] sm:$0xff] }
0x28cf   :  { %8947 = vmatprep.subr.bf16.mxu0 %v9447_v5 }
0x28d2   :  { %8949 = vmatpush3.bf16.msra.mxu0 %v8948_v18  ;;  %v4302_v18 = vld [vmem:[%s10993_s6] sm:$0x3] }
0x28d3   :  { %8950 = vmatprep.subr.bf16.mxu0 %v9447_v5  ;;  %v4303_v19 = vmax.f32 %v4302_v18, 0.0  ;;  %v4511_v18 = vld [vmem:[#allocation23 + $0x20] sm:$0xff] }
0x28d5   :  { %7568 = vmatmul.mubr.f32.vlgmr.msra.gmra.mrb[50].mxu0 %v4135_v23  ;;  %v8990_v23 = vpack.c.bf16 %v4345_v16, %v4344_v14  ;;  %v4360_v30 = vrot.slane %v4303_v19, %v4359_v12  ;;  %v4510_v14 = vld [vmem:[#allocation23 + $0x18] sm:$0xff] }
0x28d6   :  { %8952 = vmatpush3.bf16.msra.mxu0 %v8951_v27  ;;  %7602 = vmatprep.mubr.msk.f32.mxu0 %vm9448_vm0, %v9449_v8  ;;  %v4328_v27 = vld [vmem:[#allocation22 + $0x40] sm:$0xff]  ;;  %v9034_v16 = vpack.c.bf16 %v4510_v14, %v4509_v11  ;;  %v4610_v14 = vld [vmem:[#allocation25 + $0x78] sm:$0xff] }
0x28d7   :  { %8953 = vmatprep.subr.bf16.mxu0 %v9447_v5  ;;  %v8992_v36 = vpack.c.bf16 %v4329_v28, %v4328_v27  ;;  %v4514_v27 = vld [vmem:[#allocation23 + $0x38] sm:$0xff] }
0x28da   :  { %8955 = vmatpush3.bf16.msra.mxu0 %v8954_v32  ;;  %v4346_v32 = vld [vmem:[#allocation22 + $0xd0] sm:$0xff] }
0x28db   :  { %8956 = vmatprep.subr.bf16.mxu0 %v9447_v5 }
0x28de   :  { %8958 = vmatpush3.bf16.msra.mxu0 %v8957_v38  ;;  %v8994_v38 = vpack.c.bf16 %v4347_v34, %v4346_v32  ;;  %v4516_v32 = vld [vmem:[#allocation23 + $0x48] sm:$0xff] }
0x28df   :  { %8959 = vmatprep.subr.bf16.mxu0 %v9447_v5 }
0x28e2   :  { %8961 = vmatpush3.bf16.msra.mxu0 %v8960_v45  ;;  %v4348_v45 = vld [vmem:[#allocation22 + $0xe0] sm:$0xff] }
0x28e3   :  { %8962 = vmatprep.subr.bf16.mxu0 %v9447_v5 }
0x28e6   :  { %8964 = vmatpush3.bf16.msra.mxu0 %v8963_v49  ;;  %v8998_v49 = vpack.c.bf16 %v4349_v46, %v4348_v45 }
0x28e7   :  { %8965 = vmatprep.subr.bf16.mxu0 %v9447_v5 }
0x28ea   :  { %8967 = vmatpush3.bf16.msra.mxu0 %v8966_v31 }
0x28eb   :  { %8968 = vmatprep.subr.bf16.mxu0 %v9447_v5 }
0x28ee   :  { %8970 = vmatpush3.bf16.msra.mxu0 %v8969_v24  ;;  %v4356_v24 = vrot.slane %v4303_v19, %v4355_v59  ;;  %v4512_v19 = vld [vmem:[#allocation23 + $0x28] sm:$0xff] }
0x28ef   :  { %8971 = vmatprep.subr.bf16.mxu0 %v9447_v5 }
0x2988   :  { %v4040_v10 = vpop.f32.mrb[48].mxu0 }
0x2989   :  { %v4041_v15 = vadd.f32 %v10816_v37, %v4040_v10  ;;  %v7499_v21 = vpop.f32.mrb[49].mxu0  ;;  %v8972_v37 = vpack.c.bf16 %v4134_v47, %v4133_v50  ;;  %v4332_v10 = vld [vmem:[#allocation22 + $0x60] sm:$0xff]  ;;  %v9007_v50 = vpack.c.bf16 %v4305_v44, %v4304_v40  ;;  %v4306_v47 = vld [vmem:[#allocation20 + $0x10] sm:$0xff]  ;;  %v4520_v44 = vld [vmem:[#allocation23 + $0x68] sm:$0xff] }
0x298a   :  { %v4350_v21 = vld [vmem:[#allocation22 + $0xf0] sm:$0xff]  ;;  %v4519_v40 = vld [vmem:[#allocation23 + $0x60] sm:$0xff] }
0x298b   :  { %v4044_v35 = vadd.f32 %v4041_v15, %v3971_v29  ;;  %8973 = vmatpush3.bf16.msra.mxu0 %v8972_v37  ;;  %v4333_v15 = vld [vmem:[#allocation22 + $0x68] sm:$0xff]  ;;  %v4351_v29 = vld [vmem:[#allocation22 + $0xf8] sm:$0xff] }
0x298c   :  { %9030 = vmatprep.subr.bf16.mxu0 %v9447_v5  ;;  %v4307_v37 = vld [vmem:[#allocation20 + $0x18] sm:$0xff] }
0x298d   :  { %v4046_v41 = vadd.f32 %v4045_v26, %v4044_v35  ;;  %v9000_v35 = vpack.c.bf16 %v4333_v15, %v4332_v10  ;;  %v9002_v26 = vpack.c.bf16 %v4351_v29, %v4350_v21  ;;  %v9010_v39 = vpack.c.bf16 %v4307_v37, %v4306_v47  ;;  %v4522_v47 = vld [vmem:[#allocation23 + $0x78] sm:$0xff] }
0x298f   :  { %7533 = vmatmul.mubr.f32.vlgmr.msra.gmra.mrb[48].mxu1 %v4046_v41  ;;  %v4334_v41 = vld [vmem:[#allocation22 + $0x70] sm:$0xff] }
0x2990   :  { %8977 = vmatpush3.bf16.msra.mxu1 %v8976_v25  ;;  %4427 = vmatprep.mubr.f32.mxu1 %v4360_v30  ;;  %v9004_v31 = vpack.c.bf16 %v4335_v51, %v4334_v41  ;;  %v4310_v25 = vld [vmem:[#allocation20 + $0x30] sm:$0xff]  ;;  %v4515_v30 = vld [vmem:[#allocation23 + $0x40] sm:$0xff]  ;;  %v4299_v41 = vld [vmem:[%s10960_s14] sm:$0x1] }
0x2991   :  { %8979 = vmatprep.subr.bf16.mxu1 %v8978_v62  ;;  %v4311_v62 = vld [vmem:[#allocation20 + $0x38] sm:$0xff]  ;;  %v9043_v34 = vpack.c.bf16 %v4516_v32, %v4515_v30 }
0x2992   :  { %v9016_v4 = vpack.c.bf16 %v4311_v62, %v4310_v25  ;;  %v4601_v25 = vld [vmem:[#allocation25 + $0x30] sm:$0xff]  ;;  %v4602_v62 = vld [vmem:[#allocation25 + $0x38] sm:$0xff] }
0x2994   :  { %8981 = vmatpush3.bf16.msra.mxu1 %v8980_v54  ;;  %v4315_v54 = vld [vmem:[#allocation20 + $0x58] sm:$0xff] }
0x2995   :  { %8983 = vmatprep.subr.bf16.mxu1 %v8982_v57 }
0x2998   :  { %8985 = vmatpush3.bf16.msra.mxu1 %v8984_v6  ;;  %v9028_v6 = vpack.c.bf16 %v4319_v3, %v4318_v2  ;;  %v4503_v3 = vld [vmem:[%s10963_s17] sm:$0x1]  ;;  %s9450_s17 = smov [#allocation26]  }
0x2999   :  { %8987 = vmatprep.subr.bf16.mxu1 %v8986_v7  ;;  %v4507_v7 = vld [vmem:[#allocation23] sm:$0xff]  ;;  %s4689_s29 = sshll.u32 %s9450_s17, 4  ;;  %s4690_s29 = int_to_ptr.vmem [resolvable:$true] %s4689_s29 }
0x299a   :  { %v9031_v12 = vpack.c.bf16 %v4508_v56, %v4507_v7  ;;  %s9368_s30 = scalar_lea.vmem %s4690_s29, 16  ;;  %s9372_s3 = scalar_lea.vmem %s4690_s29, 32 }
0x299b   :  { %p9369_p12 = scmp.ne.s32.totalorder %s4690_s29, %s9368_s30  ;;  %p9373_p13 = scmp.lt.s32.totalorder %s4690_s29, %s4690_s29 }
0x299c   :  { %8989 = vmatpush3.bf16.msra.mxu1 %v8988_v22  ;;  %v9037_v22 = vpack.c.bf16 %v4512_v19, %v4511_v18  ;;  %p9374_p0 = scmp.lt.s32.totalorder %s9372_s3, %s9368_s30 }
0x299d   :  { %8991 = vmatprep.subr.bf16.mxu1 %v8990_v23  ;;  %v4513_v23 = vld [vmem:[#allocation23 + $0x30] sm:$0xff] }
0x299e   :  { %v9040_v28 = vpack.c.bf16 %v4514_v27, %v4513_v23  ;;  %p9375_p1 = por %p9374_p0, %p9373_p13 }
0x29a0   :  { %8993 = vmatpush3.bf16.msra.mxu1 %v8992_v36  ;;  %p9376_p2 = pnand %p9375_p1, %p9369_p12 }
0x29a1   :  { %8995 = vmatprep.subr.bf16.mxu1 %v8994_v38  ;;  %v4517_v38 = vld [vmem:[#allocation23 + $0x50] sm:$0xff] }
0x29a2   :  { %v9046_v46 = vpack.c.bf16 %v4518_v42, %v4517_v38 }
0x29a4   :  { %8997 = vmatpush3.bf16.msra.mxu1 %v8996_v48 }
0x29a5   :  { %8999 = vmatprep.subr.bf16.mxu1 %v8998_v49 }
0x29a8   :  { %9001 = vmatpush3.bf16.msra.mxu1 %v9000_v35 }
0x29a9   :  { %9003 = vmatprep.subr.bf16.mxu1 %v9002_v26 }
0x29ac   :  { %9005 = vmatpush3.bf16.msra.mxu1 %v9004_v31 }
0x29ad   :  { %9006 = vmatprep.subr.bf16.mxu1 %v9447_v5 }
0x29af   :  { %4428 = vmatmul.mubr.f32.vlgmr.msra.gmra.mrb[50].mxu1 %v4356_v24  ;;  %v9049_v24 = vpack.c.bf16 %v4520_v44, %v4519_v40 }
0x29b0   :  { %9008 = vmatpush3.bf16.msra.mxu1 %v9007_v50  ;;  %7637 = vmatprep.mubr.msk.f32.mxu1 %vm9448_vm0, %v9449_v8  ;;  %v4521_v50 = vld [vmem:[#allocation23 + $0x70] sm:$0xff] }
0x29b1   :  { %9009 = vmatprep.subr.bf16.mxu1 %v9447_v5  ;;  %v9052_v37 = vpack.c.bf16 %v4522_v47, %v4521_v50 }
0x29b4   :  { %9011 = vmatpush3.bf16.msra.mxu1 %v9010_v39  ;;  %v4595_v39 = vld [vmem:[#allocation25] sm:$0xff] }
0x29b5   :  { %9012 = vmatprep.subr.bf16.mxu1 %v9447_v5 }
0x29b8   :  { %9014 = vmatpush3.bf16.msra.mxu1 %v9013_v52  ;;  %v9055_v52 = vpack.c.bf16 %v4596_v33, %v4595_v39 }
0x29b9   :  { %9015 = vmatprep.subr.bf16.mxu1 %v9447_v5 }
0x29bc   :  { %9017 = vmatpush3.bf16.msra.mxu1 %v9016_v4  ;;  %v9064_v4 = vpack.c.bf16 %v4602_v62, %v4601_v25 }
0x29bd   :  { %9018 = vmatprep.subr.bf16.mxu1 %v9447_v5 }
0x29c0   :  { %9020 = vmatpush3.bf16.msra.mxu1 %v9019_v53  ;;  %v9067_v53 = vpack.c.bf16 %v4604_v17, %v4603_v13 }
0x29c1   :  { %9021 = vmatprep.subr.bf16.mxu1 %v9447_v5 }
0x2a62   :  { %v4113_v55 = vpop.f32.mrb[48].mxu1 }
0x2a63   :  { %v4114_v60 = vadd.f32 %v10840_v1, %v4113_v55  ;;  %v7534_v0 = vpop.f32.mrb[49].mxu1  ;;  %v4314_v1 = vld [vmem:[#allocation20 + $0x50] sm:$0xff]  ;;  %v4598_v55 = vld [vmem:[#allocation25 + $0x18] sm:$0xff] }
0x2a64   :  { %v9022_v57 = vpack.c.bf16 %v4315_v54, %v4314_v1  ;;  %v4600_v0 = vld [vmem:[#allocation25 + $0x28] sm:$0xff]  ;;  %v4605_v1 = vld [vmem:[#allocation25 + $0x50] sm:$0xff]  ;;  %v4606_v54 = vld [vmem:[#allocation25 + $0x58] sm:$0xff] }
0x2a65   :  { %4117 = vst [vmem:[%s3970_s8] sm:$0x1] %v4114_v60  ;;  %v9058_v60 = vpack.c.bf16 %v4598_v55, %v4597_v9 }
0x2a66   :  { %9023 = vmatpush3.bf16.msra.mxu1 %v9022_v57  ;;  %v9070_v57 = vpack.c.bf16 %v4606_v54, %v4605_v1 }
0x2a67   :  { %9024 = vmatprep.subr.bf16.mxu1 %v9447_v5 }
0x2a6a   :  { %9026 = vmatpush3.bf16.msra.mxu1 %v9025_v63  ;;  %v9073_v63 = vpack.c.bf16 %v4608_v61, %v4607_v58 }
0x2a6b   :  { %9027 = vmatprep.subr.bf16.mxu1 %v9447_v5 }
0x2a6c   :  { %v4118_v20 = vld [vmem:[#allocation2] sm:$0xff] }
0x2a6d   :  { %7603 = vmatmul.mubr.f32.vlgmr.msra.gmra.mrb[50].mxu0 %v4118_v20 }
0x2a6e   :  { %7672 = vmatprep.mubr.msk.f32.mxu0 %vm9448_vm0, %v9449_v8  ;;  %9029 = vmatpush3.bf16.msra.mxu1 %v9028_v6 }
0x2a6f   :  { %9054 = vmatprep.subr.bf16.mxu1 %v9447_v5  ;;  %9032 = vmatpush3.bf16.msra.mxu0 %v9031_v12  ;;  %v4609_v12 = vld [vmem:[#allocation25 + $0x70] sm:$0xff] }
0x2a70   :  { %9033 = vmatprep.subr.bf16.mxu0 %v9447_v5 }
0x2a73   :  { %9035 = vmatpush3.bf16.msra.mxu0 %v9034_v16  ;;  %v9076_v16 = vpack.c.bf16 %v4610_v14, %v4609_v12 }
0x2a74   :  { %9036 = vmatprep.subr.bf16.mxu0 %v9447_v5 }
0x2a77   :  { %9038 = vmatpush3.bf16.msra.mxu0 %v9037_v22 }
0x2a78   :  { %9039 = vmatprep.subr.bf16.mxu0 %v9447_v5 }
0x2a7b   :  { %9041 = vmatpush3.bf16.msra.mxu0 %v9040_v28 }
0x2a7c   :  { %9042 = vmatprep.subr.bf16.mxu0 %v9447_v5 }
0x2a7f   :  { %9044 = vmatpush3.bf16.msra.mxu0 %v9043_v34 }
0x2a80   :  { %9045 = vmatprep.subr.bf16.mxu0 %v9447_v5 }
0x2a82   :  { %v5731_v36 = vpop.f32.mrb[50].mxu1 }
0x2a83   :  { %v5732_v43 = vpop.f32.mrb[51].mxu1  ;;  %9047 = vmatpush3.bf16.msra.mxu0 %v9046_v46 }
0x2a84   :  { %v10895_v45 = vadd.f32 %v5732_v43, %v5731_v36  ;;  %9048 = vmatprep.subr.bf16.mxu0 %v9447_v5 }
0x2a87   :  { %9050 = vmatpush3.bf16.msra.mxu0 %v9049_v24 }
0x2a88   :  { %9051 = vmatprep.subr.bf16.mxu0 %v9447_v5 }
0x2a8b   :  { %9053 = vmatpush3.bf16.msra.mxu0 %v9052_v37 }
0x2b40   :  { %v4288_v48 = vpop.f32.mrb[50].mxu0 }
0x2b41   :  { %v4292_v49 = vrot.slane %v4288_v48, 4  ;;  %v7604_v10 = vpop.f32.mrb[51].mxu0 }
0x2b43   :  { %v4293_v15 = vadd.f32 %v4292_v49, %v4288_v48 }
0x2b45   :  { %v4294_v21 = vrot.slane %v4293_v15, 2 }
0x2b47   :  { %v4295_v29 = vadd.f32 %v4294_v21, %v4293_v15 }
0x2b49   :  { %v4296_v35 = vrot.slane %v4295_v29, 1 }
0x2b4b   :  { %v4297_v26 = vadd.f32 %v4296_v35, %v4295_v29 }
0x2b4d   :  { %v4298_v51 = vmul.f32 0.16666667, %v4297_v26 }
0x2b4f   :  { %v4300_v59 = vadd.f32 %v4299_v41, %v4298_v51 }
0x2b51   :  { %v4301_v31 = vmax.f32 %v4300_v59, 0.0 }
0x2b53   :  { %7638 = vmatmul.mubr.f32.vlgmr.msra.gmra.mrb[52].mxu1 %v4301_v31 }
0x2b54   :  { %7707 = vmatprep.mubr.msk.f32.mxu1 %vm9448_vm0, %v9449_v8  ;;  %9056 = vmatpush3.bf16.msra.mxu1 %v9055_v52  ;;  %v4599_v8 = vld [vmem:[#allocation25 + $0x20] sm:$0xff] }
0x2b55   :  { %9057 = vmatprep.subr.bf16.mxu1 %v9447_v5  ;;  %v9061_v20 = vpack.c.bf16 %v4600_v0, %v4599_v8 }
0x2b58   :  { %9059 = vmatpush3.bf16.msra.mxu1 %v9058_v60 }
0x2b59   :  { %9060 = vmatprep.subr.bf16.mxu1 %v9447_v5 }
0x2b5c   :  { %9062 = vmatpush3.bf16.msra.mxu1 %v9061_v20 }
0x2b5d   :  { %9063 = vmatprep.subr.bf16.mxu1 %v9447_v5 }
0x2b60   :  { %9065 = vmatpush3.bf16.msra.mxu1 %v9064_v4 }
0x2b61   :  { %9066 = vmatprep.subr.bf16.mxu1 %v9447_v5 }
0x2b64   :  { %9068 = vmatpush3.bf16.msra.mxu1 %v9067_v53 }
0x2b65   :  { %9069 = vmatprep.subr.bf16.mxu1 %v9447_v5 }
0x2b68   :  { %9071 = vmatpush3.bf16.msra.mxu1 %v9070_v57 }
0x2b69   :  { %9072 = vmatprep.subr.bf16.mxu1 %v9447_v5 }
0x2b6c   :  { %9074 = vmatpush3.bf16.msra.mxu1 %v9073_v63 }
0x2b6d   :  { %9075 = vmatprep.subr.bf16.mxu1 %v9447_v5  ;;  %v4523_v5 = vld [vmem:[%s10965_s19] sm:$0x1] }
0x2b70   :  { %9077 = vmatpush3.bf16.msra.mxu1 %v9076_v16 }
0x2c26   :  { %v4499_v2 = vpop.f32.mrb[52].mxu1 }
0x2c27   :  { %v4500_v6 = vadd.f32 %v10895_v45, %v4499_v2  ;;  %v7639_v7 = vpop.f32.mrb[53].mxu1 }
0x2c29   :  { %v4504_v56 = vadd.f32 %v4503_v3, %v4500_v6 }
0x2c2b   :  { %v4506_v11 = vmax.f32 %v4504_v56, 0.0  ;;  %4505 = vst [vmem:[#allocation26] sm:$0x1] %v4504_v56 }
0x2c2d   :  { %7673 = vmatmul.mubr.f32.vlgmr.msra.gmra.mrb[52].mxu0 %v4506_v11 }
0x2d00   :  { %v4590_v18 = vpop.f32.mrb[52].mxu0 }
0x2d01   :  { %v4591_v19 = vadd.f32 %v4590_v18, %v4523_v5  ;;  %v7674_v22 = vpop.f32.mrb[53].mxu0 }
0x2d03   :  { %v4594_v23 = vmax.f32 %v4591_v19, 0.0 }
0x2d05   :  { %7708 = vmatmul.mubr.f32.vlgmr.msra.gmra.mrb[54].mxu1 %v4594_v23 }
0x2d06   :  { %9379 = shalt.err (!%p9376_p2)
}
0x2d07   :  { %s9380_s19 = scalar_lea.hbm %s10968_s22, 16 }
0x2d08   :  { %p9381_p3 = scmp.ne.s32.totalorder %s10968_s22, %s9380_s19  ;;  %p9384_p4 = scmp.lt.u32.totalorder %s9380_s19, %s10968_s22 }
0x2d0a   :  { %p9386_p5 = pnand %p9384_p4, %p9381_p3 }
0x2d0c   :  { %9389 = shalt.err (!%p9386_p5)
}
0x2d0d   :  { %4692 = dma.vmem_to_hbm [thread:$0]  %s4690_s29, 16, %s10968_s22, [#allocation6]  }
0x2d0e   :  { %s10994_s9 = sld [smem:[#allocation47_spill]]  ;;  %s9451_s11 = smov [#allocation27]  }
0x2d0f   :  { %s4699_s7 = sshll.u32 %s9451_s11, 4  ;;  %s4700_s7 = int_to_ptr.vmem [resolvable:$true] %s4699_s7 }
0x2d10   :  { %s9390_s12 = scalar_lea.vmem %s4700_s7, 16  ;;  %s9394_s2 = scalar_lea.vmem %s4700_s7, 32 }
0x2d11   :  { %p9391_p6 = scmp.ne.s32.totalorder %s4700_s7, %s9390_s12  ;;  %p9395_p7 = scmp.lt.s32.totalorder %s4700_s7, %s4700_s7 }
0x2d12   :  { %p9396_p8 = scmp.lt.s32.totalorder %s9394_s2, %s9390_s12 }
0x2d14   :  { %v4611_v27 = vld [vmem:[%s10994_s9] sm:$0x1]  ;;  %p9397_p9 = por %p9396_p8, %p9395_p7 }
0x2d16   :  { %p9398_p10 = pnand %p9397_p9, %p9391_p6 }
0x2dd8   :  { %v4678_v28 = vpop.f32.mrb[54].mxu1 }
0x2dd9   :  { %v4679_v30 = vadd.f32 %v4678_v28, %v4611_v27  ;;  %v7709_v32 = vpop.f32.mrb[55].mxu1 }
0x2ddb   :  { %4682 = vst [vmem:[#allocation27] sm:$0x1] %v4679_v30 }
0x2ddc   :  { %9401 = shalt.err (!%p9398_p10)
}
0x2ddd   :  { %s10995_s27 = sld [smem:[#allocation48_spill]] }
0x2de3   :  { %s9402_s10 = scalar_lea.hbm %s10995_s27, 16 }
0x2de4   :  { %p9403_p11 = scmp.ne.s32.totalorder %s10995_s27, %s9402_s10  ;;  %p9406_p12 = scmp.lt.u32.totalorder %s9402_s10, %s10995_s27 }
0x2de6   :  { %p9408_p13 = pnand %p9406_p12, %p9403_p11 }
0x2de8   :  { %9411 = shalt.err (!%p9408_p13)
}
0x2de9   :  { %4702 = dma.vmem_to_hbm [thread:$0]  %s4700_s7, 16, %s10995_s27, [#allocation28]  }
0x2dea   :  { %9428 = dma.done.wait [#allocation6], 16  }
0x2deb   :  { %9429 = vsyncadd [#allocation6], 4294967280 }
0x2dec   :  { %9430 = dma.done.wait [#allocation28], 16  }
0x2ded   :  { %9431 = vsyncadd [#allocation28], 4294967280 }
0x2dee   :  { %4709 = vsyncpa [#allocation5], 1 }
0x2def   :  { %4710 = vsyncpa [#allocation12], 1 }
0x2df0   :  { %4711 = vsyncpa [#allocation15], 1 }
0x2df1   :  { %4712 = vsyncpa [#allocation18], 1 }
0x2df2   :  { %4713 = vsyncpa [#allocation21], 1 }
0x2df3   :  { %4714 = vsyncpa [#allocation24], 1 }
0x2df4   :  { %4715 = vsyncpa [#allocation6], 1 }
0x2df5   :  { %4716 = vsyncpa [#allocation28], 1 }
0x2df6   :  { %4717 = vsyncpa [#allocation7], 1 }
0x2df7   :  { %4718 = vsyncpa [#allocation8], 1 }

</bundles_post_ra>
